<compile_context>
chip_gen: v7x
topology: tpu7x:2x2x1
jax: 0.10.0
libtpu: 0.0.40
codegen_flags: <defaults>
</compile_context>

<pallas_src>
import functools

import jax
import jax.numpy as jnp
from jax import lax
from jax.experimental import pallas as pl
from jax.experimental.pallas import tpu as pltpu


def _round_up(x, m):
    return (x + m - 1) // m * m


# ---------------------------------------------------------------------------
# Kernel
# ---------------------------------------------------------------------------
def _pointnet_kernel(p_ref,                          # (bt, dim, T)  compute dtype
                     w_pos_ref, b_pos_ref,           # (dim, 2H), (1, 2H)
                     w0_ref, b0_ref,                 # (2H, H),  (1, H)
                     w1_ref, b1_ref,
                     w2_ref, b2_ref,
                     w3_ref, b3_ref,
                     wc_ref, bc_ref,                 # (H, c),   (1, c)
                     out_ref,                        # (bt, c)   float32
                     net_ref,                        # scratch (bt, T, H) compute dtype
                     *, tc):                         # static T-chunk length
    bt, dim, T = p_ref.shape
    hidden = w0_ref.shape[1]
    n_chunks = T // tc
    nrows = bt * tc
    f32 = jnp.float32

    def mxu(x, w, b=None):
        y = jnp.dot(x.astype(w.dtype), w, preferred_element_type=f32)
        return y if b is None else y + b.astype(f32)

    def chunk_start(c):
        if isinstance(c, int):
            return c * tc                            # static path
        return pl.multiple_of(c * tc, tc)            # tc is a multiple of 128 here

    def chunk_loop(body, init):
        if n_chunks == 1:
            return body(0, init)                     # fully static, no loop machinery
        return lax.fori_loop(0, n_chunks, body, init)

    neg_inf = jnp.full((bt, hidden), -jnp.inf, f32)

    # ---- pass 0: fc_pos + fc_0, streamed over T-chunks into net_ref --------
    b_pos = b_pos_ref[...].astype(f32)
    if dim <= 8:
        w_pos_rows = [w_pos_ref[k:k + 1, :].astype(f32) for k in range(dim)]
    w0 = w0_ref[...]
    b0 = b0_ref[...]

    def pass0(c, pooled):
        s = chunk_start(c)
        pc = p_ref[:, :, pl.ds(s, tc)]                                  # (bt, dim, tc)
        # one small XLU relayout per chunk: (bt, dim, tc) -> (bt*tc, dim)
        x = jnp.transpose(pc, (0, 2, 1)).reshape(nrows, dim)
        if dim <= 8:
            # K=dim matmul would waste the MXU K-dim; rank-1 VPU FMAs instead.
            y = x[:, 0:1].astype(f32) * w_pos_rows[0]
            for k in range(1, dim):
                y = y + x[:, k:k + 1].astype(f32) * w_pos_rows[k]
            y = y + b_pos
        else:
            y = mxu(x, w_pos_ref[...], b_pos_ref[...])
        net = mxu(jax.nn.relu(y), w0, b0)                               # (nrows, H) f32
        net3 = net.reshape(bt, tc, hidden)
        net_ref[:, pl.ds(s, tc), :] = net3.astype(net_ref.dtype)
        return jnp.maximum(pooled, jnp.max(net3, axis=1))

    pooled = chunk_loop(pass0, neg_inf)

    # ---- fc_1 / fc_2 / fc_3: factored pooled branch, in place over net_ref --
    #   fc(relu(cat([net, pooled]))) == relu(net)@W[:H] + (relu(pooled)@W[H:] + b)
    # pooled is the (pre-ReLU) max of the PREVIOUS layer's output, as in PyTorch.
    def layer(pooled, w_ref, b_ref):
        row = mxu(jax.nn.relu(pooled), w_ref[hidden:, :], b_ref[...])   # (bt, H)
        w_main = w_ref[:hidden, :]

        def body(c, new_pooled):
            s = chunk_start(c)
            cur = net_ref[:, pl.ds(s, tc), :]                           # (bt, tc, H)
            main = mxu(jax.nn.relu(cur.reshape(nrows, hidden)), w_main)
            out3 = main.reshape(bt, tc, hidden) + row[:, None, :]       # f32
            net_ref[:, pl.ds(s, tc), :] = out3.astype(net_ref.dtype)
            return jnp.maximum(new_pooled, jnp.max(out3, axis=1))

        return chunk_loop(body, neg_inf)

    pooled = layer(pooled, w1_ref, b1_ref)
    pooled = layer(pooled, w2_ref, b2_ref)
    pooled = layer(pooled, w3_ref, b3_ref)

    # ---- final pool is already in `pooled`; fc_c -----------------------------
    out_ref[...] = mxu(jax.nn.relu(pooled), wc_ref[...], bc_ref[...]
                       ).astype(out_ref.dtype)


# ---------------------------------------------------------------------------
# Wrapper helpers
# ---------------------------------------------------------------------------
def _vmem_capacity_bytes():
    """Generation-aware VMEM capacity; conservative fallback (v7x) if unknown."""
    try:
        cap = int(getattr(pltpu.get_tpu_info(), "vmem_capacity_bytes"))
        if cap > 0:
            return cap
    except Exception:
        pass
    return 64 * 2 ** 20


def _choose_chunk(T):
    """(chunk length, padded T).  Single chunk for small clouds; 128-aligned
    chunks otherwise so in-kernel lane-axis slices of the (bt, dim, T) input
    stay 128-aligned.  T-padding repeats the last point (exact under max)."""
    if T <= 1024:
        t_pad = _round_up(T, 8)
        return t_pad, t_pad
    for k in (512, 256, 128):
        t_pad = _round_up(T, k)
        if t_pad - T <= T // 8 or k == 128:
            return k, t_pad


def _choose_batch_tile(B, T_pad, tc, dim, hidden, c_dim, item, vmem_limit):
    """Largest multiple-of-8 batch tile whose per-step footprint fits a VMEM
    budget, while keeping >= 2 grid steps when the batch allows it."""
    budget = int(0.6 * vmem_limit)
    weight_bytes = 2 * (dim * 2 * hidden + 2 * hidden
                        + 4 * (2 * hidden * hidden + hidden)
                        + hidden * c_dim + c_dim) * item

    def footprint(bt):
        net = bt * T_pad * hidden * item                                  # scratch
        p_blk = 2 * bt * _round_up(dim, 8) * _round_up(T_pad, 128) * item  # dbl-buffered
        out = 2 * bt * max(c_dim, 128) * 4
        temps = 8 * bt * tc * hidden * 4                                  # live f32 chunk temps
        return net + p_blk + out + temps + weight_bytes

    bt = 8
    max_bt = max(8, (_round_up(B, 8) // 2) // 8 * 8)   # keep >= 2 steps when possible
    while bt * 2 <= max_bt and bt * T_pad < 1024 and footprint(bt * 2) <= budget:
        bt *= 2
    while bt > 8 and footprint(bt) > budget:
        bt //= 2
    # TODO(synk): bt < 8 (very large T on v7x) would need a sub-8 output block or a
    # two-level pipeline over T; we keep bt >= 8 and rely on the VMEM limit headroom.
    return bt


# ---------------------------------------------------------------------------
# Public wrapper
# ---------------------------------------------------------------------------
def simple_pointnet_pallas(p, params, *, batch_tile=None,
                           compute_dtype=jnp.bfloat16):
    """p: (B, T, dim) float32.  params: dict of (in,out) weights / (1,out) biases.

    compute_dtype=bf16 (default) feeds the MXU its native input dtype with fp32
    accumulation; use jnp.float32 for bit-tight comparisons (tighter tolerance).
    """
    B, T, dim = p.shape
    hidden = params["w0"].shape[1]
    c_dim = params["wc"].shape[1]
    item = jnp.dtype(compute_dtype).itemsize

    # ---- T chunking + padding (repeat last point: exact under max pooling) --
    tc, T_pad = _choose_chunk(T)

    # ---- transpose to (B, dim, T): lane axis = T (dense DMA, 8/3 sublane pad)
    pt = jnp.transpose(p, (0, 2, 1)).astype(compute_dtype)
    if T_pad != T:
        pt = jnp.pad(pt, ((0, 0), (0, 0), (0, T_pad - T)), mode="edge")

    # ---- generation-aware VMEM cap with headroom ----------------------------
    cap = _vmem_capacity_bytes()
    vmem_limit = int(max(32 * 2 ** 20, min(0.85 * cap, cap - 8 * 2 ** 20)))

    if batch_tile is None:
        bt = _choose_batch_tile(B, T_pad, tc, dim, hidden, c_dim, item, vmem_limit)
    else:
        bt = max(8, _round_up(int(batch_tile), 8))

    b_pad = _round_up(B, bt)
    if b_pad != B:
        pt = jnp.pad(pt, ((0, b_pad - B), (0, 0), (0, 0)))   # independent, sliced off
    grid = (b_pad // bt,)

    weight_order = ["w_pos", "b_pos", "w0", "b0", "w1", "b1",
                    "w2", "b2", "w3", "b3", "wc", "bc"]
    weight_args = [params[k].astype(compute_dtype) for k in weight_order]

    in_specs = [pl.BlockSpec((bt, dim, T_pad), lambda b: (b, 0, 0))]
    # Constant-index weight blocks: fetched once, kept resident across the grid.
    in_specs += [pl.BlockSpec(a.shape, lambda b: (0, 0)) for a in weight_args]

    # advisory cost estimate so XLA can schedule around the custom call
    flops = b_pad * (T_pad * (2 * dim * 2 * hidden + 2 * 2 * hidden * hidden
                              + 6 * hidden * hidden)
                     + 6 * hidden * hidden + 2 * hidden * c_dim)
    weight_bytes = sum(int(a.size) * a.dtype.itemsize for a in weight_args)
    cost = pl.CostEstimate(flops=int(flops), transcendentals=0,
                           bytes_accessed=int(pt.size * item + weight_bytes
                                              + b_pad * c_dim * 4))

    kernel = functools.partial(_pointnet_kernel, tc=tc)
    out = pl.pallas_call(
        kernel,
        out_shape=jax.ShapeDtypeStruct((b_pad, c_dim), jnp.float32),
        grid=grid,
        in_specs=in_specs,
        out_specs=pl.BlockSpec((bt, c_dim), lambda b: (b, 0)),
        scratch_shapes=[pltpu.VMEM((bt, T_pad, hidden), compute_dtype)],
        compiler_params=pltpu.CompilerParams(
            dimension_semantics=("parallel",),
            vmem_limit_bytes=vmem_limit),
        cost_estimate=cost,
    )(pt, *weight_args)
    return out[:B]


# ---------------------------------------------------------------------------
# Reference / params
# ---------------------------------------------------------------------------
def init_params(key, dim=3, hidden_dim=128, c_dim=128):
    """Deterministic synthetic init (PyTorch-Linear-like uniform scaling)."""
    def linear(key, fan_in, fan_out):
        kw, kb = jax.random.split(key)
        bound = 1.0 / jnp.sqrt(fan_in)
        w = jax.random.uniform(kw, (fan_in, fan_out), jnp.float32, -bound, bound)
        b = jax.random.uniform(kb, (1, fan_out), jnp.float32, -bound, bound)
        return w, b

    keys = jax.random.split(key, 6)
    params = {}
    params["w_pos"], params["b_pos"] = linear(keys[0], dim, 2 * hidden_dim)
    params["w0"], params["b0"] = linear(keys[1], 2 * hidden_dim, hidden_dim)
    params["w1"], params["b1"] = linear(keys[2], 2 * hidden_dim, hidden_dim)
    params["w2"], params["b2"] = linear(keys[3], 2 * hidden_dim, hidden_dim)
    params["w3"], params["b3"] = linear(keys[4], 2 * hidden_dim, hidden_dim)
    params["wc"], params["bc"] = linear(keys[5], hidden_dim, c_dim)
    return params


def simple_pointnet_ref(p, params):
    """Pure-JAX reference mirroring the PyTorch forward exactly."""
    relu = jax.nn.relu

    def fc(x, w, b):
        return x @ w + b

    net = fc(p, params["w_pos"], params["b_pos"])
    net = fc(relu(net), params["w0"], params["b0"])
    for k in ("1", "2", "3"):
        pooled = jnp.max(net, axis=1, keepdims=True)
        pooled = jnp.broadcast_to(pooled, net.shape)
        net = jnp.concatenate([net, pooled], axis=2)
        net = fc(relu(net), params["w" + k], params["b" + k])
    net = jnp.max(net, axis=1)
    return fc(relu(net), params["wc"], params["bc"])


if __name__ == "__main__":
    # Small but lane-dense config: module defaults hidden=c_dim=128, dim=3.
    B, T, dim = 16, 64, 3
    hidden_dim, c_dim = 128, 128

    key = jax.random.PRNGKey(0)
    k_p, k_params = jax.random.split(key)
    p = jax.random.normal(k_p, (B, T, dim), dtype=jnp.float32)
    params = init_params(k_params, dim=dim, hidden_dim=hidden_dim, c_dim=c_dim)
    ref = simple_pointnet_ref(p, params)

    # 1) fp32 path (tight tolerance): validates the kernel structure exactly.
    out_f32 = jax.block_until_ready(
        simple_pointnet_pallas(p, params, compute_dtype=jnp.float32))
    assert out_f32.shape == (B, c_dim)
    err = jnp.max(jnp.abs(out_f32 - ref))
    assert jnp.allclose(out_f32, ref, atol=1e-4, rtol=1e-4), f"f32 max abs err {err}"

    # 2) default bf16 path (native MXU input dtype): relaxed tolerances.
    out_bf16 = jax.block_until_ready(simple_pointnet_pallas(p, params))
    assert out_bf16.shape == (B, c_dim)
    err = jnp.max(jnp.abs(out_bf16 - ref))
    assert jnp.allclose(out_bf16, ref, atol=5e-2, rtol=5e-2), f"bf16 max abs err {err}"

    # 3) ragged batch (B=5) + non-multiple-of-8 point count (T=13): exercises
    #    zero padding over B and edge-repeat padding over T.
    p_r = p[:5, :13]
    ref_r = simple_pointnet_ref(p_r, params)
    out_r = jax.block_until_ready(
        simple_pointnet_pallas(p_r, params, compute_dtype=jnp.float32))
    assert out_r.shape == (5, c_dim)
    err = jnp.max(jnp.abs(out_r - ref_r))
    assert jnp.allclose(out_r, ref_r, atol=1e-4, rtol=1e-4), f"ragged max abs err {err}"

    print("KERNEL_OK")
</pallas_src>

<mosaic_0001>
module attributes {stable_mosaic.version = 11 : i64} {
  func.func @_pointnet_kernel(%arg0: i32, %arg1: memref<8x3x64xf32, #tpu.memory_space<vmem>>, %arg2: memref<3x256xf32, #tpu.memory_space<vmem>>, %arg3: memref<1x256xf32, #tpu.memory_space<vmem>>, %arg4: memref<256x128xf32, #tpu.memory_space<vmem>>, %arg5: memref<1x128xf32, #tpu.memory_space<vmem>>, %arg6: memref<256x128xf32, #tpu.memory_space<vmem>>, %arg7: memref<1x128xf32, #tpu.memory_space<vmem>>, %arg8: memref<256x128xf32, #tpu.memory_space<vmem>>, %arg9: memref<1x128xf32, #tpu.memory_space<vmem>>, %arg10: memref<256x128xf32, #tpu.memory_space<vmem>>, %arg11: memref<1x128xf32, #tpu.memory_space<vmem>>, %arg12: memref<128x128xf32, #tpu.memory_space<vmem>>, %arg13: memref<1x128xf32, #tpu.memory_space<vmem>>, %arg14: memref<8x128xf32, #tpu.memory_space<vmem>>, %arg15: memref<8x64x128xf32, #tpu.memory_space<vmem>>) attributes {dimension_semantics = [#tpu.dimension_semantics<parallel>], iteration_bounds = array<i64: 2>, scalar_prefetch = 0 : i64, scratch_operands = 1 : i64, tpu.core_type = #tpu.core_type<tc>, window_params = [{transform_indices = @transform_0, window_bounds = array<i64: 8, 3, 64>}, {pipeline_mode = #tpu.pipeline_mode<synchronous>, transform_indices = @transform_1, window_bounds = array<i64: 3, 256>}, {pipeline_mode = #tpu.pipeline_mode<synchronous>, transform_indices = @transform_2, window_bounds = array<i64: 1, 256>}, {pipeline_mode = #tpu.pipeline_mode<synchronous>, transform_indices = @transform_3, window_bounds = array<i64: 256, 128>}, {pipeline_mode = #tpu.pipeline_mode<synchronous>, transform_indices = @transform_4, window_bounds = array<i64: 1, 128>}, {pipeline_mode = #tpu.pipeline_mode<synchronous>, transform_indices = @transform_5, window_bounds = array<i64: 256, 128>}, {pipeline_mode = #tpu.pipeline_mode<synchronous>, transform_indices = @transform_6, window_bounds = array<i64: 1, 128>}, {pipeline_mode = #tpu.pipeline_mode<synchronous>, transform_indices = @transform_7, window_bounds = array<i64: 256, 128>}, {pipeline_mode = #tpu.pipeline_mode<synchronous>, transform_indices = @transform_8, window_bounds = array<i64: 1, 128>}, {pipeline_mode = #tpu.pipeline_mode<synchronous>, transform_indices = @transform_9, window_bounds = array<i64: 256, 128>}, {pipeline_mode = #tpu.pipeline_mode<synchronous>, transform_indices = @transform_10, window_bounds = array<i64: 1, 128>}, {pipeline_mode = #tpu.pipeline_mode<synchronous>, transform_indices = @transform_11, window_bounds = array<i64: 128, 128>}, {pipeline_mode = #tpu.pipeline_mode<synchronous>, transform_indices = @transform_12, window_bounds = array<i64: 1, 128>}, {transform_indices = @transform_13, window_bounds = array<i64: 8, 128>}]} {
    %cst = arith.constant 0xFF800000 : f32
    %0 = vector.broadcast %cst : f32 to vector<8x128xf32>
    %c0 = arith.constant 0 : index
    %c0_0 = arith.constant 0 : index
    %1 = vector.load %arg3[%c0, %c0_0] : memref<1x256xf32, #tpu.memory_space<vmem>>, vector<1x256xf32>
    %c0_1 = arith.constant 0 : index
    %c0_2 = arith.constant 0 : index
    %2 = vector.load %arg2[%c0_1, %c0_2] : memref<3x256xf32, #tpu.memory_space<vmem>>, vector<1x256xf32>
    %c1 = arith.constant 1 : index
    %c0_3 = arith.constant 0 : index
    %3 = vector.load %arg2[%c1, %c0_3] : memref<3x256xf32, #tpu.memory_space<vmem>>, vector<1x256xf32>
    %c2 = arith.constant 2 : index
    %c0_4 = arith.constant 0 : index
    %4 = vector.load %arg2[%c2, %c0_4] : memref<3x256xf32, #tpu.memory_space<vmem>>, vector<1x256xf32>
    %c0_5 = arith.constant 0 : index
    %c0_6 = arith.constant 0 : index
    %5 = vector.load %arg4[%c0_5, %c0_6] : memref<256x128xf32, #tpu.memory_space<vmem>>, vector<256x128xf32>
    %c0_7 = arith.constant 0 : index
    %c0_8 = arith.constant 0 : index
    %6 = vector.load %arg5[%c0_7, %c0_8] : memref<1x128xf32, #tpu.memory_space<vmem>>, vector<1x128xf32>
    %c0_9 = arith.constant 0 : index
    %c0_10 = arith.constant 0 : index
    %c0_11 = arith.constant 0 : index
    %7 = vector.load %arg1[%c0_9, %c0_10, %c0_11] : memref<8x3x64xf32, #tpu.memory_space<vmem>>, vector<8x3x64xf32>
    %8 = tpu.transpose %7, [0, 2, 1] : vector<8x3x64xf32> -> vector<8x64x3xf32>
    %9 = vector.shape_cast %8 : vector<8x64x3xf32> to vector<512x3xf32>
    %10 = vector.extract_strided_slice %9 {offsets = [0, 0], sizes = [512, 1], strides = [1, 1]} : vector<512x3xf32> to vector<512x1xf32>
    %11 = vector.broadcast %10 : vector<512x1xf32> to vector<512x256xf32>
    %12 = vector.broadcast %2 : vector<1x256xf32> to vector<512x256xf32>
    %13 = arith.mulf %11, %12 : vector<512x256xf32>
    %14 = vector.extract_strided_slice %9 {offsets = [0, 1], sizes = [512, 1], strides = [1, 1]} : vector<512x3xf32> to vector<512x1xf32>
    %15 = vector.broadcast %14 : vector<512x1xf32> to vector<512x256xf32>
    %16 = vector.broadcast %3 : vector<1x256xf32> to vector<512x256xf32>
    %17 = arith.mulf %15, %16 : vector<512x256xf32>
    %18 = arith.addf %13, %17 : vector<512x256xf32>
    %19 = vector.extract_strided_slice %9 {offsets = [0, 2], sizes = [512, 1], strides = [1, 1]} : vector<512x3xf32> to vector<512x1xf32>
    %20 = vector.broadcast %19 : vector<512x1xf32> to vector<512x256xf32>
    %21 = vector.broadcast %4 : vector<1x256xf32> to vector<512x256xf32>
    %22 = arith.mulf %20, %21 : vector<512x256xf32>
    %23 = arith.addf %18, %22 : vector<512x256xf32>
    %24 = vector.broadcast %1 : vector<1x256xf32> to vector<512x256xf32>
    %25 = arith.addf %23, %24 : vector<512x256xf32>
    %cst_12 = arith.constant 0.000000e+00 : f32
    %26 = vector.broadcast %cst_12 : f32 to vector<512x256xf32>
    %27 = arith.maximumf %25, %26 : vector<512x256xf32>
    %cst_13 = arith.constant dense<0.000000e+00> : vector<512x128xf32>
    %28 = tpu.matmul %27, %5, %cst_13 {dimension_numbers = #tpu.dot_dimension_numbers<[1], [0], [0], [1], [0, 0, 1, 1], [], []>} : vector<512x256xf32>, vector<256x128xf32>, vector<512x128xf32> -> vector<512x128xf32>
    %29 = vector.broadcast %6 : vector<1x128xf32> to vector<512x128xf32>
    %30 = arith.addf %28, %29 : vector<512x128xf32>
    %31 = vector.shape_cast %30 : vector<512x128xf32> to vector<8x64x128xf32>
    %c0_14 = arith.constant 0 : index
    %c0_15 = arith.constant 0 : index
    %c0_16 = arith.constant 0 : index
    %32 = vector.load %arg15[%c0_14, %c0_15, %c0_16] : memref<8x64x128xf32, #tpu.memory_space<vmem>>, vector<8x64x128xf32>
    tpu.vector_store %arg15[%c0_14, %c0_15, %c0_16], %31 {strides = array<i32>} : memref<8x64x128xf32, #tpu.memory_space<vmem>>, vector<8x64x128xf32>,
    %cst_17 = arith.constant dense<0xFF800000> : vector<8x128xf32>
    %33 = vector.multi_reduction <maximumf>, %31, %cst_17 [1] : vector<8x64x128xf32> to vector<8x128xf32>
    %34 = arith.maximumf %0, %33 : vector<8x128xf32>
    %cst_18 = arith.constant 0.000000e+00 : f32
    %35 = vector.broadcast %cst_18 : f32 to vector<8x128xf32>
    %36 = arith.maximumf %34, %35 : vector<8x128xf32>
    %c128 = arith.constant 128 : index
    %c0_19 = arith.constant 0 : index
    %37 = vector.load %arg6[%c128, %c0_19] : memref<256x128xf32, #tpu.memory_space<vmem>>, vector<128x128xf32>
    %c0_20 = arith.constant 0 : index
    %c0_21 = arith.constant 0 : index
    %38 = vector.load %arg7[%c0_20, %c0_21] : memref<1x128xf32, #tpu.memory_space<vmem>>, vector<1x128xf32>
    %cst_22 = arith.constant dense<0.000000e+00> : vector<8x128xf32>
    %39 = tpu.matmul %36, %37, %cst_22 {dimension_numbers = #tpu.dot_dimension_numbers<[1], [0], [0], [1], [0, 0, 1, 1], [], []>} : vector<8x128xf32>, vector<128x128xf32>, vector<8x128xf32> -> vector<8x128xf32>
    %40 = vector.broadcast %38 : vector<1x128xf32> to vector<8x128xf32>
    %41 = arith.addf %39, %40 : vector<8x128xf32>
    %c0_23 = arith.constant 0 : index
    %c0_24 = arith.constant 0 : index
    %42 = vector.load %arg6[%c0_23, %c0_24] : memref<256x128xf32, #tpu.memory_space<vmem>>, vector<128x128xf32>
    %c0_25 = arith.constant 0 : index
    %c0_26 = arith.constant 0 : index
    %c0_27 = arith.constant 0 : index
    %43 = vector.load %arg15[%c0_25, %c0_26, %c0_27] : memref<8x64x128xf32, #tpu.memory_space<vmem>>, vector<8x64x128xf32>
    %44 = vector.shape_cast %43 : vector<8x64x128xf32> to vector<512x128xf32>
    %cst_28 = arith.constant 0.000000e+00 : f32
    %45 = vector.broadcast %cst_28 : f32 to vector<512x128xf32>
    %46 = arith.maximumf %44, %45 : vector<512x128xf32>
    %cst_29 = arith.constant dense<0.000000e+00> : vector<512x128xf32>
    %47 = tpu.matmul %46, %42, %cst_29 {dimension_numbers = #tpu.dot_dimension_numbers<[1], [0], [0], [1], [0, 0, 1, 1], [], []>} : vector<512x128xf32>, vector<128x128xf32>, vector<512x128xf32> -> vector<512x128xf32>
    %48 = vector.shape_cast %47 : vector<512x128xf32> to vector<8x64x128xf32>
    %49 = vector.shape_cast %41 : vector<8x128xf32> to vector<8x1x128xf32>
    %50 = vector.broadcast %49 : vector<8x1x128xf32> to vector<8x64x128xf32>
    %51 = arith.addf %48, %50 : vector<8x64x128xf32>
    %c0_30 = arith.constant 0 : index
    %c0_31 = arith.constant 0 : index
    %c0_32 = arith.constant 0 : index
    %52 = vector.load %arg15[%c0_30, %c0_31, %c0_32] : memref<8x64x128xf32, #tpu.memory_space<vmem>>, vector<8x64x128xf32>
    tpu.vector_store %arg15[%c0_30, %c0_31, %c0_32], %51 {strides = array<i32>} : memref<8x64x128xf32, #tpu.memory_space<vmem>>, vector<8x64x128xf32>,
    %cst_33 = arith.constant dense<0xFF800000> : vector<8x128xf32>
    %53 = vector.multi_reduction <maximumf>, %51, %cst_33 [1] : vector<8x64x128xf32> to vector<8x128xf32>
    %54 = arith.maximumf %0, %53 : vector<8x128xf32>
    %cst_34 = arith.constant 0.000000e+00 : f32
    %55 = vector.broadcast %cst_34 : f32 to vector<8x128xf32>
    %56 = arith.maximumf %54, %55 : vector<8x128xf32>
    %c128_35 = arith.constant 128 : index
    %c0_36 = arith.constant 0 : index
    %57 = vector.load %arg8[%c128_35, %c0_36] : memref<256x128xf32, #tpu.memory_space<vmem>>, vector<128x128xf32>
    %c0_37 = arith.constant 0 : index
    %c0_38 = arith.constant 0 : index
    %58 = vector.load %arg9[%c0_37, %c0_38] : memref<1x128xf32, #tpu.memory_space<vmem>>, vector<1x128xf32>
    %cst_39 = arith.constant dense<0.000000e+00> : vector<8x128xf32>
    %59 = tpu.matmul %56, %57, %cst_39 {dimension_numbers = #tpu.dot_dimension_numbers<[1], [0], [0], [1], [0, 0, 1, 1], [], []>} : vector<8x128xf32>, vector<128x128xf32>, vector<8x128xf32> -> vector<8x128xf32>
    %60 = vector.broadcast %58 : vector<1x128xf32> to vector<8x128xf32>
    %61 = arith.addf %59, %60 : vector<8x128xf32>
    %c0_40 = arith.constant 0 : index
    %c0_41 = arith.constant 0 : index
    %62 = vector.load %arg8[%c0_40, %c0_41] : memref<256x128xf32, #tpu.memory_space<vmem>>, vector<128x128xf32>
    %c0_42 = arith.constant 0 : index
    %c0_43 = arith.constant 0 : index
    %c0_44 = arith.constant 0 : index
    %63 = vector.load %arg15[%c0_42, %c0_43, %c0_44] : memref<8x64x128xf32, #tpu.memory_space<vmem>>, vector<8x64x128xf32>
    %64 = vector.shape_cast %63 : vector<8x64x128xf32> to vector<512x128xf32>
    %cst_45 = arith.constant 0.000000e+00 : f32
    %65 = vector.broadcast %cst_45 : f32 to vector<512x128xf32>
    %66 = arith.maximumf %64, %65 : vector<512x128xf32>
    %cst_46 = arith.constant dense<0.000000e+00> : vector<512x128xf32>
    %67 = tpu.matmul %66, %62, %cst_46 {dimension_numbers = #tpu.dot_dimension_numbers<[1], [0], [0], [1], [0, 0, 1, 1], [], []>} : vector<512x128xf32>, vector<128x128xf32>, vector<512x128xf32> -> vector<512x128xf32>
    %68 = vector.shape_cast %67 : vector<512x128xf32> to vector<8x64x128xf32>
    %69 = vector.shape_cast %61 : vector<8x128xf32> to vector<8x1x128xf32>
    %70 = vector.broadcast %69 : vector<8x1x128xf32> to vector<8x64x128xf32>
    %71 = arith.addf %68, %70 : vector<8x64x128xf32>
    %c0_47 = arith.constant 0 : index
    %c0_48 = arith.constant 0 : index
    %c0_49 = arith.constant 0 : index
    %72 = vector.load %arg15[%c0_47, %c0_48, %c0_49] : memref<8x64x128xf32, #tpu.memory_space<vmem>>, vector<8x64x128xf32>
    tpu.vector_store %arg15[%c0_47, %c0_48, %c0_49], %71 {strides = array<i32>} : memref<8x64x128xf32, #tpu.memory_space<vmem>>, vector<8x64x128xf32>,
    %cst_50 = arith.constant dense<0xFF800000> : vector<8x128xf32>
    %73 = vector.multi_reduction <maximumf>, %71, %cst_50 [1] : vector<8x64x128xf32> to vector<8x128xf32>
    %74 = arith.maximumf %0, %73 : vector<8x128xf32>
    %cst_51 = arith.constant 0.000000e+00 : f32
    %75 = vector.broadcast %cst_51 : f32 to vector<8x128xf32>
    %76 = arith.maximumf %74, %75 : vector<8x128xf32>
    %c128_52 = arith.constant 128 : index
    %c0_53 = arith.constant 0 : index
    %77 = vector.load %arg10[%c128_52, %c0_53] : memref<256x128xf32, #tpu.memory_space<vmem>>, vector<128x128xf32>
    %c0_54 = arith.constant 0 : index
    %c0_55 = arith.constant 0 : index
    %78 = vector.load %arg11[%c0_54, %c0_55] : memref<1x128xf32, #tpu.memory_space<vmem>>, vector<1x128xf32>
    %cst_56 = arith.constant dense<0.000000e+00> : vector<8x128xf32>
    %79 = tpu.matmul %76, %77, %cst_56 {dimension_numbers = #tpu.dot_dimension_numbers<[1], [0], [0], [1], [0, 0, 1, 1], [], []>} : vector<8x128xf32>, vector<128x128xf32>, vector<8x128xf32> -> vector<8x128xf32>
    %80 = vector.broadcast %78 : vector<1x128xf32> to vector<8x128xf32>
    %81 = arith.addf %79, %80 : vector<8x128xf32>
    %c0_57 = arith.constant 0 : index
    %c0_58 = arith.constant 0 : index
    %82 = vector.load %arg10[%c0_57, %c0_58] : memref<256x128xf32, #tpu.memory_space<vmem>>, vector<128x128xf32>
    %c0_59 = arith.constant 0 : index
    %c0_60 = arith.constant 0 : index
    %c0_61 = arith.constant 0 : index
    %83 = vector.load %arg15[%c0_59, %c0_60, %c0_61] : memref<8x64x128xf32, #tpu.memory_space<vmem>>, vector<8x64x128xf32>
    %84 = vector.shape_cast %83 : vector<8x64x128xf32> to vector<512x128xf32>
    %cst_62 = arith.constant 0.000000e+00 : f32
    %85 = vector.broadcast %cst_62 : f32 to vector<512x128xf32>
    %86 = arith.maximumf %84, %85 : vector<512x128xf32>
    %cst_63 = arith.constant dense<0.000000e+00> : vector<512x128xf32>
    %87 = tpu.matmul %86, %82, %cst_63 {dimension_numbers = #tpu.dot_dimension_numbers<[1], [0], [0], [1], [0, 0, 1, 1], [], []>} : vector<512x128xf32>, vector<128x128xf32>, vector<512x128xf32> -> vector<512x128xf32>
    %88 = vector.shape_cast %87 : vector<512x128xf32> to vector<8x64x128xf32>
    %89 = vector.shape_cast %81 : vector<8x128xf32> to vector<8x1x128xf32>
    %90 = vector.broadcast %89 : vector<8x1x128xf32> to vector<8x64x128xf32>
    %91 = arith.addf %88, %90 : vector<8x64x128xf32>
    %c0_64 = arith.constant 0 : index
    %c0_65 = arith.constant 0 : index
    %c0_66 = arith.constant 0 : index
    %92 = vector.load %arg15[%c0_64, %c0_65, %c0_66] : memref<8x64x128xf32, #tpu.memory_space<vmem>>, vector<8x64x128xf32>
    tpu.vector_store %arg15[%c0_64, %c0_65, %c0_66], %91 {strides = array<i32>} : memref<8x64x128xf32, #tpu.memory_space<vmem>>, vector<8x64x128xf32>,
    %cst_67 = arith.constant dense<0xFF800000> : vector<8x128xf32>
    %93 = vector.multi_reduction <maximumf>, %91, %cst_67 [1] : vector<8x64x128xf32> to vector<8x128xf32>
    %94 = arith.maximumf %0, %93 : vector<8x128xf32>
    %cst_68 = arith.constant 0.000000e+00 : f32
    %95 = vector.broadcast %cst_68 : f32 to vector<8x128xf32>
    %96 = arith.maximumf %94, %95 : vector<8x128xf32>
    %c0_69 = arith.constant 0 : index
    %c0_70 = arith.constant 0 : index
    %97 = vector.load %arg12[%c0_69, %c0_70] : memref<128x128xf32, #tpu.memory_space<vmem>>, vector<128x128xf32>
    %c0_71 = arith.constant 0 : index
    %c0_72 = arith.constant 0 : index
    %98 = vector.load %arg13[%c0_71, %c0_72] : memref<1x128xf32, #tpu.memory_space<vmem>>, vector<1x128xf32>
    %cst_73 = arith.constant dense<0.000000e+00> : vector<8x128xf32>
    %99 = tpu.matmul %96, %97, %cst_73 {dimension_numbers = #tpu.dot_dimension_numbers<[1], [0], [0], [1], [0, 0, 1, 1], [], []>} : vector<8x128xf32>, vector<128x128xf32>, vector<8x128xf32> -> vector<8x128xf32>
    %100 = vector.broadcast %98 : vector<1x128xf32> to vector<8x128xf32>
    %101 = arith.addf %99, %100 : vector<8x128xf32>
    %c0_74 = arith.constant 0 : index
    %c0_75 = arith.constant 0 : index
    %102 = vector.load %arg14[%c0_74, %c0_75] : memref<8x128xf32, #tpu.memory_space<vmem>>, vector<8x128xf32>
    tpu.vector_store %arg14[%c0_74, %c0_75], %101 {strides = array<i32>} : memref<8x128xf32, #tpu.memory_space<vmem>>, vector<8x128xf32>,
    return
  }
  func.func @transform_0(%arg0: i32) -> (i32, i32, i32) {
    %c0_i32 = arith.constant 0 : i32
    %c0_i32_0 = arith.constant 0 : i32
    %c0_i32_1 = arith.constant 0 : i32
    return %arg0, %c0_i32, %c0_i32_0 : i32, i32, i32
  }
  func.func @transform_1(%arg0: i32) -> (i32, i32) {
    %c0_i32 = arith.constant 0 : i32
    %c0_i32_0 = arith.constant 0 : i32
    %c0_i32_1 = arith.constant 0 : i32
    return %c0_i32, %c0_i32_0 : i32, i32
  }
  func.func @transform_2(%arg0: i32) -> (i32, i32) {
    %c0_i32 = arith.constant 0 : i32
    %c0_i32_0 = arith.constant 0 : i32
    %c0_i32_1 = arith.constant 0 : i32
    return %c0_i32, %c0_i32_0 : i32, i32
  }
  func.func @transform_3(%arg0: i32) -> (i32, i32) {
    %c0_i32 = arith.constant 0 : i32
    %c0_i32_0 = arith.constant 0 : i32
    %c0_i32_1 = arith.constant 0 : i32
    return %c0_i32, %c0_i32_0 : i32, i32
  }
  func.func @transform_4(%arg0: i32) -> (i32, i32) {
    %c0_i32 = arith.constant 0 : i32
    %c0_i32_0 = arith.constant 0 : i32
    %c0_i32_1 = arith.constant 0 : i32
    return %c0_i32, %c0_i32_0 : i32, i32
  }
  func.func @transform_5(%arg0: i32) -> (i32, i32) {
    %c0_i32 = arith.constant 0 : i32
    %c0_i32_0 = arith.constant 0 : i32
    %c0_i32_1 = arith.constant 0 : i32
    return %c0_i32, %c0_i32_0 : i32, i32
  }
  func.func @transform_6(%arg0: i32) -> (i32, i32) {
    %c0_i32 = arith.constant 0 : i32
    %c0_i32_0 = arith.constant 0 : i32
    %c0_i32_1 = arith.constant 0 : i32
    return %c0_i32, %c0_i32_0 : i32, i32
  }
  func.func @transform_7(%arg0: i32) -> (i32, i32) {
    %c0_i32 = arith.constant 0 : i32
    %c0_i32_0 = arith.constant 0 : i32
    %c0_i32_1 = arith.constant 0 : i32
    return %c0_i32, %c0_i32_0 : i32, i32
  }
  func.func @transform_8(%arg0: i32) -> (i32, i32) {
    %c0_i32 = arith.constant 0 : i32
    %c0_i32_0 = arith.constant 0 : i32
    %c0_i32_1 = arith.constant 0 : i32
    return %c0_i32, %c0_i32_0 : i32, i32
  }
  func.func @transform_9(%arg0: i32) -> (i32, i32) {
    %c0_i32 = arith.constant 0 : i32
    %c0_i32_0 = arith.constant 0 : i32
    %c0_i32_1 = arith.constant 0 : i32
    return %c0_i32, %c0_i32_0 : i32, i32
  }
  func.func @transform_10(%arg0: i32) -> (i32, i32) {
    %c0_i32 = arith.constant 0 : i32
    %c0_i32_0 = arith.constant 0 : i32
    %c0_i32_1 = arith.constant 0 : i32
    return %c0_i32, %c0_i32_0 : i32, i32
  }
  func.func @transform_11(%arg0: i32) -> (i32, i32) {
    %c0_i32 = arith.constant 0 : i32
    %c0_i32_0 = arith.constant 0 : i32
    %c0_i32_1 = arith.constant 0 : i32
    return %c0_i32, %c0_i32_0 : i32, i32
  }
  func.func @transform_12(%arg0: i32) -> (i32, i32) {
    %c0_i32 = arith.constant 0 : i32
    %c0_i32_0 = arith.constant 0 : i32
    %c0_i32_1 = arith.constant 0 : i32
    return %c0_i32, %c0_i32_0 : i32, i32
  }
  func.func @transform_13(%arg0: i32) -> (i32, i32) {
    %c0_i32 = arith.constant 0 : i32
    %c0_i32_0 = arith.constant 0 : i32
    return %arg0, %c0_i32 : i32, i32
  }
}

</mosaic_0001>

<bundles_post_ra>
// kernel: tpu_custom_call.1
= control target key start
LH: loop header
LB: loop body
LE: loop exit
PB: predicated region body
PF: predicated region fallthrough
CT: control target
= control target key end

     0   :  { %s10463_s0 = inlined_call_operand.vmem [shape: f32[16,3,64], index: 0, kind: input, shape index: {}]   ;;  %s10464_s1 = inlined_call_operand.vmem [shape: f32[3,256], index: 1, kind: input, shape index: {}]   ;;  %s10465_s2 = inlined_call_operand.vmem [shape: f32[1,256], index: 2, kind: input, shape index: {}]   ;;  %s10466_s3 = inlined_call_operand.hbm [shape: f32[256,128], index: 3, kind: input, shape index: {}]   ;;  %s10467_s4 = inlined_call_operand.vmem [shape: f32[1,128], index: 4, kind: input, shape index: {}]   ;;  %s10468_s5 = inlined_call_operand.hbm [shape: f32[256,128], index: 5, kind: input, shape index: {}]   ;;  %s10469_s6 = inlined_call_operand.vmem [shape: f32[1,128], index: 6, kind: input, shape index: {}]   ;;  %s10470_s7 = inlined_call_operand.hbm [shape: f32[256,128], index: 7, kind: input, shape index: {}]   ;;  %s10471_s8 = inlined_call_operand.vmem [shape: f32[1,128], index: 8, kind: input, shape index: {}]   ;;  %s10472_s9 = inlined_call_operand.hbm [shape: f32[256,128], index: 9, kind: input, shape index: {}]   ;;  %s10473_s10 = inlined_call_operand.vmem [shape: f32[1,128], index: 10, kind: input, shape index: {}]   ;;  %s10474_s11 = inlined_call_operand.vmem [shape: f32[128,128], index: 11, kind: input, shape index: {}]   ;;  %s10475_s12 = inlined_call_operand.vmem [shape: f32[1,128], index: 12, kind: input, shape index: {}]   ;;  %s10476_s13 = inlined_call_operand.hbm [shape: f32[16,128], index: 13, kind: output, shape index: {}]  }
   0x1   :  { %10584 = sst [smem:[#allocation48_spill]] %s10475_s12 }
   0x2   :  { %10585 = sst [smem:[#allocation49_spill]] %s10476_s13 }
   0x3   :  { %18 = vsyncpa [#allocation4], 0 }
   0x4   :  { %19 = vsyncpa [#allocation7], 0 }
   0x5   :  { %20 = vsyncpa [#allocation10], 0 }
   0x6   :  { %21 = vsyncpa [#allocation5], 0 }
   0x7   :  { %23 = vsyncpa [#allocation5 + $0x1], 0  ;;  %s7878_s25 = smov 0   ;;  %s7880_s26 = smov 0  }
   0x8   :  { %s7882_s27 = smov 0   ;;  %s7884_s28 = smov 0  }
   0x9 LB: > { %10586 = sst [smem:[#allocation16_spill]] %s7780_s25  ;;  %s7899_s29 = sadd.s32 4294967295, %s7792_s28   ;;  %s7792_s28 = sphi %s7884_s28, %s10773_s28   ;;  %s7788_s27 = sphi %s7882_s27, %s10775_s27   ;;  %s7784_s26 = sphi %s7880_s26, %s10777_s26   ;;  %s7780_s25 = sphi %s7878_s25, %s10776_s25  }
   0xa   : > { %10587 = sst [smem:[#allocation17_spill]] %s7788_s27  ;;  %s6277_s30 = sadd.s32 4294967294, %s7792_s28  }
   0xb   : > { %10588 = sst [smem:[#allocation18_spill]] %s7792_s28  ;;  %s7903_s14 = sadd.s32 1, %s7792_s28  }
   0xc   : > { %10589 = sst [smem:[#allocation19_spill]] %s7903_s14  ;;  %s314_s15 = sadd.s32 1, %s7788_s27 }
   0xd   : > { %s311_s16 = ssub.s32 %s7792_s28, %s7903_s14  ;;  %p324_p0 = scmp.ne.s32.totalorder %s7788_s27, %s7784_s26 }
   0xe   : > { %p312_p1 = scmp.eq.s32.totalorder %s311_s16, 0  ;;  %p325_p2 = scmp.eq.s32.totalorder %s7899_s29, 1 }
   0xf   : > { %p330_p3 = scmp.ne.s32.totalorder %s7784_s26, %s7780_s25  ;;  %p331_p4 = scmp.eq.s32.totalorder %s6277_s30, 1 }
  0x10   : > { %s7914_s17 = scalar_select %p312_p1, %s7788_s27, %s314_s15  }
  0x11   : > { %p7916_p5 = por %p325_p2, %p324_p0  ;;  %p7920_p6 = por %p331_p4, %p330_p3 }
  0x12   : > { %10590 = sst [smem:[#allocation20_spill]] %s7914_s17  ;;  %p6278_p7 = scmp.ge.s32.totalorder %s7792_s28, 1 }
  0x13   : > { %s10591_s18 = scalar_select %p7916_p5, 1, 0 }
  0x14   : > { %s10593_s19 = scalar_select %p7920_p6, 1, 0 }
  0x15   : > { %10592 = sst [smem:[#allocation21_spill]] %s10591_s18  ;;  %p338_p8 = scmp.lt.s32.totalorder %s7792_s28, 3 }
  0x16   : > { %10594 = sst [smem:[#allocation22_spill]] %s10593_s19  ;;  %p10482_p9 = scmp.eq.s32.totalorder %s7899_s29, 0 }
  0x17   : > { %p7927_p10 = pnand %p6278_p7, %p338_p8  ;;  %s7794_s21 = smov [#allocation6]  }
  0x18   : > { %s372_s22 = sshll.u32 %s7794_s21, 4  ;;  %s7795_s24 = smov [#allocation3]   ;;  %s7933_s22 = int_to_ptr.vmem [resolvable:$true] %s372_s22 }
  0x19   : > { %s10595_s20 = scalar_select %p7927_p10, 1, 0 }
  0x1a   : > { %p7409_p11 = pneg %p7927_p10  ;;  %s356_s30 = sshll.u32 %s7795_s24, 4  ;;  %s7941_s30 = int_to_ptr.vmem [resolvable:$true] %s356_s30 }
  0x1b   : > { %s7796_s15 = smov [#allocation8]   ;;  %s7606_s14 = scalar_lea.hbm %s10468_s5, 4096 }
  0x1c   : > { %p7937_p12 = pnand %p10482_p9, %p7409_p11  ;;  %s7943_s16 = sshll.u32 %s7796_s15, 4  ;;  %s389_s16 = int_to_ptr.vmem [resolvable:$true] %s7943_s16 }
  0x1d   : > { %p7607_p13 = scmp.ne.s32.totalorder %s10468_s5, %s7606_s14  ;;  %p7613_p3 = scmp.lt.u32.totalorder %s7606_s14, %s10468_s5 }
  0x1e   : > { %p7953_p0 = pneg %p7937_p12 }
  0x20   : > { %p7609_p1 = pnand %p7953_p0, %p7607_p13 }
  0x22   : > { %p7610_p2 = pneg %p7609_p1 }
  0x24   : > { %p7615_p4 = pnand %p7613_p3, %p7610_p2 }
  0x26   : > { %7618 = shalt.err (!%p7615_p4)
}
  0x27   : > { %s7619_s27 = scalar_lea.vmem %s7933_s22, 4096  ;;  %p7627_p9 = scmp.lt.s32.totalorder %s7933_s22, %s7933_s22 }
  0x28   : > { %p7620_p7 = scmp.ne.s32.totalorder %s7933_s22, %s7619_s27  ;;  %p7628_p6 = scmp.lt.s32.totalorder %s7619_s27, %s7619_s27 }
  0x2a   : > { %p7622_p8 = pnand %p7620_p7, %p7953_p0  ;;  %p7629_p13 = por %p7628_p6, %p7627_p9 }
  0x2c   : > { %p7623_p11 = pneg %p7622_p8 }
  0x2e   : > { %p7630_p1 = pnand %p7629_p13, %p7623_p11 }
  0x30   : > { %7633 = shalt.err (!%p7630_p1)
}
  0x31   : > { %s7797_s17 = smov 128   ;;  %s7798_s14 = smov 8  }
  0x32   : > { %7415 = dma.hbm_to_vmem [thread:$0]  (!%p7937_p12), %s10468_s5, 4096, %s7933_s22, [#allocation7], %s7797_s17, %s7797_s17, %s7798_s14  }
  0x33   : > { %s7634_s27 = scalar_lea.hbm %s10466_s3, 4096 }
  0x34   : > { %p7635_p6 = scmp.ne.s32.totalorder %s10466_s3, %s7634_s27  ;;  %p7641_p3 = scmp.lt.u32.totalorder %s7634_s27, %s10466_s3 }
  0x36   : > { %p7637_p9 = pnand %p7635_p6, %p7953_p0 }
  0x38   : > { %p7638_p2 = pneg %p7637_p9 }
  0x3a   : > { %p7643_p4 = pnand %p7641_p3, %p7638_p2 }
  0x3c   : > { %7646 = shalt.err (!%p7643_p4)
}
  0x3d   : > { %s7647_s22 = scalar_lea.vmem %s7941_s30, 4096  ;;  %p7655_p13 = scmp.lt.s32.totalorder %s7941_s30, %s7941_s30 }
  0x3e   : > { %p7648_p7 = scmp.ne.s32.totalorder %s7941_s30, %s7647_s22  ;;  %p7656_p1 = scmp.lt.s32.totalorder %s7647_s22, %s7647_s22 }
  0x40   : > { %p7650_p8 = pnand %p7648_p7, %p7953_p0  ;;  %p7657_p6 = por %p7656_p1, %p7655_p13 }
  0x42   : > { %p7651_p11 = pneg %p7650_p8 }
  0x44   : > { %p7658_p9 = pnand %p7657_p6, %p7651_p11 }
  0x46   : > { %7661 = shalt.err (!%p7658_p9)
}
  0x47   : > { %7412 = dma.hbm_to_vmem [thread:$0]  (!%p7937_p12), %s10466_s3, 4096, %s7941_s30, [#allocation4], %s7797_s17, %s7797_s17, %s7798_s14  }
  0x48   : > { %s7662_s19 = scalar_lea.hbm %s10470_s7, 4096 }
  0x49   : > { %p7663_p2 = scmp.ne.s32.totalorder %s10470_s7, %s7662_s19  ;;  %p7669_p7 = scmp.lt.u32.totalorder %s7662_s19, %s10470_s7 }
  0x4b   : > { %p7665_p3 = pnand %p7663_p2, %p7953_p0 }
  0x4d   : > { %p7666_p4 = pneg %p7665_p3 }
  0x4f   : > { %p7671_p8 = pnand %p7669_p7, %p7666_p4 }
  0x51   : > { %7674 = shalt.err (!%p7671_p8)
}
  0x52   : > { %s7675_s22 = scalar_lea.vmem %s389_s16, 4096  ;;  %p7683_p6 = scmp.lt.s32.totalorder %s389_s16, %s389_s16 }
  0x53   : > { %p7676_p11 = scmp.ne.s32.totalorder %s389_s16, %s7675_s22  ;;  %p7684_p9 = scmp.lt.s32.totalorder %s7675_s22, %s7675_s22 }
  0x55   : > { %p7678_p13 = pnand %p7676_p11, %p7953_p0  ;;  %p7685_p5 = por %p7684_p9, %p7683_p6 }
  0x57   : > { %p7679_p1 = pneg %p7678_p13 }
  0x59   : > { %p7686_p10 = pnand %p7685_p5, %p7679_p1 }
  0x5b   : > { %7689 = shalt.err (!%p7686_p10)
}
  0x5c   : > { %7418 = dma.hbm_to_vmem [thread:$0]  (!%p7937_p12), %s10470_s7, 4096, %s389_s16, [#allocation7], %s7797_s17, %s7797_s17, %s7798_s14  }
  0x5d   : > { %s7799_s13 = smov [#allocation9]   ;;  %s7690_s21 = scalar_lea.hbm %s10472_s9, 4096 }
  0x5e   : > { %s404_s28 = sshll.u32 %s7799_s13, 4  ;;  %p7691_p5 = scmp.ne.s32.totalorder %s10472_s9, %s7690_s21  ;;  %s405_s28 = int_to_ptr.vmem [resolvable:$true] %s404_s28 }
  0x5f   : > { %p7697_p3 = scmp.lt.u32.totalorder %s7690_s21, %s10472_s9 }
  0x60   : > { %p7693_p10 = pnand %p7691_p5, %p7953_p0 }
  0x62   : > { %p7694_p2 = pneg %p7693_p10 }
  0x64   : > { %p7699_p4 = pnand %p7697_p3, %p7694_p2 }
  0x66   : > { %7702 = shalt.err (!%p7699_p4)
}
  0x67   : > { %s7703_s16 = scalar_lea.vmem %s405_s28, 4096  ;;  %p7711_p13 = scmp.lt.s32.totalorder %s405_s28, %s405_s28 }
  0x68   : > { %p7704_p7 = scmp.ne.s32.totalorder %s405_s28, %s7703_s16  ;;  %p7712_p1 = scmp.lt.s32.totalorder %s7703_s16, %s7703_s16 }
  0x6a   : > { %p7706_p8 = pnand %p7704_p7, %p7953_p0  ;;  %p7713_p6 = por %p7712_p1, %p7711_p13 }
  0x6c   : > { %p7707_p11 = pneg %p7706_p8 }
  0x6e   : > { %p7714_p9 = pnand %p7713_p6, %p7707_p11 }
  0x70   : > { %7717 = shalt.err (!%p7714_p9)
}
  0x71   : > { %7421 = dma.hbm_to_vmem [thread:$0]  (!%p7937_p12), %s10472_s9, 4096, %s405_s28, [#allocation10], %s7797_s17, %s7797_s17, %s7798_s14  }
  0x72   : > { %p10598_p5 = scmp.ne.s32.totalorder %s10595_s20, 0 }
  0x74   : > { %438 = sbr.rel (%p10598_p5) target bundleno = 2573 (0xa0d), region = 72 }
  0x7b   : > { %p10599_p0 = scmp.eq.s32.totalorder %s7899_s29, 0 }
  0x7d   : > { %7763 = dma.done.wait (%p10599_p0), [#allocation4], 4096   ;;  %p10600_p10 = pmov %p10599_p0 }
  0x7e   : > { %p10601_p2 = pmov %p10599_p0 }
  0x7f   : > { %7765 = vsyncadd (%p10600_p10), [#allocation4], 4294963200 }
  0x80   : > { %7767 = dma.done.wait (%p10601_p2), [#allocation7], 8192   ;;  %p10602_p3 = pmov %p10599_p0 }
  0x81   : > { %p10603_p4 = pmov %p10599_p0 }
  0x82   : > { %7769 = vsyncadd (%p10602_p3), [#allocation7], 4294959104 }
  0x83   : > { %7771 = dma.done.wait (%p10603_p4), [#allocation10], 4096   ;;  %p10604_p12 = pmov %p10599_p0 }
  0x84   : > { %s6290_s25 = sshll.u32 %s7899_s29, 3  ;;  %v506_v8 = vld [vmem:[#allocation3] sm:$0xff]  ;;  %v507_v9 = vld [vmem:[#allocation3 + $0x8] sm:$0xff]  ;;  %v10489_v11 = vmov 0.0|0.0   ;;  %v508_v12 = vld [vmem:[#allocation3 + $0x10] sm:$0xff]  ;;  %v10500_v24 = vmov 0  }
  0x85   : > { %7773 = vsyncadd (%p10604_p12), [#allocation10], 4294963200  ;;  %p495_p7 = scmp.lt.s32.totalorder %s6290_s25, 15  ;;  %v7136_v10 = vpack.c.bf16 %v507_v9, %v506_v8  ;;  %7135 = vmatprep.subr.bf16.mxu0 %v10489_v11  ;;  %7183 = vmatprep.subr.bf16.mxu1 %v10489_v11  ;;  %v509_v13 = vld [vmem:[#allocation3 + $0x18] sm:$0xff]  ;;  %v510_v15 = vld [vmem:[#allocation3 + $0x20] sm:$0xff]  ;;  %v10493_v36 = vmov 1  }
  0x86   : > { %v7139_v14 = vpack.c.bf16 %v509_v13, %v508_v12  ;;  %v511_v16 = vld [vmem:[#allocation3 + $0x28] sm:$0xff]  ;;  %v512_v18 = vld [vmem:[#allocation3 + $0x30] sm:$0xff]  ;;  %v513_v19 = vld [vmem:[#allocation3 + $0x38] sm:$0xff]  ;;  %vm3173_vm0 = vcmask 1041409   ;;  %vm3175_vm1 = vcmask 1042434   ;;  %vm3177_vm2 = vcmask 1043459  }
  0x87   : > { %s10779_s25 = smov (!%p495_p7, %s6290_s25), 15  ;;  %7137 = vmatpush1.bf16.msra.mxu0 %v7136_v10  ;;  %v7142_v17 = vpack.c.bf16 %v511_v16, %v510_v15  ;;  %v7145_v20 = vpack.c.bf16 %v513_v19, %v512_v18  ;;  %v514_v21 = vld [vmem:[#allocation3 + $0x40] sm:$0xff]  ;;  %v515_v22 = vld [vmem:[#allocation3 + $0x48] sm:$0xff]  ;;  %v516_v25 = vld [vmem:[#allocation3 + $0x50] sm:$0xff]  ;;  %vm3179_vm3 = vcmask 1044484   ;;  %vm7804_vm4 = vmmov 0  }
  0x88   : > { %s6291_s20 = sshll.u32 %s10779_s25, 2  ;;  %7138 = vmatprep.subr.bf16.mxu0 %v10489_v11  ;;  %v7148_v23 = vpack.c.bf16 %v515_v22, %v514_v21  ;;  %v517_v26 = vld [vmem:[#allocation3 + $0x58] sm:$0xff]  ;;  %v518_v28 = vld [vmem:[#allocation3 + $0x60] sm:$0xff]  ;;  %v519_v29 = vld [vmem:[#allocation3 + $0x68] sm:$0xff]  ;;  %vm3181_vm5 = vcmask 1045509   ;;  %vm3183_vm6 = vcmask 1046534  }
  0x89   : > { %s498_s14 = scalar_lea.vmem %s10463_s0, %s6291_s20  ;;  %v7151_v27 = vpack.c.bf16 %v517_v26, %v516_v25  ;;  %v7154_v30 = vpack.c.bf16 %v519_v29, %v518_v28  ;;  %v520_v31 = vld [vmem:[#allocation3 + $0x70] sm:$0xff]  ;;  %v521_v32 = vld [vmem:[#allocation3 + $0x78] sm:$0xff]  ;;  %v522_v37 = vld [vmem:[#allocation3 + $0x80] sm:$0xff]  ;;  %vm3185_vm7 = vcmask 1047559   ;;  %s10764_s28 = sld [smem:[#allocation21_spill]] }
  0x8a   : > { %v541_v0 = vld [vmem:[%s498_s14 + $0x8] sm:$0x7]  ;;  %v539_v1 = vld [vmem:[%s498_s14] sm:$0x7]  ;;  %v542_v2 = vld [vmem:[%s498_s14 + $0xc] sm:$0x7]  ;;  %v7157_v33 = vpack.c.bf16 %v521_v32, %v520_v31 }
  0x8b   : > { %611 = vxpose.xlu1.b32.start.end [1/1] (short) (narrow) %v541_v0, 64  ;;  %547 = vxpose.xlu0.b32.start.end [1/1] (short) (narrow) %v539_v1, 64  ;;  %v540_v3 = vld [vmem:[%s498_s14 + $0x4] sm:$0x7]  ;;  %v544_v4 = vld [vmem:[%s498_s14 + $0x14] sm:$0x7] }
  0x8c   : > { %v543_v5 = vld [vmem:[%s498_s14 + $0x10] sm:$0x7]  ;;  %v546_v6 = vld [vmem:[%s498_s14 + $0x1c] sm:$0x7]  ;;  %v545_v7 = vld [vmem:[%s498_s14 + $0x18] sm:$0x7]  ;;  %7140 = vmatpush1.bf16.msra.mxu0 %v7139_v14 }
  0x8d   : > { %7141 = vmatprep.subr.bf16.mxu0 %v10489_v11  ;;  %v523_v38 = vld [vmem:[#allocation3 + $0x88] sm:$0xff]  ;;  %v524_v42 = vld [vmem:[#allocation3 + $0x90] sm:$0xff]  ;;  %v525_v43 = vld [vmem:[#allocation3 + $0x98] sm:$0xff]  ;;  %s491_s18 = sand.u32 1, %s7784_s26   ;;  %s10765_s15 = sld [smem:[#allocation48_spill]] }
  0x8e   : > { %v7160_v39 = vpack.c.bf16 %v523_v38, %v522_v37  ;;  %v7163_v44 = vpack.c.bf16 %v525_v43, %v524_v42  ;;  %v526_v47 = vld [vmem:[#allocation3 + $0xa0] sm:$0xff]  ;;  %v527_v48 = vld [vmem:[#allocation3 + $0xa8] sm:$0xff]  ;;  %v528_v52 = vld [vmem:[#allocation3 + $0xb0] sm:$0xff]  ;;  %s6289_s19 = sshll.u32 %s491_s18, 3  ;;  %s6300_s27 = sshll.u32 %s7899_s29, 7 }
  0x8f   : > { %v7166_v49 = vpack.c.bf16 %v527_v48, %v526_v47  ;;  %v529_v53 = vld [vmem:[#allocation3 + $0xb8] sm:$0xff]  ;;  %v530_v57 = vld [vmem:[#allocation3 + $0xc0] sm:$0xff]  ;;  %v531_v58 = vld [vmem:[#allocation3 + $0xc8] sm:$0xff]  ;;  %s493_s22 = scalar_lea.vmem [#allocation11], %s6289_s19  ;;  %s10766_s25 = sld [smem:[#allocation49_spill]] }
  0x90   : > { %7143 = vmatpush1.bf16.msra.mxu0 %v7142_v17  ;;  %v7169_v54 = vpack.c.bf16 %v529_v53, %v528_v52  ;;  %v7172_v59 = vpack.c.bf16 %v531_v58, %v530_v57  ;;  %v532_v62 = vld [vmem:[#allocation3 + $0xd0] sm:$0xff]  ;;  %v533_v63 = vld [vmem:[#allocation3 + $0xd8] sm:$0xff]  ;;  %s6177_s16 = sshll.u32 %s493_s22, 4  ;;  %s6164_s17 = scalar_lea.sflag [#allocation5], %s491_s18  ;;  %s10423_s16 = int_to_ptr.vmem [resolvable:$true] %s6177_s16 }
  0x91   : > { %7144 = vmatprep.subr.bf16.mxu0 %v10489_v11  ;;  %v7175_v0 = vpack.c.bf16 %v533_v63, %v532_v62  ;;  %v536_v9 = vld [vmem:[#allocation3 + $0xf0] sm:$0xff]  ;;  %v537_v10 = vld [vmem:[#allocation3 + $0xf8] sm:$0xff]  ;;  %s7718_s14 = scalar_lea.vmem %s10423_s16, 128  ;;  %p10768_p11 = scmp.ne.s32.totalorder %s10764_s28, 0 }
  0x92   : > { %v7181_v12 = vpack.c.bf16 %v537_v10, %v536_v9  ;;  %v6292_v9 = vld [vmem:[%s10464_s1 + $0x1] ss:$4 sm:$0x3]  ;;  %p7719_p8 = scmp.ne.s32.totalorder %s10423_s16, %s7718_s14  ;;  %s7807_s29 = smov [#allocation11]  }
  0x93   : > { %s7722_s13 = sshll.u32 %s7807_s29, 4  ;;  %s7723_s13 = int_to_ptr.vmem [resolvable:$false] %s7722_s13 }
  0x94   : > { %7146 = vmatpush1.bf16.msra.mxu0 %v7145_v20  ;;  %p7720_p13 = pnand %p7719_p8, %p10768_p11  ;;  %s7724_s19 = scalar_lea.vmem %s7723_s13, 256 }
  0x95   : > { %7147 = vmatprep.subr.bf16.mxu0 %v10489_v11  ;;  %s10767_s20 = smov %s10766_s25  ;;  %s10421_s23 = scalar_lea.hbm %s10766_s25, %s6300_s27 }
  0x96   : > { %p7721_p1 = pneg %p7720_p13  ;;  %p7725_p6 = scmp.lt.s32.totalorder %s10423_s16, %s7723_s13 }
  0x97   : > { %p7726_p9 = scmp.lt.s32.totalorder %s7724_s19, %s7718_s14 }
  0x98   : > { %7149 = vmatpush1.bf16.msra.mxu0 %v7148_v23 }
  0x99   : > { %7150 = vmatprep.subr.bf16.mxu0 %v10489_v11  ;;  %p7727_p5 = por %p7726_p9, %p7725_p6 }
  0x9b   : > { %p7728_p0 = pnand %p7727_p5, %p7721_p1 }
  0x9c   : > { %7152 = vmatpush1.bf16.msra.mxu0 %v7151_v27 }
  0x9d   : > { %7153 = vmatprep.subr.bf16.mxu0 %v10489_v11 }
  0xa0   : > { %7155 = vmatpush1.bf16.msra.mxu0 %v7154_v30 }
  0xa1   : > { %7156 = vmatprep.subr.bf16.mxu0 %v10489_v11 }
  0xa4   : > { %7158 = vmatpush1.bf16.msra.mxu0 %v7157_v33 }
  0xa5   : > { %7159 = vmatprep.subr.bf16.mxu0 %v10489_v11 }
  0xa8   : > { %643 = vxpose.xlu1.b32.start.end [1/1] (short) (narrow) %v542_v2, 64  ;;  %579 = vxpose.xlu0.b32.start.end [1/1] (short) (narrow) %v540_v3, 64  ;;  %v10491_v3 = vmov 2  }
  0xa9   : > { %7161 = vmatpush1.bf16.msra.mxu0 %v7160_v39 }
  0xaa   : > { %7162 = vmatprep.subr.bf16.mxu0 %v10489_v11 }
  0xad   : > { %7164 = vmatpush1.bf16.msra.mxu0 %v7163_v44 }
  0xae   : > { %7165 = vmatprep.subr.bf16.mxu0 %v10489_v11 }
  0xb1   : > { %7167 = vmatpush1.bf16.msra.mxu0 %v7166_v49 }
  0xb2   : > { %7168 = vmatprep.subr.bf16.mxu0 %v10489_v11 }
  0xb5   : > { %7170 = vmatpush1.bf16.msra.mxu0 %v7169_v54 }
  0xb6   : > { %7171 = vmatprep.subr.bf16.mxu0 %v10489_v11 }
  0xb9   : > { %7173 = vmatpush1.bf16.msra.mxu0 %v7172_v59 }
  0xba   : > { %7174 = vmatprep.subr.bf16.mxu0 %v10489_v11 }
  0xbd   : > { %7176 = vmatpush1.bf16.msra.mxu0 %v7175_v0 }
  0xbe   : > { %7177 = vmatprep.subr.bf16.mxu0 %v10489_v11 }
  0xc5   : > { %707 = vxpose.xlu1.b32.start.end [1/1] (short) (narrow) %v544_v4, 64  ;;  %675 = vxpose.xlu0.b32.start.end [1/1] (short) (narrow) %v543_v5, 64  ;;  %v534_v4 = vld [vmem:[#allocation3 + $0xe0] sm:$0xff]  ;;  %v535_v5 = vld [vmem:[#allocation3 + $0xe8] sm:$0xff] }
  0xe2   : > { %771 = vxpose.xlu1.b32.start.end [1/1] (short) (narrow) %v546_v6, 64  ;;  %739 = vxpose.xlu0.b32.start.end [1/1] (short) (narrow) %v545_v7, 64  ;;  %v7178_v6 = vpack.c.bf16 %v535_v5, %v534_v4 }
  0xe4   : > { %7179 = vmatpush1.bf16.msra.mxu0 %v7178_v6 }
  0xe5   : > { %7180 = vmatprep.subr.bf16.mxu0 %v10489_v11 }
  0xe8   : > { %7182 = vmatpush1.bf16.msra.mxu0 %v7181_v12 }
  0xe9   : > { %7295 = vmatprep.subr.bf16.mxu0 %v10489_v11 }
 0x100   : > { %7485 = vset.pattern.permute.xlu1 %v10500_v24 }
 0x10b   : > { %v563_v34 = vpop.trf.xlu0  ;;  %v8074_v35 = vpop.trf.xlu1  ;;  %7480 = vset.pattern.permute.xlu0 %v10493_v36 }
 0x10f   : > { %v8078_v40 = vpop.trf.xlu0  ;;  %v8080_v41 = vpop.trf.xlu1 }
 0x113   : > { %v8083_v45 = vpop.trf.xlu0  ;;  %v8085_v46 = vpop.trf.xlu1 }
 0x117   : > { %v8088_v50 = vpop.trf.xlu0  ;;  %v8090_v51 = vpop.trf.xlu1 }
 0x11b   : > { %v8093_v55 = vpop.trf.xlu0  ;;  %v8095_v56 = vpop.trf.xlu1 }
 0x11c   : > { %805 = vperm.xlu1 %7485, %v563_v34  }
 0x11f   : > { %v8098_v60 = vpop.trf.xlu0  ;;  %v8100_v61 = vpop.trf.xlu1 }
 0x120   : > { %7486 = vset.pattern.permute.xlu1 %v10493_v36 }
 0x121   : > { %1263 = vperm.xlu1 %7486, %v563_v34  }
 0x123   : > { %v8104_v1 = vpop.trf.xlu0  ;;  %v8106_v2 = vpop.trf.xlu1 }
 0x125   : > { %7487 = vset.pattern.permute.xlu1 %v10491_v3 }
 0x126   : > { %1786 = vperm.xlu1 %7487, %v563_v34  }
 0x127   : > { %v8110_v7 = vpop.trf.xlu0  ;;  %v8112_v8 = vpop.trf.xlu1 }
 0x12a   : > { %7488 = vset.pattern.permute.xlu1 %v10500_v24 }
 0x12b   : > { %810 = vperm.xlu1 %7488, %v8078_v40   ;;  %v8117_v13 = vpop.trf.xlu0  ;;  %v8119_v14 = vpop.trf.xlu1 }
 0x12c   : > { %1295 = vperm.xlu0 %7480, %v8117_v13  }
 0x12f   : > { %7489 = vset.pattern.permute.xlu1 %v10493_v36  ;;  %v8124_v15 = vpop.trf.xlu0  ;;  %v8126_v16 = vpop.trf.xlu1 }
 0x130   : > { %1267 = vperm.xlu1 %7489, %v8078_v40   ;;  %1299 = vperm.xlu0 %7480, %v8124_v15  }
 0x133   : > { %v8130_v17 = vpop.trf.xlu0  ;;  %v8132_v18 = vpop.trf.xlu1 }
 0x134   : > { %7490 = vset.pattern.permute.xlu1 %v10491_v3  ;;  %1303 = vperm.xlu0 %7480, %v8130_v17  }
 0x135   : > { %1790 = vperm.xlu1 %7490, %v8078_v40  }
 0x137   : > { %v8137_v19 = vpop.trf.xlu0  ;;  %v8139_v20 = vpop.trf.xlu1 }
 0x138   : > { %1307 = vperm.xlu0 %7480, %v8137_v19  }
 0x139   : > { %7491 = vset.pattern.permute.xlu1 %v10500_v24 }
 0x13a   : > { %815 = vperm.xlu1 %7491, %v8083_v45  }
 0x13b   : > { %v8144_v21 = vpop.trf.xlu1  ;;  %v8146_v22 = vpop.trf.xlu0 }
 0x13c   : > { %7481 = vset.pattern.permute.xlu0 %v10500_v24 }
 0x13d   : > { %820 = vperm.xlu0 %7481, %v8088_v50  }
 0x13e   : > { %7492 = vset.pattern.permute.xlu1 %v10493_v36 }
 0x13f   : > { %1271 = vperm.xlu1 %7492, %v8083_v45   ;;  %v8152_v23 = vpop.trf.xlu1  ;;  %v8154_v25 = vpop.trf.xlu0 }
 0x141   : > { %845 = vperm.xlu0 %7481, %v8117_v13  }
 0x143   : > { %7493 = vset.pattern.permute.xlu1 %v10491_v3  ;;  %v8158_v26 = vpop.trf.xlu1  ;;  %v8160_v27 = vpop.trf.xlu0 }
 0x144   : > { %1794 = vperm.xlu1 %7493, %v8083_v45  }
 0x145   : > { %855 = vperm.xlu0 %7481, %v8130_v17  }
 0x147   : > { %v8164_v28 = vpop.trf.xlu1  ;;  %v8166_v29 = vpop.trf.xlu0 }
 0x148   : > { %10605 = vst [vmem:[#allocation23_spill] sm:$0xff] %v8164_v28  ;;  %7494 = vset.pattern.permute.xlu1 %v10493_v36 }
 0x149   : > { %1275 = vperm.xlu1 %7494, %v8088_v50   ;;  %860 = vperm.xlu0 %7481, %v8137_v19  }
 0x14b   : > { %v8171_v30 = vpop.trf.xlu1  ;;  %v8173_v31 = vpop.trf.xlu0 }
 0x14c   : > { %10606 = vst [vmem:[#allocation24_spill] sm:$0xff] %v8171_v30 }
 0x14d   : > { %7495 = vset.pattern.permute.xlu1 %v10491_v3  ;;  %865 = vperm.xlu0 %7481, %v8146_v22  }
 0x14e   : > { %1798 = vperm.xlu1 %7495, %v8088_v50  }
 0x14f   : > { %v8178_v32 = vpop.trf.xlu1  ;;  %v8181_v33 = vpop.trf.xlu0 }
 0x150   : > { %10607 = vst [vmem:[#allocation25_spill] sm:$0xff] %v8178_v32  ;;  %10608 = vst [vmem:[#allocation26_spill] sm:$0xff] %v8181_v33 }
 0x151   : > { %870 = vperm.xlu0 %7481, %v8154_v25  }
 0x152   : > { %7496 = vset.pattern.permute.xlu1 %v10500_v24 }
 0x153   : > { %825 = vperm.xlu1 %7496, %v8093_v55   ;;  %v8185_v34 = vpop.trf.xlu1  ;;  %v8191_v38 = vpop.trf.xlu0 }
 0x154   : > { %10609 = vst [vmem:[#allocation27_spill] sm:$0xff] %v8185_v34 }
 0x155   : > { %885 = vperm.xlu0 %7481, %v8074_v35  }
 0x157   : > { %7497 = vset.pattern.permute.xlu1 %v10493_v36  ;;  %v8189_v37 = vpop.trf.xlu1  ;;  %v8200_v40 = vpop.trf.xlu0 }
 0x158   : > { %10610 = vst [vmem:[#allocation28_spill] sm:$0xff] %v8189_v37  ;;  %1279 = vperm.xlu1 %7497, %v8093_v55  }
 0x159   : > { %890 = vperm.xlu0 %7481, %v8080_v41  }
 0x15b   : > { %v8195_v39 = vpop.trf.xlu1  ;;  %v8209_v44 = vpop.trf.xlu0 }
 0x15c   : > { %10611 = vst [vmem:[#allocation29_spill] sm:$0xff] %v8195_v39  ;;  %7498 = vset.pattern.permute.xlu1 %v10491_v3  ;;  %10614 = vst [vmem:[#allocation32_spill] sm:$0xff] %v8209_v44 }
 0x15d   : > { %1802 = vperm.xlu1 %7498, %v8093_v55   ;;  %895 = vperm.xlu0 %7481, %v8085_v46  }
 0x15f   : > { %v8202_v42 = vpop.trf.xlu1  ;;  %v8217_v47 = vpop.trf.xlu0 }
 0x160   : > { %10612 = vst [vmem:[#allocation30_spill] sm:$0xff] %v8202_v42  ;;  %10615 = vst [vmem:[#allocation33_spill] sm:$0xff] %v8217_v47 }
 0x161   : > { %7499 = vset.pattern.permute.xlu1 %v10500_v24  ;;  %900 = vperm.xlu0 %7481, %v8090_v51  }
 0x162   : > { %830 = vperm.xlu1 %7499, %v8098_v60  }
 0x163   : > { %v8207_v43 = vpop.trf.xlu1  ;;  %v8225_v49 = vpop.trf.xlu0 }
 0x164   : > { %10613 = vst [vmem:[#allocation31_spill] sm:$0xff] %v8207_v43  ;;  %10616 = vst [vmem:[#allocation34_spill] sm:$0xff] %v8225_v49  ;;  %v500_v43 = vld [vmem:[%s10465_s2] sm:$0x3] }
 0x165   : > { %915 = vperm.xlu0 %7481, %v8106_v2  }
 0x166   : > { %7500 = vset.pattern.permute.xlu1 %v10493_v36 }
 0x167   : > { %1283 = vperm.xlu1 %7500, %v8098_v60   ;;  %v8214_v45 = vpop.trf.xlu1  ;;  %v8233_v52 = vpop.trf.xlu0 }
 0x168   : > { %10618 = vst [vmem:[#allocation36_spill] sm:$0xff] %v8233_v52 }
 0x169   : > { %920 = vperm.xlu0 %7481, %v8112_v8  }
 0x16b   : > { %7501 = vset.pattern.permute.xlu1 %v10491_v3  ;;  %v8220_v48 = vpop.trf.xlu1  ;;  %v8242_v54 = vpop.trf.xlu0 }
 0x16c   : > { %1806 = vperm.xlu1 %7501, %v8098_v60  }
 0x16d   : > { %7482 = vset.pattern.permute.xlu0 %v10491_v3 }
 0x16e   : > { %1814 = vperm.xlu0 %7482, %v8110_v7  }
 0x16f   : > { %v8229_v50 = vpop.trf.xlu1  ;;  %v8249_v57 = vpop.trf.xlu0 }
 0x170   : > { %7502 = vset.pattern.permute.xlu1 %v10500_v24  ;;  %10617 = vst [vmem:[#allocation35_spill] sm:$0xff] %v8229_v50 }
 0x171   : > { %835 = vperm.xlu1 %7502, %v8104_v1  }
 0x172   : > { %1818 = vperm.xlu0 %7482, %v8117_v13   ;;  %v501_v13 = vld [vmem:[%s10464_s1] ss:$4 sm:$0x3] }
 0x173   : > { %v8237_v53 = vpop.trf.xlu1  ;;  %v8257_v59 = vpop.trf.xlu0 }
 0x174   : > { %10619 = vst [vmem:[#allocation37_spill] sm:$0xff] %v8237_v53 }
 0x175   : > { %7503 = vset.pattern.permute.xlu1 %v10493_v36 }
 0x176   : > { %1287 = vperm.xlu1 %7503, %v8104_v1   ;;  %1822 = vperm.xlu0 %7482, %v8124_v15  }
 0x177   : > { %v8244_v55 = vpop.trf.xlu1  ;;  %v8264_v62 = vpop.trf.xlu0 }
 0x178   : > { %10620 = vst [vmem:[#allocation38_spill] sm:$0xff] %v8244_v55 }
 0x17a   : > { %7504 = vset.pattern.permute.xlu1 %v10491_v3  ;;  %1826 = vperm.xlu0 %7482, %v8130_v17  }
 0x17b   : > { %1810 = vperm.xlu1 %7504, %v8104_v1   ;;  %v8252_v58 = vpop.trf.xlu1  ;;  %v8273_v0 = vpop.trf.xlu0  ;;  %v1124_v1 = vlaneseq }
 0x17c   : > { %10621 = vst [vmem:[#allocation39_spill] sm:$0xff] %v8252_v58 }
 0x17d   : > { %v8280_v5 = vshrl.u32 %v1124_v1, 7 }
 0x17e   : > { %1838 = vperm.xlu0 %7482, %v8154_v25  }
 0x17f   : > { %7505 = vset.pattern.permute.xlu1 %v10500_v24  ;;  %v8260_v60 = vpop.trf.xlu1  ;;  %10625 = vst [vmem:[#allocation43_spill] sm:$0xff] %v8280_v5  ;;  %v8283_v6 = vpop.trf.xlu0  ;;  %v8290_v10 = vsub.s32 0, %v8280_v5  ;;  %v1130_v12 = vsub.s32 1, %v8280_v5 }
 0x180   : > { %840 = vperm.xlu1 %7505, %v8110_v7   ;;  %10622 = vst [vmem:[#allocation40_spill] sm:$0xff] %v8260_v60 }
 0x181   : > { %10626 = vst [vmem:[#allocation44_spill] sm:$0xff] %v8290_v10  ;;  %v8302_v17 = vrot.slane %v6292_v9, %v1130_v12  ;;  %v8310_v1 = vrot.slane %v501_v13, %v8290_v10  ;;  %v8312_v11 = vrot.slane %v501_v13, %v1130_v12 }
 0x182   : > { %1842 = vperm.xlu0 %7482, %v8160_v27  }
 0x183   : > { %v8269_v63 = vpop.trf.xlu1 }
 0x184   : > { %7506 = vset.pattern.permute.xlu1 %v10493_v36  ;;  %10623 = vst [vmem:[#allocation41_spill] sm:$0xff] %v8269_v63  ;;  %v10628_v63 = vmov 1  }
 0x185   : > { %1291 = vperm.xlu1 %7506, %v8110_v7  }
 0x186   : > { %1846 = vperm.xlu0 %7482, %v8166_v29  }
 0x187   : > { %v8276_v4 = vpop.trf.xlu1 }
 0x188   : > { %10624 = vst [vmem:[#allocation42_spill] sm:$0xff] %v8276_v4 }
 0x189   : > { %7507 = vset.pattern.permute.xlu1 %v10500_v24 }
 0x18a   : > { %850 = vperm.xlu1 %7507, %v8124_v15   ;;  %1850 = vperm.xlu0 %7482, %v8074_v35   ;;  %v8300_v15 = vrot.slane %v6292_v9, %v8290_v10 }
 0x18e   : > { %7508 = vset.pattern.permute.xlu1 %v10491_v3  ;;  %1854 = vperm.xlu0 %7482, %v8080_v41  }
 0x18f   : > { %1830 = vperm.xlu1 %7508, %v8137_v19   ;;  %v6293_v19 = vld [vmem:[%s10464_s1 + $0x2] ss:$4 sm:$0x3] }
 0x190   : > { %v8321_v5 = vrot.slane %v6293_v19, %v1130_v12 }
 0x192   : > { %1858 = vperm.xlu0 %7482, %v8085_v46  }
 0x193   : > { %7509 = vset.pattern.permute.xlu1 %v10493_v36 }
 0x194   : > { %1311 = vperm.xlu1 %7509, %v8146_v22  }
 0x196   : > { %1862 = vperm.xlu0 %7482, %v8090_v51  }
 0x198   : > { %7510 = vset.pattern.permute.xlu1 %v10491_v3 }
 0x199   : > { %1834 = vperm.xlu1 %7510, %v8146_v22   ;;  %v8307_v22 = vpop.trf.xlu0 }
 0x19a   : > { %1910 = vperm.xlu0 %7482, %v8164_v28   ;;  %10627 = vst [vmem:[#allocation45_spill] sm:$0xff] %v8307_v22 }
 0x19b   : > { %v806_v7 = vpop.permute.xlu1 %805 }
 0x19c   : > { %v1134_v13 = vmul.f32 %v8310_v1, %v806_v7  ;;  %v1135_v42 = vmul.f32 %v8312_v11, %v806_v7 }
 0x19d   : > { %7511 = vset.pattern.permute.xlu1 %v10493_v36  ;;  %v8329_v37 = vpop.trf.xlu0 }
 0x19e   : > { %1315 = vperm.xlu1 %7511, %v8154_v25   ;;  %1914 = vperm.xlu0 %7482, %v8173_v31   ;;  %v8315_v25 = vrot.slane %v6293_v19, %v8290_v10 }
 0x1a0   : > { %v1264_v3 = vpop.permute.xlu1 %1263 }
 0x1a1   : > { %v1529_v36 = vmul.f32 %v8300_v15, %v1264_v3  ;;  %v1530_v9 = vmul.f32 %v8302_v17, %v1264_v3  ;;  %v8332_v3 = vrot.slane %v500_v43, %v8290_v10 }
 0x1a2   : > { %7512 = vset.pattern.permute.xlu1 %v10500_v24  ;;  %1918 = vperm.xlu0 %7482, %v8181_v33   ;;  %v8334_v24 = vrot.slane %v500_v43, %v1130_v12 }
 0x1a3   : > { %875 = vperm.xlu1 %7512, %v8160_v27   ;;  %v1657_v19 = vadd.f32 %v1529_v36, %v1134_v13  ;;  %v1658_v4 = vadd.f32 %v1530_v9, %v1135_v42  ;;  %v10629_v13 = vmov 0  }
 0x1a5   : > { %v1787_v39 = vpop.permute.xlu1 %1786 }
 0x1a6   : > { %v2052_v32 = vmul.f32 %v8315_v25, %v1787_v39  ;;  %v2053_v30 = vmul.f32 %v8321_v5, %v1787_v39  ;;  %1922 = vperm.xlu0 %7482, %v8191_v38  }
 0x1a7   : > { %7513 = vset.pattern.permute.xlu1 %v10628_v63 }
 0x1a8   : > { %v2180_v60 = vadd.f32 %v2052_v32, %v1657_v19  ;;  %1319 = vperm.xlu1 %7513, %v8160_v27   ;;  %v2181_v7 = vadd.f32 %v2053_v30, %v1658_v4 }
 0x1aa   : > { %v811_v58 = vpop.permute.xlu1 %810  ;;  %1926 = vperm.xlu0 %7482, %v8200_v40   ;;  %v2320_v43 = vadd.f32 %v8334_v24, %v2181_v7  ;;  %v2319_v36 = vadd.f32 %v8332_v3, %v2180_v60 }
 0x1ab   : > { %v8344_v12 = vpop.permute.xlu0 %1295  ;;  %v1136_v60 = vmul.f32 %v8310_v1, %v811_v58  ;;  %v1137_v4 = vmul.f32 %v8312_v11, %v811_v58 }
 0x1ac   : > { %7514 = vset.pattern.permute.xlu1 %v10629_v13  ;;  %v2448_v39 = vmax.f32 %v2320_v43, 0.0  ;;  %v2447_v10 = vmax.f32 %v2319_v36, 0.0 }
 0x1ad   : > { %880 = vperm.xlu1 %7514, %v8166_v29  }
 0x1ae   : > { %7483 = vset.pattern.permute.xlu0 %v10628_v63  ;;  %2645 = vmatprep.mubr.f32.mxu0 %v2448_v39 }
 0x1af   : > { %v1268_v27 = vpop.permute.xlu1 %1267  ;;  %1323 = vperm.xlu0 %7483, %v8166_v29   ;;  %2646 = vmatmul.mubr.f32.vlgmr.msra.gmra.mrb[0].mxu0 %v2447_v10  ;;  %v8350_v30 = vpop.permute.xlu0 %1299 }
 0x1b0   : > { %v1531_v32 = vmul.f32 %v8300_v15, %v1268_v27  ;;  %v1532_v42 = vmul.f32 %v8302_v17, %v1268_v27 }
 0x1b1   : > { %7515 = vset.pattern.permute.xlu1 %v10628_v63 }
 0x1b2   : > { %1331 = vperm.xlu1 %7515, %v8080_v41   ;;  %v1659_v10 = vadd.f32 %v1531_v32, %v1136_v60  ;;  %v1660_v19 = vadd.f32 %v1532_v42, %v1137_v4  ;;  %v10630_v32 = vmov 2  }
 0x1b3   : > { %1327 = vperm.xlu0 %7483, %v8074_v35   ;;  %v8359_v9 = vpop.permute.xlu0 %1303 }
 0x1b4   : > { %v1791_v29 = vpop.permute.xlu1 %1790 }
 0x1b5   : > { %v2054_v7 = vmul.f32 %v8315_v25, %v1791_v29  ;;  %v2055_v43 = vmul.f32 %v8321_v5, %v1791_v29 }
 0x1b6   : > { %7516 = vset.pattern.permute.xlu1 %v10629_v13 }
 0x1b7   : > { %v2182_v36 = vadd.f32 %v2054_v7, %v1659_v10  ;;  %v2183_v39 = vadd.f32 %v2055_v43, %v1660_v19  ;;  %905 = vperm.xlu1 %7516, %v8095_v56   ;;  %1335 = vperm.xlu0 %7483, %v8085_v46   ;;  %v8366_v41 = vpop.permute.xlu0 %1307 }
 0x1b9   : > { %v816_v35 = vpop.permute.xlu1 %815  ;;  %v2322_v58 = vadd.f32 %v8334_v24, %v2183_v39  ;;  %v2321_v27 = vadd.f32 %v8332_v3, %v2182_v36 }
 0x1ba   : > { %v1139_v7 = vmul.f32 %v8312_v11, %v816_v35 }
 0x1bb   : > { %7517 = vset.pattern.permute.xlu1 %v10630_v32  ;;  %1339 = vperm.xlu0 %7483, %v8090_v51   ;;  %v2450_v42 = vmax.f32 %v2322_v58, 0.0  ;;  %v2449_v60 = vmax.f32 %v2321_v27, 0.0  ;;  %v1138_v51 = vmul.f32 %v8310_v1, %v816_v35 }
 0x1bc   : > { %1866 = vperm.xlu1 %7517, %v8095_v56   ;;  %v821_v4 = vpop.permute.xlu0 %820 }
 0x1bd   : > { %2650 = vmatprep.mubr.f32.mxu0 %v2450_v42 }
 0x1be   : > { %v1272_v29 = vpop.permute.xlu1 %1271  ;;  %2651 = vmatmul.mubr.f32.gmra.mrb[2].mxu0 %v2449_v60 }
 0x1bf   : > { %1343 = vperm.xlu0 %7483, %v8095_v56   ;;  %v1533_v46 = vmul.f32 %v8300_v15, %v1272_v29  ;;  %v1534_v10 = vmul.f32 %v8302_v17, %v1272_v29 }
 0x1c0   : > { %7518 = vset.pattern.permute.xlu1 %v10629_v13  ;;  %v8377_v19 = vpop.permute.xlu0 %845 }
 0x1c1   : > { %910 = vperm.xlu1 %7518, %v8100_v61   ;;  %v1661_v36 = vadd.f32 %v1533_v46, %v1138_v51  ;;  %v1662_v39 = vadd.f32 %v1534_v10, %v1139_v7  ;;  %v1140_v51 = vmul.f32 %v8310_v1, %v821_v4  ;;  %v1141_v7 = vmul.f32 %v8312_v11, %v821_v4 }
 0x1c3   : > { %v1795_v43 = vpop.permute.xlu1 %1794  ;;  %1347 = vperm.xlu0 %7483, %v8100_v61  }
 0x1c4   : > { %v2056_v56 = vmul.f32 %v8315_v25, %v1795_v43  ;;  %v2057_v58 = vmul.f32 %v8321_v5, %v1795_v43  ;;  %v8385_v27 = vpop.permute.xlu0 %855 }
 0x1c5   : > { %7519 = vset.pattern.permute.xlu1 %v10630_v32 }
 0x1c6   : > { %v2184_v42 = vadd.f32 %v2056_v56, %v1661_v36  ;;  %v2185_v60 = vadd.f32 %v2057_v58, %v1662_v39  ;;  %1870 = vperm.xlu1 %7519, %v8100_v61  }
 0x1c7   : > { %1367 = vperm.xlu0 %7483, %v8132_v18  }
 0x1c8   : > { %v1276_v35 = vpop.permute.xlu1 %1275  ;;  %v8390_v29 = vpop.permute.xlu0 %860  ;;  %v2324_v46 = vadd.f32 %v8334_v24, %v2185_v60  ;;  %v2323_v10 = vadd.f32 %v8332_v3, %v2184_v42 }
 0x1c9   : > { %v1535_v43 = vmul.f32 %v8300_v15, %v1276_v35  ;;  %v1536_v36 = vmul.f32 %v8302_v17, %v1276_v35 }
 0x1ca   : > { %7520 = vset.pattern.permute.xlu1 %v10628_v63  ;;  %v2452_v61 = vmax.f32 %v2324_v46, 0.0  ;;  %v2451_v39 = vmax.f32 %v2323_v10, 0.0 }
 0x1cb   : > { %1351 = vperm.xlu1 %7520, %v8106_v2   ;;  %1391 = vperm.xlu0 %7483, %v8173_v31   ;;  %v1663_v42 = vadd.f32 %v1535_v43, %v1140_v51  ;;  %v1664_v60 = vadd.f32 %v1536_v36, %v1141_v7 }
 0x1cc   : > { %2655 = vmatprep.mubr.f32.mxu0 %v2452_v61  ;;  %v8401_v56 = vpop.permute.xlu0 %865 }
 0x1cd   : > { %v1799_v58 = vpop.permute.xlu1 %1798  ;;  %2656 = vmatmul.mubr.f32.gmra.mrb[4].mxu0 %v2451_v39 }
 0x1ce   : > { %v2058_v4 = vmul.f32 %v8315_v25, %v1799_v58  ;;  %v2059_v55 = vmul.f32 %v8321_v5, %v1799_v58 }
 0x1cf   : > { %7521 = vset.pattern.permute.xlu1 %v10630_v32  ;;  %1399 = vperm.xlu0 %7483, %v8191_v38  }
 0x1d0   : > { %v2186_v35 = vadd.f32 %v2058_v4, %v1663_v42  ;;  %v2187_v46 = vadd.f32 %v2059_v55, %v1664_v60  ;;  %1874 = vperm.xlu1 %7521, %v8106_v2   ;;  %v8408_v10 = vpop.permute.xlu0 %870 }
 0x1d2   : > { %v826_v61 = vpop.permute.xlu1 %825  ;;  %v2326_v22 = vadd.f32 %v8334_v24, %v2187_v46  ;;  %v2325_v51 = vadd.f32 %v8332_v3, %v2186_v35 }
 0x1d3   : > { %1403 = vperm.xlu0 %7483, %v8200_v40   ;;  %v1143_v42 = vmul.f32 %v8312_v11, %v826_v61 }
 0x1d4   : > { %7522 = vset.pattern.permute.xlu1 %v10628_v63  ;;  %v8414_v7 = vpop.permute.xlu0 %885  ;;  %v2454_v43 = vmax.f32 %v2326_v22, 0.0  ;;  %v2453_v36 = vmax.f32 %v2325_v51, 0.0  ;;  %v1142_v22 = vmul.f32 %v8310_v1, %v826_v61 }
 0x1d5   : > { %1355 = vperm.xlu1 %7522, %v8112_v8  }
 0x1d6   : > { %2660 = vmatprep.mubr.f32.mxu0 %v2454_v43 }
 0x1d7   : > { %v1280_v55 = vpop.permute.xlu1 %1279  ;;  %2661 = vmatmul.mubr.f32.gmra.mrb[6].mxu0 %v2453_v36  ;;  %1407 = vperm.xlu0 %7483, %v8209_v44  }
 0x1d8   : > { %v8418_v2 = vpop.permute.xlu0 %890  ;;  %v1537_v39 = vmul.f32 %v8300_v15, %v1280_v55  ;;  %v1538_v58 = vmul.f32 %v8302_v17, %v1280_v55 }
 0x1d9   : > { %7523 = vset.pattern.permute.xlu1 %v10630_v32 }
 0x1da   : > { %1878 = vperm.xlu1 %7523, %v8112_v8   ;;  %v1665_v35 = vadd.f32 %v1537_v39, %v1142_v22  ;;  %v1666_v46 = vadd.f32 %v1538_v58, %v1143_v42 }
 0x1db   : > { %1411 = vperm.xlu0 %7483, %v8217_v47  }
 0x1dc   : > { %v1803_v60 = vpop.permute.xlu1 %1802  ;;  %v8427_v4 = vpop.permute.xlu0 %895 }
 0x1dd   : > { %v2060_v51 = vmul.f32 %v8315_v25, %v1803_v60  ;;  %v2061_v43 = vmul.f32 %v8321_v5, %v1803_v60 }
 0x1de   : > { %7524 = vset.pattern.permute.xlu1 %v10629_v13 }
 0x1df   : > { %v2188_v36 = vadd.f32 %v2060_v51, %v1665_v35  ;;  %v2189_v55 = vadd.f32 %v2061_v43, %v1666_v46  ;;  %925 = vperm.xlu1 %7524, %v8119_v14   ;;  %1431 = vperm.xlu0 %7483, %v8185_v34  }
 0x1e0   : > { %v8434_v8 = vpop.permute.xlu0 %900 }
 0x1e1   : > { %v831_v61 = vpop.permute.xlu1 %830  ;;  %v2328_v47 = vadd.f32 %v8334_v24, %v2189_v55  ;;  %v2327_v39 = vadd.f32 %v8332_v3, %v2188_v36 }
 0x1e2   : > { %v1145_v43 = vmul.f32 %v8312_v11, %v831_v61 }
 0x1e3   : > { %7525 = vset.pattern.permute.xlu1 %v10628_v63  ;;  %v2456_v58 = vmax.f32 %v2328_v47, 0.0  ;;  %v2455_v22 = vmax.f32 %v2327_v39, 0.0  ;;  %7484 = vset.pattern.permute.xlu0 %v10629_v13  ;;  %v1144_v47 = vmul.f32 %v8310_v1, %v831_v61 }
 0x1e4   : > { %1359 = vperm.xlu1 %7525, %v8119_v14   ;;  %v8441_v42 = vpop.permute.xlu0 %915  ;;  %965 = vperm.xlu0 %7484, %v8173_v31  }
 0x1e5   : > { %10631 = vst [vmem:[#allocation46_spill] sm:$0xff] %v8441_v42  ;;  %2665 = vmatprep.mubr.f32.mxu0 %v2456_v58  ;;  %v1552_v42 = vmul.f32 %v8302_v17, %v8366_v41 }
 0x1e6   : > { %v1284_v60 = vpop.permute.xlu1 %1283  ;;  %2666 = vmatmul.mubr.f32.gmra.mrb[8].mxu0 %v2455_v22 }
 0x1e7   : > { %v1539_v35 = vmul.f32 %v8300_v15, %v1284_v60  ;;  %v1540_v46 = vmul.f32 %v8302_v17, %v1284_v60 }
 0x1e8   : > { %7526 = vset.pattern.permute.xlu1 %v10630_v32  ;;  %v8447_v51 = vpop.permute.xlu0 %920  ;;  %970 = vperm.xlu0 %7484, %v8181_v33   ;;  %v1551_v33 = vmul.f32 %v8300_v15, %v8366_v41 }
 0x1e9   : > { %10632 = vst [vmem:[#allocation47_spill] sm:$0xff] %v8447_v51  ;;  %1882 = vperm.xlu1 %7526, %v8119_v14   ;;  %v1667_v36 = vadd.f32 %v1539_v35, %v1144_v47  ;;  %v1668_v55 = vadd.f32 %v1540_v46, %v1145_v43 }
 0x1eb   : > { %v1807_v31 = vpop.permute.xlu1 %1806 }
 0x1ec   : > { %v2062_v39 = vmul.f32 %v8315_v25, %v1807_v31  ;;  %v2063_v58 = vmul.f32 %v8321_v5, %v1807_v31  ;;  %975 = vperm.xlu0 %7484, %v8191_v38  }
 0x1ed   : > { %7527 = vset.pattern.permute.xlu1 %v10629_v13  ;;  %v8457_v22 = vpop.permute.xlu0 %1814 }
 0x1ee   : > { %v2190_v60 = vadd.f32 %v2062_v39, %v1667_v36  ;;  %v2191_v34 = vadd.f32 %v2063_v58, %v1668_v55  ;;  %930 = vperm.xlu1 %7527, %v8126_v16  }
 0x1f0   : > { %v836_v14 = vpop.permute.xlu1 %835  ;;  %v2330_v61 = vadd.f32 %v8334_v24, %v2191_v34  ;;  %v2329_v35 = vadd.f32 %v8332_v3, %v2190_v60  ;;  %980 = vperm.xlu0 %7484, %v8200_v40  }
 0x1f1   : > { %v1819_v46 = vpop.permute.xlu0 %1818  ;;  %v1146_v40 = vmul.f32 %v8310_v1, %v836_v14  ;;  %v1147_v55 = vmul.f32 %v8312_v11, %v836_v14  ;;  %v1546_v14 = vmul.f32 %v8302_v17, %v8344_v12 }
 0x1f2   : > { %7528 = vset.pattern.permute.xlu1 %v10628_v63  ;;  %v2458_v47 = vmax.f32 %v2330_v61, 0.0  ;;  %v2457_v38 = vmax.f32 %v2329_v35, 0.0 }
 0x1f3   : > { %1363 = vperm.xlu1 %7528, %v8126_v16  }
 0x1f4   : > { %2670 = vmatprep.mubr.f32.mxu0 %v2458_v47  ;;  %995 = vperm.xlu0 %7484, %v8225_v49  }
 0x1f5   : > { %v1288_v43 = vpop.permute.xlu1 %1287  ;;  %v8466_v31 = vpop.permute.xlu0 %1822  ;;  %2671 = vmatmul.mubr.f32.gmra.mrb[10].mxu0 %v2457_v38 }
 0x1f6   : > { %v1541_v34 = vmul.f32 %v8300_v15, %v1288_v43  ;;  %v1542_v36 = vmul.f32 %v8302_v17, %v1288_v43 }
 0x1f7   : > { %7529 = vset.pattern.permute.xlu1 %v10630_v32 }
 0x1f8   : > { %1886 = vperm.xlu1 %7529, %v8126_v16   ;;  %1000 = vperm.xlu0 %7484, %v8233_v52   ;;  %v1669_v60 = vadd.f32 %v1541_v34, %v1146_v40  ;;  %v1670_v61 = vadd.f32 %v1542_v36, %v1147_v55  ;;  %v1151_v34 = vmul.f32 %v8312_v11, %v8377_v19 }
 0x1f9   : > { %v8475_v39 = vpop.permute.xlu0 %1826 }
 0x1fa   : > { %v1811_v58 = vpop.permute.xlu1 %1810  ;;  %v1674_v52 = vadd.f32 %v1546_v14, %v1151_v34  ;;  %v1547_v14 = vmul.f32 %v8300_v15, %v8350_v30  ;;  %v1155_v34 = vmul.f32 %v8312_v11, %v8385_v27  ;;  %v2073_v41 = vmul.f32 %v8321_v5, %v8475_v39 }
 0x1fb   : > { %v2064_v35 = vmul.f32 %v8315_v25, %v1811_v58  ;;  %v2065_v47 = vmul.f32 %v8321_v5, %v1811_v58  ;;  %v1545_v58 = vmul.f32 %v8300_v15, %v8344_v12  ;;  %v2068_v12 = vmul.f32 %v8315_v25, %v1819_v46 }
 0x1fc   : > { %7530 = vset.pattern.permute.xlu1 %v10629_v13  ;;  %1045 = vperm.xlu0 %7484, %v8242_v54   ;;  %v2072_v53 = vmul.f32 %v8315_v25, %v8475_v39 }
 0x1fd   : > { %v2192_v38 = vadd.f32 %v2064_v35, %v1669_v60  ;;  %v2193_v43 = vadd.f32 %v2065_v47, %v1670_v61  ;;  %935 = vperm.xlu1 %7530, %v8132_v18   ;;  %v8482_v16 = vpop.permute.xlu0 %1838  ;;  %v1150_v60 = vmul.f32 %v8310_v1, %v8377_v19 }
 0x1ff   : > { %v841_v36 = vpop.permute.xlu1 %840  ;;  %v2332_v40 = vadd.f32 %v8334_v24, %v2193_v43  ;;  %v2331_v55 = vadd.f32 %v8332_v3, %v2192_v38  ;;  %v2069_v43 = vmul.f32 %v8321_v5, %v1819_v46  ;;  %v1673_v38 = vadd.f32 %v1545_v58, %v1150_v60 }
 0x200   : > { %1050 = vperm.xlu0 %7484, %v8249_v57   ;;  %v1148_v19 = vmul.f32 %v8310_v1, %v841_v36  ;;  %v1149_v51 = vmul.f32 %v8312_v11, %v841_v36  ;;  %v1550_v46 = vmul.f32 %v8302_v17, %v8359_v9  ;;  %v2066_v36 = vmul.f32 %v8315_v25, %v8457_v22 }
 0x201   : > { %7531 = vset.pattern.permute.xlu1 %v10630_v32  ;;  %v8496_v61 = vpop.permute.xlu0 %1842  ;;  %v2460_v35 = vmax.f32 %v2332_v40, 0.0  ;;  %v2459_v47 = vmax.f32 %v2331_v55, 0.0  ;;  %v2197_v55 = vadd.f32 %v2069_v43, %v1674_v52  ;;  %v2196_v52 = vadd.f32 %v2068_v12, %v1673_v38 }
 0x202   : > { %1890 = vperm.xlu1 %7531, %v8132_v18  }
 0x203   : > { %2675 = vmatprep.mubr.f32.mxu0 %v2460_v35  ;;  %v1548_v35 = vmul.f32 %v8302_v17, %v8350_v30  ;;  %v2336_v12 = vadd.f32 %v8334_v24, %v2197_v55  ;;  %v2335_v55 = vadd.f32 %v8332_v3, %v2196_v52 }
 0x204   : > { %v1292_v49 = vpop.permute.xlu1 %1291  ;;  %2676 = vmatmul.mubr.f32.gmra.mrb[12].mxu0 %v2459_v47  ;;  %1055 = vperm.xlu0 %7484, %v8257_v59   ;;  %v1549_v47 = vmul.f32 %v8300_v15, %v8359_v9  ;;  %v1157_v9 = vmul.f32 %v8312_v11, %v8390_v29 }
 0x205   : > { %v1543_v44 = vmul.f32 %v8300_v15, %v1292_v49  ;;  %v1544_v40 = vmul.f32 %v8302_v17, %v1292_v49  ;;  %v8506_v18 = vpop.permute.xlu0 %1846  ;;  %v2067_v49 = vmul.f32 %v8321_v5, %v8457_v22  ;;  %v1154_v22 = vmul.f32 %v8310_v1, %v8385_v27 }
 0x206   : > { %7532 = vset.pattern.permute.xlu1 %v10629_v13  ;;  %v2464_v50 = vmax.f32 %v2336_v12, 0.0 }
 0x207   : > { %v1671_v58 = vadd.f32 %v1543_v44, %v1148_v19  ;;  %v1672_v60 = vadd.f32 %v1544_v40, %v1149_v51  ;;  %940 = vperm.xlu1 %7532, %v8139_v20   ;;  %v1678_v19 = vadd.f32 %v1550_v46, %v1155_v34  ;;  %v2070_v46 = vmul.f32 %v8315_v25, %v8466_v31 }
 0x208   : > { %1060 = vperm.xlu0 %7484, %v8264_v62   ;;  %v2071_v34 = vmul.f32 %v8321_v5, %v8466_v31 }
 0x209   : > { %v851_v44 = vpop.permute.xlu1 %850  ;;  %v8531_v51 = vpop.permute.xlu0 %1850  ;;  %v2195_v43 = vadd.f32 %v2067_v49, %v1672_v60  ;;  %v2194_v30 = vadd.f32 %v2066_v36, %v1671_v58  ;;  %v1156_v58 = vmul.f32 %v8310_v1, %v8390_v29 }
 0x20a   : > { %v1152_v40 = vmul.f32 %v8310_v1, %v851_v44  ;;  %v1153_v28 = vmul.f32 %v8312_v11, %v851_v44 }
 0x20b   : > { %7533 = vset.pattern.permute.xlu1 %v10628_v63  ;;  %v2334_v27 = vadd.f32 %v8334_v24, %v2195_v43  ;;  %v2333_v38 = vadd.f32 %v8332_v3, %v2194_v30  ;;  %v1677_v30 = vadd.f32 %v1549_v47, %v1154_v22  ;;  %v1679_v47 = vadd.f32 %v1551_v33, %v1156_v58 }
 0x20c   : > { %v1675_v36 = vadd.f32 %v1547_v14, %v1152_v40  ;;  %v1676_v49 = vadd.f32 %v1548_v35, %v1153_v28  ;;  %1371 = vperm.xlu1 %7533, %v8139_v20   ;;  %7576 = vset.pattern.permute.xlu0 %v10630_v32  ;;  %v1680_v35 = vadd.f32 %v1552_v42, %v1157_v9  ;;  %v2463_v22 = vmax.f32 %v2335_v55, 0.0 }
 0x20d   : > { %v8551_v60 = vpop.permute.xlu0 %1854  ;;  %v2462_v44 = vmax.f32 %v2334_v27, 0.0  ;;  %v2461_v43 = vmax.f32 %v2333_v38, 0.0  ;;  %1974 = vperm.xlu0 %7576, %v8214_v45   ;;  %v2201_v40 = vadd.f32 %v2073_v41, %v1678_v19  ;;  %v2200_v27 = vadd.f32 %v2072_v53, %v1677_v30 }
 0x20e   : > { %v1831_v28 = vpop.permute.xlu1 %1830  ;;  %v2199_v31 = vadd.f32 %v2071_v34, %v1676_v49  ;;  %v2198_v14 = vadd.f32 %v2070_v46, %v1675_v36  ;;  %v1158_v33 = vmul.f32 %v8310_v1, %v8401_v56 }
 0x20f   : > { %v2075_v29 = vmul.f32 %v8321_v5, %v1831_v28  ;;  %2680 = vmatprep.mubr.f32.mxu0 %v2462_v44  ;;  %v2074_v42 = vmul.f32 %v8315_v25, %v1831_v28  ;;  %v2340_v12 = vadd.f32 %v8334_v24, %v2201_v40  ;;  %v2339_v49 = vadd.f32 %v8332_v3, %v2200_v27 }
 0x210   : > { %7534 = vset.pattern.permute.xlu1 %v10630_v32  ;;  %2681 = vmatmul.mubr.f32.gmra.mrb[14].mxu0 %v2461_v43  ;;  %v2338_v52 = vadd.f32 %v8334_v24, %v2199_v31  ;;  %v2337_v9 = vadd.f32 %v8332_v3, %v2198_v14 }
 0x211   : > { %1894 = vperm.xlu1 %7534, %v8139_v20   ;;  %v8561_v39 = vpop.permute.xlu0 %1858  ;;  %2685 = vmatprep.mubr.f32.mxu0 %v2464_v50  ;;  %v2203_v41 = vadd.f32 %v2075_v29, %v1680_v35  ;;  %v1159_v20 = vmul.f32 %v8312_v11, %v8401_v56  ;;  %v2202_v34 = vadd.f32 %v2074_v42, %v1679_v47  ;;  %v2468_v58 = vmax.f32 %v2340_v12, 0.0 }
 0x212   : > { %1978 = vperm.xlu0 %7576, %v8242_v54   ;;  %v2466_v19 = vmax.f32 %v2338_v52, 0.0  ;;  %v2465_v36 = vmax.f32 %v2337_v9, 0.0  ;;  %v2467_v14 = vmax.f32 %v2339_v49, 0.0  ;;  %v1160_v47 = vmul.f32 %v8310_v1, %v8408_v10 }
 0x213   : > { %v1312_v38 = vpop.permute.xlu1 %1311  ;;  %v2342_v56 = vadd.f32 %v8334_v24, %v2203_v41  ;;  %v2341_v35 = vadd.f32 %v8332_v3, %v2202_v34 }
 0x214   : > { %2686 = vmatmul.mubr.f32.gmra.mrb[16].mxu0 %v2463_v22  ;;  %v1553_v50 = vmul.f32 %v8300_v15, %v1312_v38  ;;  %v1554_v53 = vmul.f32 %v8302_v17, %v1312_v38  ;;  %v1161_v22 = vmul.f32 %v8312_v11, %v8408_v10  ;;  %v2078_v10 = vmul.f32 %v8315_v25, %v8482_v16 }
 0x215   : > { %7535 = vset.pattern.permute.xlu1 %v10629_v13  ;;  %v8574_v46 = vpop.permute.xlu0 %1862  ;;  %2690 = vmatprep.mubr.f32.mxu0 %v2466_v19  ;;  %v2470_v52 = vmax.f32 %v2342_v56, 0.0  ;;  %v2469_v38 = vmax.f32 %v2341_v35, 0.0 }
 0x216   : > { %1982 = vperm.xlu0 %7576, %v8249_v57   ;;  %945 = vperm.xlu1 %7535, %v8144_v21   ;;  %v1681_v43 = vadd.f32 %v1553_v50, %v1158_v33  ;;  %v1682_v55 = vadd.f32 %v1554_v53, %v1159_v20  ;;  %v2079_v20 = vmul.f32 %v8321_v5, %v8482_v16 }
 0x218   : > { %v1835_v44 = vpop.permute.xlu1 %1834  ;;  %2691 = vmatmul.mubr.f32.gmra.mrb[18].mxu0 %v2465_v36 }
 0x219   : > { %v2076_v30 = vmul.f32 %v8315_v25, %v1835_v44  ;;  %v2077_v28 = vmul.f32 %v8321_v5, %v1835_v44  ;;  %2695 = vmatprep.mubr.f32.mxu0 %v2468_v58  ;;  %v8582_v31 = vpop.permute.xlu0 %1910 }
 0x21a   : > { %1986 = vperm.xlu0 %7576, %v8257_v59   ;;  %7536 = vset.pattern.permute.xlu1 %v10628_v63 }
 0x21b   : > { %v2204_v40 = vadd.f32 %v2076_v30, %v1681_v43  ;;  %v2205_v29 = vadd.f32 %v2077_v28, %v1682_v55  ;;  %1375 = vperm.xlu1 %7536, %v8144_v21  }
 0x21c   : > { %2696 = vmatmul.mubr.f32.gmra.mrb[20].mxu0 %v2467_v14 }
 0x21d   : > { %v1316_v27 = vpop.permute.xlu1 %1315  ;;  %2700 = vmatprep.mubr.f32.mxu0 %v2470_v52  ;;  %v8592_v42 = vpop.permute.xlu0 %1914  ;;  %v2344_v19 = vadd.f32 %v8334_v24, %v2205_v29  ;;  %v2343_v12 = vadd.f32 %v8332_v3, %v2204_v40  ;;  %v2080_v29 = vmul.f32 %v8315_v25, %v8496_v61 }
 0x21e   : > { %v1555_v9 = vmul.f32 %v8300_v15, %v1316_v27  ;;  %v1556_v41 = vmul.f32 %v8302_v17, %v1316_v27  ;;  %1990 = vperm.xlu0 %7576, %v8264_v62  }
 0x21f   : > { %v2472_v33 = vmax.f32 %v2344_v19, 0.0  ;;  %7537 = vset.pattern.permute.xlu1 %v10630_v32  ;;  %v2471_v49 = vmax.f32 %v2343_v12, 0.0  ;;  %v1167_v12 = vmul.f32 %v8312_v11, %v8414_v7 }
 0x220   : > { %v1683_v50 = vadd.f32 %v1555_v9, %v1160_v47  ;;  %v1684_v53 = vadd.f32 %v1556_v41, %v1161_v22  ;;  %2701 = vmatmul.mubr.f32.gmra.mrb[22].mxu0 %v2469_v38  ;;  %1898 = vperm.xlu1 %7537, %v8144_v21   ;;  %v2081_v47 = vmul.f32 %v8321_v5, %v8496_v61 }
 0x221   : > { %2705 = vmatprep.mubr.f32.mxu0 %v2472_v33  ;;  %v8605_v34 = vpop.permute.xlu0 %1918  ;;  %v1166_v38 = vmul.f32 %v8310_v1, %v8414_v7  ;;  %v1168_v7 = vmul.f32 %v8310_v1, %v8418_v2 }
 0x222   : > { %2006 = vperm.xlu0 %7576, %v8329_v37   ;;  %v876_v36 = vpop.permute.xlu1 %875  ;;  %v2207_v58 = vadd.f32 %v2079_v20, %v1684_v53  ;;  %v2206_v56 = vadd.f32 %v2078_v10, %v1683_v50 }
 0x223   : > { %v1162_v28 = vmul.f32 %v8310_v1, %v876_v36  ;;  %v1163_v14 = vmul.f32 %v8312_v11, %v876_v36  ;;  %v1169_v36 = vmul.f32 %v8312_v11, %v8418_v2 }
 0x224   : > { %2706 = vmatmul.mubr.f32.gmra.mrb[24].mxu0 %v2471_v49  ;;  %v2346_v44 = vadd.f32 %v8334_v24, %v2207_v58  ;;  %v2345_v16 = vadd.f32 %v8332_v3, %v2206_v56  ;;  %7538 = vset.pattern.permute.xlu1 %v10629_v13  ;;  %v2082_v56 = vmul.f32 %v8315_v25, %v8506_v18 }
 0x225   : > { %v8611_v43 = vpop.permute.xlu0 %1922  ;;  %950 = vperm.xlu1 %7538, %v8152_v23  }
 0x226   : > { %2010 = vperm.xlu0 %7576, %v8220_v48   ;;  %v2474_v21 = vmax.f32 %v2346_v44, 0.0  ;;  %v2473_v55 = vmax.f32 %v2345_v16, 0.0 }
 0x227   : > { %v1320_v30 = vpop.permute.xlu1 %1319 }
 0x228   : > { %v1557_v35 = vmul.f32 %v8300_v15, %v1320_v30  ;;  %v1558_v40 = vmul.f32 %v8302_v17, %v1320_v30  ;;  %2710 = vmatprep.mubr.f32.mxu0 %v2474_v21  ;;  %v2084_v30 = vmul.f32 %v8315_v25, %v8531_v51 }
 0x229   : > { %2711 = vmatmul.mubr.f32.gmra.mrb[26].mxu0 %v2473_v55  ;;  %v8621_v52 = vpop.permute.xlu0 %1926  ;;  %7539 = vset.pattern.permute.xlu1 %v10628_v63  ;;  %v1170_v55 = vmul.f32 %v8310_v1, %v8427_v4 }
 0x22a   : > { %v1685_v22 = vadd.f32 %v1557_v35, %v1162_v28  ;;  %v1686_v27 = vadd.f32 %v1558_v40, %v1163_v14  ;;  %7586 = vset.pattern.permute.xlu0 %v10628_v63  ;;  %1379 = vperm.xlu1 %7539, %v8152_v23  }
 0x22b   : > { %1455 = vperm.xlu0 %7586, %v8242_v54  }
 0x22c   : > { %v881_v19 = vpop.permute.xlu1 %880  ;;  %v2209_v9 = vadd.f32 %v2081_v47, %v1686_v27  ;;  %v2208_v41 = vadd.f32 %v2080_v29, %v1685_v22  ;;  %v2085_v29 = vmul.f32 %v8321_v5, %v8531_v51  ;;  %v2087_v47 = vmul.f32 %v8321_v5, %v8551_v60 }
 0x22d   : > { %v1164_v61 = vmul.f32 %v8310_v1, %v881_v19  ;;  %v1165_v50 = vmul.f32 %v8312_v11, %v881_v19  ;;  %v1172_v51 = vmul.f32 %v8310_v1, %v8434_v8 }
 0x22e   : > { %v1324_v10 = vpop.permute.xlu0 %1323  ;;  %v2348_v33 = vadd.f32 %v8334_v24, %v2209_v9  ;;  %v2347_v20 = vadd.f32 %v8332_v3, %v2208_v41  ;;  %7540 = vset.pattern.permute.xlu1 %v10630_v32  ;;  %v1171_v41 = vmul.f32 %v8312_v11, %v8427_v4 }
 0x22f   : > { %1463 = vperm.xlu0 %7586, %v8257_v59   ;;  %v1559_v54 = vmul.f32 %v8300_v15, %v1324_v10  ;;  %v1560_v53 = vmul.f32 %v8302_v17, %v1324_v10  ;;  %1902 = vperm.xlu1 %7540, %v8152_v23   ;;  %v2083_v59 = vmul.f32 %v8321_v5, %v8506_v18 }
 0x230   : > { %v2476_v49 = vmax.f32 %v2348_v33, 0.0  ;;  %v2475_v58 = vmax.f32 %v2347_v20, 0.0 }
 0x231   : > { %v1687_v44 = vadd.f32 %v1559_v54, %v1164_v61  ;;  %v1688_v16 = vadd.f32 %v1560_v53, %v1165_v50  ;;  %v1332_v21 = vpop.permute.xlu1 %1331  ;;  %v1173_v61 = vmul.f32 %v8312_v11, %v8434_v8  ;;  %v2088_v8 = vmul.f32 %v8315_v25, %v8561_v39 }
 0x232   : > { %v1563_v2 = vmul.f32 %v8300_v15, %v1332_v21  ;;  %v1564_v23 = vmul.f32 %v8302_v17, %v1332_v21  ;;  %v1328_v28 = vpop.permute.xlu0 %1327  ;;  %2715 = vmatprep.mubr.f32.mxu0 %v2476_v49 }
 0x233   : > { %v2210_v14 = vadd.f32 %v2082_v56, %v1687_v44  ;;  %v2211_v35 = vadd.f32 %v2083_v59, %v1688_v16  ;;  %1467 = vperm.xlu0 %7586, %v8264_v62   ;;  %v1561_v18 = vmul.f32 %v8300_v15, %v1328_v28  ;;  %v1562_v40 = vmul.f32 %v8302_v17, %v1328_v28 }
 0x234   : > { %v1692_v22 = vadd.f32 %v1564_v23, %v1169_v36  ;;  %7541 = vset.pattern.permute.xlu1 %v10629_v13  ;;  %2716 = vmatmul.mubr.f32.gmra.mrb[28].mxu0 %v2475_v58  ;;  %v1691_v10 = vadd.f32 %v1563_v2, %v1168_v7  ;;  %v2089_v7 = vmul.f32 %v8321_v5, %v8561_v39 }
 0x235   : > { %v1689_v27 = vadd.f32 %v1561_v18, %v1166_v38  ;;  %v1690_v19 = vadd.f32 %v1562_v40, %v1167_v12  ;;  %955 = vperm.xlu1 %7541, %v8158_v26   ;;  %v2350_v62 = vadd.f32 %v8334_v24, %v2211_v35  ;;  %v2349_v9 = vadd.f32 %v8332_v3, %v2210_v14 }
 0x236   : > { %v906_v33 = vpop.permute.xlu1 %905  ;;  %v1336_v20 = vpop.permute.xlu0 %1335  ;;  %v2086_v38 = vmul.f32 %v8315_v25, %v8551_v60  ;;  %v2215_v54 = vadd.f32 %v2087_v47, %v1692_v22 }
 0x237   : > { %v2212_v12 = vadd.f32 %v2084_v30, %v1689_v27  ;;  %v2213_v50 = vadd.f32 %v2085_v29, %v1690_v19  ;;  %1471 = vperm.xlu0 %7586, %v8273_v0   ;;  %v1565_v53 = vmul.f32 %v8300_v15, %v1336_v20  ;;  %v1566_v4 = vmul.f32 %v8302_v17, %v1336_v20  ;;  %v10633_v19 = vld [vmem:[#allocation35_spill] sm:$0xff] }
 0x238   : > { %v2478_v36 = vmax.f32 %v2350_v62, 0.0  ;;  %v2477_v49 = vmax.f32 %v2349_v9, 0.0  ;;  %v2214_v16 = vadd.f32 %v2086_v38, %v1691_v10  ;;  %v2354_v23 = vadd.f32 %v8334_v24, %v2215_v54 }
 0x239   : > { %7542 = vset.pattern.permute.xlu1 %v10628_v63  ;;  %v2352_v60 = vadd.f32 %v8334_v24, %v2213_v50  ;;  %v2351_v58 = vadd.f32 %v8332_v3, %v2212_v12  ;;  %v1693_v56 = vadd.f32 %v1565_v53, %v1170_v55  ;;  %v1694_v59 = vadd.f32 %v1566_v4, %v1171_v41 }
 0x23a   : > { %1383 = vperm.xlu1 %7542, %v8158_v26   ;;  %2720 = vmatprep.mubr.f32.mxu0 %v2478_v36  ;;  %v1340_v44 = vpop.permute.xlu0 %1339  ;;  %v2091_v55 = vmul.f32 %v8321_v5, %v8574_v46  ;;  %v2090_v29 = vmul.f32 %v8315_v25, %v8574_v46  ;;  %v2353_v22 = vadd.f32 %v8332_v3, %v2214_v16  ;;  %v2482_v9 = vmax.f32 %v2354_v23, 0.0  ;;  %v10634_v36 = vld [vmem:[#allocation37_spill] sm:$0xff] }
 0x23b   : > { %1475 = vperm.xlu0 %7586, %v8283_v6   ;;  %v1567_v21 = vmul.f32 %v8300_v15, %v1340_v44  ;;  %v1568_v30 = vmul.f32 %v8302_v17, %v1340_v44  ;;  %2721 = vmatmul.mubr.f32.gmra.mrb[30].mxu0 %v2477_v49  ;;  %v1867_v39 = vpop.permute.xlu1 %1866  ;;  %v2480_v2 = vmax.f32 %v2352_v60, 0.0  ;;  %v2217_v28 = vadd.f32 %v2089_v7, %v1694_v59  ;;  %v10635_v59 = vld [vmem:[#allocation23_spill] sm:$0xff] }
 0x23c   : > { %v2479_v14 = vmax.f32 %v2351_v58, 0.0  ;;  %v2216_v35 = vadd.f32 %v2088_v8, %v1693_v56  ;;  %v2093_v38 = vmul.f32 %v8321_v5, %v1867_v39  ;;  %v2481_v4 = vmax.f32 %v2353_v22, 0.0 }
 0x23d   : > { %v1695_v18 = vadd.f32 %v1567_v21, %v1172_v51  ;;  %v1696_v40 = vadd.f32 %v1568_v30, %v1173_v61  ;;  %2725 = vmatprep.mubr.f32.mxu0 %v2480_v2  ;;  %v2356_v41 = vadd.f32 %v8334_v24, %v2217_v28  ;;  %v1174_v51 = vmul.f32 %v8310_v1, %v906_v33 }
 0x23e   : > { %7543 = vset.pattern.permute.xlu1 %v10630_v32  ;;  %v1344_v47 = vpop.permute.xlu0 %1343  ;;  %v1175_v61 = vmul.f32 %v8312_v11, %v906_v33  ;;  %v2092_v60 = vmul.f32 %v8315_v25, %v1867_v39 }
 0x23f   : > { %v2219_v27 = vadd.f32 %v2091_v55, %v1696_v40  ;;  %1906 = vperm.xlu1 %7543, %v8158_v26   ;;  %1491 = vperm.xlu0 %7586, %v10633_v19   ;;  %v1569_v62 = vmul.f32 %v8300_v15, %v1344_v47  ;;  %v1570_v46 = vmul.f32 %v8302_v17, %v1344_v47  ;;  %v2484_v8 = vmax.f32 %v2356_v41, 0.0 }
 0x240   : > { %2726 = vmatmul.mubr.f32.gmra.mrb[32].mxu0 %v2479_v14  ;;  %v911_v10 = vpop.permute.xlu1 %910  ;;  %v2218_v20 = vadd.f32 %v2090_v29, %v1695_v18  ;;  %v2355_v26 = vadd.f32 %v8332_v3, %v2216_v35  ;;  %v10636_v18 = vld [vmem:[#allocation45_spill] sm:$0xff] }
 0x241   : > { %2730 = vmatprep.mubr.f32.mxu0 %v2482_v9  ;;  %v1697_v12 = vadd.f32 %v1569_v62, %v1174_v51  ;;  %v1698_v50 = vadd.f32 %v1570_v46, %v1175_v61  ;;  %v1177_v54 = vmul.f32 %v8312_v11, %v911_v10  ;;  %v2358_v7 = vadd.f32 %v8334_v24, %v2219_v27  ;;  %v10637_v61 = vld [vmem:[#allocation46_spill] sm:$0xff] }
 0x242   : > { %v1348_v53 = vpop.permute.xlu0 %1347  ;;  %v1176_v56 = vmul.f32 %v8310_v1, %v911_v10  ;;  %v2483_v21 = vmax.f32 %v2355_v26, 0.0  ;;  %v2357_v30 = vadd.f32 %v8332_v3, %v2218_v20  ;;  %v1178_v46 = vmul.f32 %v8310_v1, %v10637_v61  ;;  %v10638_v20 = vld [vmem:[#allocation26_spill] sm:$0xff] }
 0x243   : > { %7544 = vset.pattern.permute.xlu1 %v10629_v13  ;;  %1495 = vperm.xlu0 %7586, %v10634_v36   ;;  %v1571_v33 = vmul.f32 %v8300_v15, %v1348_v53  ;;  %v1572_v49 = vmul.f32 %v8302_v17, %v1348_v53  ;;  %v2221_v58 = vadd.f32 %v2093_v38, %v1698_v50  ;;  %v2486_v39 = vmax.f32 %v2358_v7, 0.0 }
 0x244   : > { %2731 = vmatmul.mubr.f32.gmra.mrb[34].mxu0 %v2481_v4  ;;  %960 = vperm.xlu1 %7544, %v10635_v59   ;;  %v2220_v2 = vadd.f32 %v2092_v60, %v1697_v12  ;;  %v2485_v47 = vmax.f32 %v2357_v30, 0.0  ;;  %v1179_v10 = vmul.f32 %v8312_v11, %v10637_v61  ;;  %v10640_v60 = vld [vmem:[#allocation32_spill] sm:$0xff] }
 0x245   : > { %v1700_v44 = vadd.f32 %v1572_v49, %v1177_v54  ;;  %2735 = vmatprep.mubr.f32.mxu0 %v2484_v8  ;;  %v1871_v16 = vpop.permute.xlu1 %1870  ;;  %v1699_v23 = vadd.f32 %v1571_v33, %v1176_v56  ;;  %v2360_v55 = vadd.f32 %v8334_v24, %v2221_v58  ;;  %v10639_v33 = vld [vmem:[#allocation38_spill] sm:$0xff] }
 0x246   : > { %v2094_v28 = vmul.f32 %v8315_v25, %v1871_v16  ;;  %v2095_v14 = vmul.f32 %v8321_v5, %v1871_v16  ;;  %v2359_v22 = vadd.f32 %v8332_v3, %v2220_v2 }
 0x247   : > { %7590 = vset.pattern.permute.xlu0 %v10629_v13  ;;  %v2488_v62 = vmax.f32 %v2360_v55, 0.0 }
 0x248   : > { %v2223_v35 = vadd.f32 %v2095_v14, %v1700_v44  ;;  %2736 = vmatmul.mubr.f32.gmra.mrb[36].mxu0 %v2483_v21  ;;  %7545 = vset.pattern.permute.xlu1 %v10628_v63  ;;  %v2222_v40 = vadd.f32 %v2094_v28, %v1699_v23  ;;  %v2487_v38 = vmax.f32 %v2359_v22, 0.0  ;;  %v10641_v44 = vld [vmem:[#allocation39_spill] sm:$0xff] }
 0x249   : > { %1075 = vperm.xlu0 %7590, %v10636_v18   ;;  %2740 = vmatprep.mubr.f32.mxu0 %v2486_v39  ;;  %v10642_v23 = vld [vmem:[#allocation47_spill] sm:$0xff] }
 0x24a   : > { %1387 = vperm.xlu1 %7545, %v10635_v59   ;;  %v1352_v29 = vpop.permute.xlu1 %1351  ;;  %v2362_v27 = vadd.f32 %v8334_v24, %v2223_v35  ;;  %v2361_v26 = vadd.f32 %v8332_v3, %v2222_v40  ;;  %v1180_v28 = vmul.f32 %v8310_v1, %v10642_v23  ;;  %v1181_v14 = vmul.f32 %v8312_v11, %v10642_v23  ;;  %v10648_v23 = vld [vmem:[#allocation36_spill] sm:$0xff] }
 0x24b   : > { %v1573_v9 = vmul.f32 %v8300_v15, %v1352_v29  ;;  %v1574_v41 = vmul.f32 %v8302_v17, %v1352_v29 }
 0x24c   : > { %2741 = vmatmul.mubr.f32.gmra.mrb[38].mxu0 %v2485_v47  ;;  %v2490_v51 = vmax.f32 %v2362_v27, 0.0  ;;  %v2489_v7 = vmax.f32 %v2361_v26, 0.0  ;;  %v10643_v27 = vld [vmem:[#allocation33_spill] sm:$0xff] }
 0x24d   : > { %1080 = vperm.xlu0 %7590, %v8329_v37   ;;  %2745 = vmatprep.mubr.f32.mxu0 %v2488_v62  ;;  %v1701_v50 = vadd.f32 %v1573_v9, %v1178_v46  ;;  %v1702_v54 = vadd.f32 %v1574_v41, %v1179_v10  ;;  %v10644_v62 = vld [vmem:[#allocation40_spill] sm:$0xff]  ;;  %v10645_v10 = vld [vmem:[#allocation41_spill] sm:$0xff] }
 0x24e   : > { %1395 = vperm.xlu1 %7545, %v10638_v20  }
 0x24f   : > { %v1875_v12 = vpop.permute.xlu1 %1874 }
 0x250   : > { %2746 = vmatmul.mubr.f32.gmra.mrb[40].mxu0 %v2487_v38  ;;  %v2096_v53 = vmul.f32 %v8315_v25, %v1875_v12  ;;  %v2097_v4 = vmul.f32 %v8321_v5, %v1875_v12 }
 0x251   : > { %1100 = vperm.xlu0 %7590, %v10639_v33   ;;  %2750 = vmatprep.mubr.f32.mxu0 %v2490_v51 }
 0x252   : > { %v2224_v49 = vadd.f32 %v2096_v53, %v1701_v50  ;;  %v2225_v8 = vadd.f32 %v2097_v4, %v1702_v54  ;;  %7546 = vset.pattern.permute.xlu1 %v10629_v13  ;;  %v10646_v54 = vld [vmem:[#allocation34_spill] sm:$0xff] }
 0x253   : > { %985 = vperm.xlu1 %7546, %v10640_v60   ;;  %v10647_v53 = vld [vmem:[#allocation42_spill] sm:$0xff] }
 0x254   : > { %2751 = vmatmul.mubr.f32.gmra.mrb[42].mxu0 %v2489_v7  ;;  %v1356_v58 = vpop.permute.xlu1 %1355  ;;  %v2364_v56 = vadd.f32 %v8334_v24, %v2225_v8  ;;  %v2363_v59 = vadd.f32 %v8332_v3, %v2224_v49 }
 0x255   : > { %1105 = vperm.xlu0 %7590, %v10641_v44   ;;  %v1575_v16 = vmul.f32 %v8300_v15, %v1356_v58  ;;  %v1576_v21 = vmul.f32 %v8302_v17, %v1356_v58 }
 0x256   : > { %v2492_v30 = vmax.f32 %v2364_v56, 0.0  ;;  %v2491_v2 = vmax.f32 %v2363_v59, 0.0 }
 0x257   : > { %7547 = vset.pattern.permute.xlu1 %v10630_v32  ;;  %v1703_v55 = vadd.f32 %v1575_v16, %v1180_v28  ;;  %v1704_v35 = vadd.f32 %v1576_v21, %v1181_v14 }
 0x258   : > { %1930 = vperm.xlu1 %7547, %v10640_v60   ;;  %2755 = vmatprep.mubr.f32.mxu0 %v2492_v30 }
 0x259   : > { %7595 = vset.pattern.permute.xlu0 %v10630_v32  ;;  %v1879_v39 = vpop.permute.xlu1 %1878  ;;  %2756 = vmatmul.mubr.f32.gmra.mrb[44].mxu0 %v2491_v2 }
 0x25a   : > { %2026 = vperm.xlu0 %7595, %v10641_v44   ;;  %v2098_v40 = vmul.f32 %v8315_v25, %v1879_v39  ;;  %v2099_v29 = vmul.f32 %v8321_v5, %v1879_v39 }
 0x25c   : > { %v2226_v47 = vadd.f32 %v2098_v40, %v1703_v55  ;;  %v2227_v22 = vadd.f32 %v2099_v29, %v1704_v35  ;;  %7548 = vset.pattern.permute.xlu1 %v10629_v13 }
 0x25d   : > { %990 = vperm.xlu1 %7548, %v10643_v27  }
 0x25e   : > { %2030 = vperm.xlu0 %7595, %v10644_v62   ;;  %v926_v9 = vpop.permute.xlu1 %925  ;;  %v2366_v41 = vadd.f32 %v8334_v24, %v2227_v22  ;;  %v2365_v51 = vadd.f32 %v8332_v3, %v2226_v47 }
 0x25f   : > { %v1182_v12 = vmul.f32 %v8310_v1, %v926_v9  ;;  %v1183_v50 = vmul.f32 %v8312_v11, %v926_v9 }
 0x260   : > { %v2494_v61 = vmax.f32 %v2366_v41, 0.0  ;;  %v2493_v46 = vmax.f32 %v2365_v51, 0.0  ;;  %v10649_v51 = vld [vmem:[#allocation24_spill] sm:$0xff] }
 0x261   : > { %7549 = vset.pattern.permute.xlu1 %v10630_v32 }
 0x262   : > { %1934 = vperm.xlu1 %7549, %v10643_v27   ;;  %7599 = vset.pattern.permute.xlu0 %v10628_v63 }
 0x263   : > { %1511 = vperm.xlu0 %7599, %v10645_v10   ;;  %2760 = vmatprep.mubr.f32.mxu0 %v2494_v61  ;;  %v1360_v20 = vpop.permute.xlu1 %1359 }
 0x264   : > { %2761 = vmatmul.mubr.f32.gmra.mrb[46].mxu0 %v2493_v46  ;;  %v1577_v38 = vmul.f32 %v8300_v15, %v1360_v20  ;;  %v1578_v26 = vmul.f32 %v8302_v17, %v1360_v20 }
 0x266   : > { %7550 = vset.pattern.permute.xlu1 %v10628_v63  ;;  %v1705_v49 = vadd.f32 %v1577_v38, %v1182_v12  ;;  %v1706_v8 = vadd.f32 %v1578_v26, %v1183_v50  ;;  %v1368_v38 = vpop.permute.xlu0 %1367 }
 0x267   : > { %1415 = vperm.xlu1 %7550, %v10646_v54   ;;  %1515 = vperm.xlu0 %7599, %v10647_v53  }
 0x268   : > { %v1883_v4 = vpop.permute.xlu1 %1882 }
 0x269   : > { %v2100_v7 = vmul.f32 %v8315_v25, %v1883_v4  ;;  %v2101_v60 = vmul.f32 %v8321_v5, %v1883_v4  ;;  %v1581_v4 = vmul.f32 %v8300_v15, %v1368_v38 }
 0x26b   : > { %v2228_v58 = vadd.f32 %v2100_v7, %v1705_v49  ;;  %v2229_v56 = vadd.f32 %v2101_v60, %v1706_v8  ;;  %7551 = vset.pattern.permute.xlu1 %v10630_v32  ;;  %7603 = vset.pattern.permute.xlu0 %v10630_v32  ;;  %v1582_v49 = vmul.f32 %v8302_v17, %v1368_v38 }
 0x26c   : > { %1938 = vperm.xlu1 %7551, %v10646_v54  }
 0x26d   : > { %v931_v59 = vpop.permute.xlu1 %930  ;;  %v2368_v16 = vadd.f32 %v8334_v24, %v2229_v56  ;;  %v2367_v21 = vadd.f32 %v8332_v3, %v2228_v58 }
 0x26e   : > { %v1184_v55 = vmul.f32 %v8310_v1, %v931_v59  ;;  %v1185_v35 = vmul.f32 %v8312_v11, %v931_v59 }
 0x26f   : > { %v2496_v30 = vmax.f32 %v2368_v16, 0.0  ;;  %v2495_v2 = vmax.f32 %v2367_v21, 0.0 }
 0x270   : > { %7552 = vset.pattern.permute.xlu1 %v10628_v63 }
 0x271   : > { %1419 = vperm.xlu1 %7552, %v10648_v23   ;;  %2765 = vmatprep.mubr.f32.mxu0 %v2496_v30 }
 0x272   : > { %v1364_v28 = vpop.permute.xlu1 %1363  ;;  %2766 = vmatmul.mubr.f32.gmra.mrb[48].mxu0 %v2495_v2 }
 0x273   : > { %v1579_v14 = vmul.f32 %v8300_v15, %v1364_v28  ;;  %v1580_v39 = vmul.f32 %v8302_v17, %v1364_v28 }
 0x275   : > { %7553 = vset.pattern.permute.xlu1 %v10630_v32  ;;  %v1707_v29 = vadd.f32 %v1579_v14, %v1184_v55  ;;  %v1708_v47 = vadd.f32 %v1580_v39, %v1185_v35  ;;  %v10650_v55 = vld [vmem:[#allocation25_spill] sm:$0xff] }
 0x276   : > { %1942 = vperm.xlu1 %7553, %v10648_v23  }
 0x277   : > { %v1887_v40 = vpop.permute.xlu1 %1886 }
 0x278   : > { %v2102_v22 = vmul.f32 %v8315_v25, %v1887_v40  ;;  %v2103_v27 = vmul.f32 %v8321_v5, %v1887_v40 }
 0x27a   : > { %v2230_v9 = vadd.f32 %v2102_v22, %v1707_v29  ;;  %v2231_v41 = vadd.f32 %v2103_v27, %v1708_v47  ;;  %7554 = vset.pattern.permute.xlu1 %v10629_v13  ;;  %v8810_v47 = vld [vmem:[%s10467_s4] ss:$0 sm:$0xff] }
 0x27b   : > { %1005 = vperm.xlu1 %7554, %v10649_v51  }
 0x27c   : > { %v936_v61 = vpop.permute.xlu1 %935  ;;  %v2370_v46 = vadd.f32 %v8334_v24, %v2231_v41  ;;  %v2369_v20 = vadd.f32 %v8332_v3, %v2230_v9 }
 0x27d   : > { %v1186_v26 = vmul.f32 %v8310_v1, %v936_v61  ;;  %v1187_v12 = vmul.f32 %v8312_v11, %v936_v61 }
 0x27e   : > { %v2498_v50 = vmax.f32 %v2370_v46, 0.0  ;;  %v2497_v54 = vmax.f32 %v2369_v20, 0.0 }
 0x27f   : > { %7555 = vset.pattern.permute.xlu1 %v10628_v63  ;;  %v1709_v7 = vadd.f32 %v1581_v4, %v1186_v26  ;;  %v1710_v60 = vadd.f32 %v1582_v49, %v1187_v12 }
 0x280   : > { %1423 = vperm.xlu1 %7555, %v10649_v51   ;;  %2770 = vmatprep.mubr.f32.mxu0 %v2498_v50 }
 0x281   : > { %v1891_v8 = vpop.permute.xlu1 %1890  ;;  %2771 = vmatmul.mubr.f32.gmra.mrb[50].mxu0 %v2497_v54 }
 0x282   : > { %v2104_v58 = vmul.f32 %v8315_v25, %v1891_v8  ;;  %v2105_v56 = vmul.f32 %v8321_v5, %v1891_v8  ;;  %v2647_v59 = vpop.f32.mrb[0].mxu0 }
 0x283   : > { %v2649_v16 = vpop.f32.mrb[1].mxu0  ;;  %v8818_v38 = vadd.f32 %v8810_v47, %v2647_v59 }
 0x284   : > { %v2232_v21 = vadd.f32 %v2104_v58, %v1709_v7  ;;  %v2233_v30 = vadd.f32 %v2105_v56, %v1710_v60  ;;  %7556 = vset.pattern.permute.xlu1 %v10630_v32  ;;  %v10651_v56 = vld [vmem:[#allocation27_spill] sm:$0xff]  ;;  %v8831_v16 = vpop.permute.xlu0 %1391 }
 0x285   : > { %1946 = vperm.xlu1 %7556, %v10649_v51  }
 0x286   : > { %v941_v2 = vpop.permute.xlu1 %940  ;;  %v2372_v23 = vadd.f32 %v8334_v24, %v2233_v30  ;;  %v2371_v28 = vadd.f32 %v8332_v3, %v2232_v21 }
 0x287   : > { %v1188_v22 = vmul.f32 %v8310_v1, %v941_v2  ;;  %v1189_v27 = vmul.f32 %v8312_v11, %v941_v2 }
 0x288   : > { %v2500_v14 = vmax.f32 %v2372_v23, 0.0  ;;  %v2499_v39 = vmax.f32 %v2371_v28, 0.0 }
 0x289   : > { %7557 = vset.pattern.permute.xlu1 %v10629_v13 }
 0x28a   : > { %1010 = vperm.xlu1 %7557, %v10650_v55   ;;  %2775 = vmatprep.mubr.f32.mxu0 %v2500_v14 }
 0x28b   : > { %v1372_v35 = vpop.permute.xlu1 %1371  ;;  %2776 = vmatmul.mubr.f32.gmra.mrb[52].mxu0 %v2499_v39 }
 0x28c   : > { %v1583_v40 = vmul.f32 %v8300_v15, %v1372_v35  ;;  %v1584_v29 = vmul.f32 %v8302_v17, %v1372_v35 }
 0x28e   : > { %7558 = vset.pattern.permute.xlu1 %v10628_v63  ;;  %v1711_v41 = vadd.f32 %v1583_v40, %v1188_v22  ;;  %v1712_v51 = vadd.f32 %v1584_v29, %v1189_v27  ;;  %v8844_v27 = vpop.permute.xlu0 %1399 }
 0x28f   : > { %1427 = vperm.xlu1 %7558, %v10650_v55  }
 0x290   : > { %v1895_v9 = vpop.permute.xlu1 %1894 }
 0x291   : > { %v2106_v61 = vmul.f32 %v8315_v25, %v1895_v9  ;;  %v2107_v46 = vmul.f32 %v8321_v5, %v1895_v9  ;;  %v2652_v20 = vpop.f32.mrb[2].mxu0 }
 0x292   : > { %v8821_v26 = vadd.f32 %v8810_v47, %v2652_v20  ;;  %v2654_v12 = vpop.f32.mrb[3].mxu0 }
 0x293   : > { %v2234_v50 = vadd.f32 %v2106_v61, %v1711_v41  ;;  %v2235_v54 = vadd.f32 %v2107_v46, %v1712_v51  ;;  %7559 = vset.pattern.permute.xlu1 %v10630_v32  ;;  %v10653_v61 = vld [vmem:[#allocation28_spill] sm:$0xff] }
 0x294   : > { %v3030_v4 = vmax.f32 %v8818_v38, %v8821_v26  ;;  %1950 = vperm.xlu1 %7559, %v10650_v55  }
 0x295   : > { %v2374_v49 = vadd.f32 %v8334_v24, %v2235_v54  ;;  %v2373_v8 = vadd.f32 %v8332_v3, %v2234_v50  ;;  %v946_v7 = vpop.permute.xlu1 %945 }
 0x296   : > { %v1190_v2 = vmul.f32 %v8310_v1, %v946_v7  ;;  %v1191_v23 = vmul.f32 %v8312_v11, %v946_v7 }
 0x297   : > { %v2502_v60 = vmax.f32 %v2374_v49, 0.0  ;;  %v2501_v58 = vmax.f32 %v2373_v8, 0.0  ;;  %v8852_v49 = vpop.permute.xlu0 %1403 }
 0x298   : > { %7560 = vset.pattern.permute.xlu1 %v10629_v13 }
 0x299   : > { %1015 = vperm.xlu1 %7560, %v10651_v56   ;;  %2780 = vmatprep.mubr.f32.mxu0 %v2502_v60 }
 0x29a   : > { %2781 = vmatmul.mubr.f32.gmra.mrb[54].mxu0 %v2501_v58  ;;  %v1376_v59 = vpop.permute.xlu1 %1375 }
 0x29b   : > { %v1585_v21 = vmul.f32 %v8300_v15, %v1376_v59  ;;  %v1586_v30 = vmul.f32 %v8302_v17, %v1376_v59  ;;  %v8862_v59 = vpop.permute.xlu0 %1407 }
 0x29d   : > { %7561 = vset.pattern.permute.xlu1 %v10630_v32  ;;  %v1713_v28 = vadd.f32 %v1585_v21, %v1190_v2  ;;  %v1714_v55 = vadd.f32 %v1586_v30, %v1191_v23 }
 0x29e   : > { %1954 = vperm.xlu1 %7561, %v10651_v56  }
 0x29f   : > { %v1899_v14 = vpop.permute.xlu1 %1898 }
 0x2a0   : > { %v2657_v39 = vpop.f32.mrb[4].mxu0  ;;  %v2108_v35 = vmul.f32 %v8315_v25, %v1899_v14  ;;  %v2109_v40 = vmul.f32 %v8321_v5, %v1899_v14 }
 0x2a1   : > { %v8842_v29 = vadd.f32 %v8810_v47, %v2657_v39  ;;  %v2659_v22 = vpop.f32.mrb[5].mxu0 }
 0x2a2   : > { %7562 = vset.pattern.permute.xlu1 %v10629_v13  ;;  %v2236_v9 = vadd.f32 %v2108_v35, %v1713_v28  ;;  %v2237_v41 = vadd.f32 %v2109_v40, %v1714_v55  ;;  %v10655_v22 = vld [vmem:[#allocation29_spill] sm:$0xff] }
 0x2a3   : > { %10652 = vst [vmem:[#allocation35_spill] sm:$0xff] %v8842_v29  ;;  %v3031_v51 = vmax.f32 %v3030_v4, %v8842_v29  ;;  %1020 = vperm.xlu1 %7562, %v10653_v61   ;;  %v2121_v29 = vmul.f32 %v8321_v5, %v8611_v43 }
 0x2a4   : > { %v951_v46 = vpop.permute.xlu1 %950  ;;  %v2376_v20 = vadd.f32 %v8334_v24, %v2237_v41  ;;  %v2375_v12 = vadd.f32 %v8332_v3, %v2236_v9  ;;  %v8871_v9 = vpop.permute.xlu0 %1411 }
 0x2a5   : > { %v1192_v21 = vmul.f32 %v8310_v1, %v951_v46  ;;  %v1193_v30 = vmul.f32 %v8312_v11, %v951_v46 }
 0x2a6   : > { %v2504_v50 = vmax.f32 %v2376_v20, 0.0  ;;  %v2503_v54 = vmax.f32 %v2375_v12, 0.0 }
 0x2a7   : > { %7563 = vset.pattern.permute.xlu1 %v10628_v63 }
 0x2a8   : > { %1435 = vperm.xlu1 %7563, %v10653_v61   ;;  %2785 = vmatprep.mubr.f32.mxu0 %v2504_v50 }
 0x2a9   : > { %v1380_v8 = vpop.permute.xlu1 %1379  ;;  %2786 = vmatmul.mubr.f32.gmra.mrb[56].mxu0 %v2503_v54  ;;  %v8877_v54 = vpop.permute.xlu0 %1431 }
 0x2aa   : > { %v2662_v7 = vpop.f32.mrb[6].mxu0  ;;  %v1587_v4 = vmul.f32 %v8300_v15, %v1380_v8  ;;  %v1588_v60 = vmul.f32 %v8302_v17, %v1380_v8 }
 0x2ab   : > { %v8859_v58 = vadd.f32 %v8810_v47, %v2662_v7  ;;  %v2664_v56 = vpop.f32.mrb[7].mxu0 }
 0x2ac   : > { %7564 = vset.pattern.permute.xlu1 %v10630_v32  ;;  %v1715_v28 = vadd.f32 %v1587_v4, %v1192_v21  ;;  %v1716_v14 = vadd.f32 %v1588_v60, %v1193_v30 }
 0x2ad   : > { %10654 = vst [vmem:[#allocation37_spill] sm:$0xff] %v8859_v58  ;;  %1958 = vperm.xlu1 %7564, %v10653_v61   ;;  %v3032_v2 = vmax.f32 %v3031_v51, %v8859_v58 }
 0x2ae   : > { %v1903_v23 = vpop.permute.xlu1 %1902 }
 0x2af   : > { %v2110_v39 = vmul.f32 %v8315_v25, %v1903_v23  ;;  %v2111_v55 = vmul.f32 %v8321_v5, %v1903_v23  ;;  %v966_v23 = vpop.permute.xlu0 %965 }
 0x2b1   : > { %7565 = vset.pattern.permute.xlu1 %v10629_v13  ;;  %v2238_v35 = vadd.f32 %v2110_v39, %v1715_v28  ;;  %v2239_v40 = vadd.f32 %v2111_v55, %v1716_v14 }
 0x2b2   : > { %1025 = vperm.xlu1 %7565, %v10655_v22  }
 0x2b3   : > { %v2378_v61 = vadd.f32 %v8334_v24, %v2239_v40  ;;  %v2377_v51 = vadd.f32 %v8332_v3, %v2238_v35 }
 0x2b4   : > { %v956_v41 = vpop.permute.xlu1 %955 }
 0x2b5   : > { %v2506_v46 = vmax.f32 %v2378_v61, 0.0  ;;  %v2505_v20 = vmax.f32 %v2377_v51, 0.0  ;;  %v1194_v21 = vmul.f32 %v8310_v1, %v956_v41  ;;  %v1195_v30 = vmul.f32 %v8312_v11, %v956_v41  ;;  %v971_v41 = vpop.permute.xlu0 %970 }
 0x2b6   : > { %7566 = vset.pattern.permute.xlu1 %v10628_v63 }
 0x2b7   : > { %1439 = vperm.xlu1 %7566, %v10655_v22   ;;  %2790 = vmatprep.mubr.f32.mxu0 %v2506_v46 }
 0x2b8   : > { %2791 = vmatmul.mubr.f32.gmra.mrb[58].mxu0 %v2505_v20  ;;  %v1594_v20 = vmul.f32 %v8302_v17, %v8831_v16 }
 0x2b9   : > { %v1384_v12 = vpop.permute.xlu1 %1383  ;;  %v2667_v50 = vpop.f32.mrb[8].mxu0 }
 0x2ba   : > { %v8880_v8 = vadd.f32 %v8810_v47, %v2667_v50  ;;  %v2669_v7 = vpop.f32.mrb[9].mxu0  ;;  %v1589_v4 = vmul.f32 %v8300_v15, %v1384_v12  ;;  %v1590_v60 = vmul.f32 %v8302_v17, %v1384_v12  ;;  %v1199_v12 = vmul.f32 %v8312_v11, %v966_v23 }
 0x2bb   : > { %7567 = vset.pattern.permute.xlu1 %v10630_v32 }
 0x2bc   : > { %10656 = vst [vmem:[#allocation23_spill] sm:$0xff] %v8880_v8  ;;  %v8886_v56 = vmax.f32 %v3032_v2, %v8880_v8  ;;  %1962 = vperm.xlu1 %7567, %v10655_v22   ;;  %v1717_v14 = vadd.f32 %v1589_v4, %v1194_v21  ;;  %v1718_v39 = vadd.f32 %v1590_v60, %v1195_v30  ;;  %v10657_v2 = vld [vmem:[#allocation30_spill] sm:$0xff] }
 0x2bd   : > { %v1593_v4 = vmul.f32 %v8300_v15, %v8831_v16  ;;  %v1198_v60 = vmul.f32 %v8310_v1, %v966_v23  ;;  %v2114_v30 = vmul.f32 %v8315_v25, %v8582_v31  ;;  %v1201_v8 = vmul.f32 %v8312_v11, %v971_v41 }
 0x2be   : > { %v1907_v28 = vpop.permute.xlu1 %1906 }
 0x2bf   : > { %v2112_v55 = vmul.f32 %v8315_v25, %v1907_v28  ;;  %v2113_v35 = vmul.f32 %v8321_v5, %v1907_v28  ;;  %v2117_v28 = vmul.f32 %v8321_v5, %v8592_v42 }
 0x2c0   : > { %7568 = vset.pattern.permute.xlu1 %v10629_v13 }
 0x2c1   : > { %v2240_v40 = vadd.f32 %v2112_v55, %v1717_v14  ;;  %v2241_v61 = vadd.f32 %v2113_v35, %v1718_v39  ;;  %1030 = vperm.xlu1 %7568, %v10657_v2   ;;  %v1722_v14 = vadd.f32 %v1594_v20, %v1199_v12  ;;  %v2116_v20 = vmul.f32 %v8315_v25, %v8592_v42 }
 0x2c2   : > { %v1721_v12 = vadd.f32 %v1593_v4, %v1198_v60 }
 0x2c3   : > { %v961_v51 = vpop.permute.xlu1 %960  ;;  %v2380_v22 = vadd.f32 %v8334_v24, %v2241_v61  ;;  %v2379_v46 = vadd.f32 %v8332_v3, %v2240_v40  ;;  %v976_v40 = vpop.permute.xlu0 %975 }
 0x2c4   : > { %v1196_v16 = vmul.f32 %v8310_v1, %v961_v51  ;;  %v1197_v23 = vmul.f32 %v8312_v11, %v961_v51  ;;  %v2119_v51 = vmul.f32 %v8321_v5, %v8605_v34  ;;  %v1203_v42 = vmul.f32 %v8312_v11, %v976_v40 }
 0x2c5   : > { %7569 = vset.pattern.permute.xlu1 %v10628_v63  ;;  %v2508_v50 = vmax.f32 %v2380_v22, 0.0  ;;  %v2507_v7 = vmax.f32 %v2379_v46, 0.0  ;;  %v2115_v46 = vmul.f32 %v8321_v5, %v8582_v31  ;;  %v1200_v31 = vmul.f32 %v8310_v1, %v971_v41 }
 0x2c6   : > { %1443 = vperm.xlu1 %7569, %v10657_v2  }
 0x2c7   : > { %2795 = vmatprep.mubr.f32.mxu0 %v2508_v50  ;;  %v981_v41 = vpop.permute.xlu0 %980 }
 0x2c8   : > { %2796 = vmatmul.mubr.f32.gmra.mrb[60].mxu0 %v2507_v7  ;;  %v2672_v21 = vpop.f32.mrb[10].mxu0  ;;  %v1598_v7 = vmul.f32 %v8302_v17, %v8844_v27 }
 0x2c9   : > { %v1388_v39 = vpop.permute.xlu1 %1387  ;;  %v8910_v55 = vadd.f32 %v8810_v47, %v2672_v21  ;;  %v2674_v35 = vpop.f32.mrb[11].mxu0 }
 0x2ca   : > { %v1591_v61 = vmul.f32 %v8300_v15, %v1388_v39  ;;  %v1592_v22 = vmul.f32 %v8302_v17, %v1388_v39  ;;  %7570 = vset.pattern.permute.xlu1 %v10630_v32  ;;  %v2245_v35 = vadd.f32 %v2117_v28, %v1722_v14  ;;  %v2244_v28 = vadd.f32 %v2116_v20, %v1721_v12 }
 0x2cb   : > { %1966 = vperm.xlu1 %7570, %v10657_v2   ;;  %v1202_v14 = vmul.f32 %v8310_v1, %v976_v40  ;;  %v2118_v40 = vmul.f32 %v8315_v25, %v8605_v34 }
 0x2cc   : > { %v1719_v21 = vadd.f32 %v1591_v61, %v1196_v16  ;;  %v1720_v39 = vadd.f32 %v1592_v22, %v1197_v23  ;;  %v1597_v16 = vmul.f32 %v8300_v15, %v8844_v27  ;;  %v10658_v22 = vld [vmem:[#allocation31_spill] sm:$0xff]  ;;  %v1205_v27 = vmul.f32 %v8312_v11, %v981_v41 }
 0x2cd   : > { %v1396_v4 = vpop.permute.xlu1 %1395  ;;  %v2384_v20 = vadd.f32 %v8334_v24, %v2245_v35  ;;  %v1204_v35 = vmul.f32 %v8310_v1, %v981_v41 }
 0x2ce   : > { %v1595_v60 = vmul.f32 %v8300_v15, %v1396_v4  ;;  %v1596_v2 = vmul.f32 %v8302_v17, %v1396_v4  ;;  %v2243_v50 = vadd.f32 %v2115_v46, %v1720_v39  ;;  %v2242_v58 = vadd.f32 %v2114_v30, %v1719_v21 }
 0x2cf   : > { %7571 = vset.pattern.permute.xlu1 %v10629_v13  ;;  %v1600_v46 = vmul.f32 %v8302_v17, %v8852_v49  ;;  %v1726_v21 = vadd.f32 %v1598_v7, %v1203_v42  ;;  %v1599_v7 = vmul.f32 %v8300_v15, %v8852_v49  ;;  %v2383_v42 = vadd.f32 %v8332_v3, %v2244_v28 }
 0x2d0   : > { %v1723_v23 = vadd.f32 %v1595_v60, %v1200_v31  ;;  %v1724_v61 = vadd.f32 %v1596_v2, %v1201_v8  ;;  %1035 = vperm.xlu1 %7571, %v10658_v22   ;;  %v2382_v4 = vadd.f32 %v8334_v24, %v2243_v50  ;;  %v2381_v30 = vadd.f32 %v8332_v3, %v2242_v58 }
 0x2d1   : > { %v2120_v50 = vmul.f32 %v8315_v25, %v8611_v43  ;;  %v2123_v58 = vmul.f32 %v8321_v5, %v8621_v52  ;;  %v1725_v60 = vadd.f32 %v1597_v16, %v1202_v14  ;;  %v2249_v2 = vadd.f32 %v2121_v29, %v1726_v21 }
 0x2d2   : > { %v986_v12 = vpop.permute.xlu1 %985  ;;  %v2510_v39 = vmax.f32 %v2382_v4, 0.0  ;;  %v2509_v8 = vmax.f32 %v2381_v30, 0.0  ;;  %v2247_v31 = vadd.f32 %v2119_v51, %v1724_v61  ;;  %v2246_v34 = vadd.f32 %v2118_v40, %v1723_v23 }
 0x2d3   : > { %v1728_v51 = vadd.f32 %v1600_v46, %v1205_v27  ;;  %v2512_v43 = vmax.f32 %v2384_v20, 0.0  ;;  %v2122_v49 = vmul.f32 %v8315_v25, %v8621_v52  ;;  %v1602_v16 = vmul.f32 %v8302_v17, %v8862_v59 }
 0x2d4   : > { %7572 = vset.pattern.permute.xlu1 %v10628_v63  ;;  %2800 = vmatprep.mubr.f32.mxu0 %v2510_v39  ;;  %v2386_v61 = vadd.f32 %v8334_v24, %v2247_v31  ;;  %v1207_v28 = vmul.f32 %v8312_v11, %v986_v12  ;;  %v2511_v23 = vmax.f32 %v2383_v42, 0.0  ;;  %v2248_v29 = vadd.f32 %v2120_v50, %v1725_v60 }
 0x2d5   : > { %1447 = vperm.xlu1 %7572, %v10658_v22   ;;  %2801 = vmatmul.mubr.f32.gmra.mrb[62].mxu0 %v2509_v8  ;;  %v1727_v4 = vadd.f32 %v1599_v7, %v1204_v35  ;;  %v2385_v21 = vadd.f32 %v8332_v3, %v2246_v34  ;;  %v2251_v27 = vadd.f32 %v2123_v58, %v1728_v51 }
 0x2d6   : > { %2805 = vmatprep.mubr.f32.mxu0 %v2512_v43  ;;  %v2514_v20 = vmax.f32 %v2386_v61, 0.0  ;;  %v2388_v40 = vadd.f32 %v8334_v24, %v2249_v2  ;;  %v1601_v39 = vmul.f32 %v8300_v15, %v8862_v59  ;;  %v1206_v8 = vmul.f32 %v8310_v1, %v986_v12 }
 0x2d7   : > { %v1931_v14 = vpop.permute.xlu1 %1930  ;;  %v2677_v41 = vpop.f32.mrb[12].mxu0  ;;  %v1730_v31 = vadd.f32 %v1602_v16, %v1207_v28  ;;  %v10659_v50 = vmax.f32 %v8886_v56, %v8910_v55  ;;  %v2250_v58 = vadd.f32 %v2122_v49, %v1727_v4  ;;  %v2513_v35 = vmax.f32 %v2385_v21, 0.0 }
 0x2d8   : > { %v8965_v30 = vadd.f32 %v8810_v47, %v2677_v41  ;;  %v2679_v46 = vpop.f32.mrb[13].mxu0  ;;  %v2125_v52 = vmul.f32 %v8321_v5, %v1931_v14  ;;  %v2124_v42 = vmul.f32 %v8315_v25, %v1931_v14  ;;  %v2387_v34 = vadd.f32 %v8332_v3, %v2248_v29 }
 0x2d9   : > { %7573 = vset.pattern.permute.xlu1 %v10630_v32  ;;  %2806 = vmatmul.mubr.f32.gmra.mrb[64].mxu0 %v2511_v23  ;;  %v2516_v2 = vmax.f32 %v2388_v40, 0.0  ;;  %v2390_v12 = vadd.f32 %v8334_v24, %v2251_v27  ;;  %v1604_v51 = vmul.f32 %v8302_v17, %v8871_v9  ;;  %v1729_v43 = vadd.f32 %v1601_v39, %v1206_v8 }
 0x2da   : > { %v3035_v7 = vmax.f32 %v10659_v50, %v8965_v30  ;;  %1970 = vperm.xlu1 %7573, %v10658_v22   ;;  %2810 = vmatprep.mubr.f32.mxu0 %v2514_v20  ;;  %v2253_v59 = vadd.f32 %v2125_v52, %v1730_v31  ;;  %v1603_v22 = vmul.f32 %v8300_v15, %v8871_v9  ;;  %v2515_v16 = vmax.f32 %v2387_v34, 0.0  ;;  %v996_v50 = vpop.permute.xlu0 %995 }
 0x2db   : > { %v2252_v49 = vadd.f32 %v2124_v42, %v1729_v43  ;;  %v2389_v28 = vadd.f32 %v8332_v3, %v2250_v58  ;;  %v2518_v41 = vmax.f32 %v2390_v12, 0.0 }
 0x2dc   : > { %v991_v60 = vpop.permute.xlu1 %990  ;;  %v2392_v23 = vadd.f32 %v8334_v24, %v2253_v59 }
 0x2dd   : > { %v1209_v56 = vmul.f32 %v8312_v11, %v991_v60  ;;  %2811 = vmatmul.mubr.f32.gmra.mrb[66].mxu0 %v2513_v35  ;;  %v1208_v61 = vmul.f32 %v8310_v1, %v991_v60  ;;  %v2517_v20 = vmax.f32 %v2389_v28, 0.0  ;;  %v2391_v39 = vadd.f32 %v8332_v3, %v2252_v49 }
 0x2de   : > { %7574 = vset.pattern.permute.xlu1 %v10629_v13  ;;  %2815 = vmatprep.mubr.f32.mxu0 %v2516_v2  ;;  %v2520_v31 = vmax.f32 %v2392_v23, 0.0  ;;  %v1210_v35 = vmul.f32 %v8310_v1, %v996_v50  ;;  %v1211_v2 = vmul.f32 %v8312_v11, %v996_v50 }
 0x2df   : > { %1040 = vperm.xlu1 %7574, %v8214_v45   ;;  %v1732_v29 = vadd.f32 %v1604_v51, %v1209_v56  ;;  %v1731_v46 = vadd.f32 %v1603_v22, %v1208_v61 }
 0x2e1   : > { %v1935_v14 = vpop.permute.xlu1 %1934  ;;  %2816 = vmatmul.mubr.f32.gmra.mrb[68].mxu0 %v2515_v16 }
 0x2e2   : > { %v2126_v4 = vmul.f32 %v8315_v25, %v1935_v14  ;;  %v2127_v9 = vmul.f32 %v8321_v5, %v1935_v14  ;;  %2820 = vmatprep.mubr.f32.mxu0 %v2518_v41 }
 0x2e3   : > { %v2682_v21 = vpop.f32.mrb[14].mxu0  ;;  %7575 = vset.pattern.permute.xlu1 %v10628_v63 }
 0x2e4   : > { %v2255_v27 = vadd.f32 %v2127_v9, %v1732_v29  ;;  %v8996_v52 = vadd.f32 %v8810_v47, %v2682_v21  ;;  %v2684_v40 = vpop.f32.mrb[15].mxu0  ;;  %v2254_v8 = vadd.f32 %v2126_v4, %v1731_v46  ;;  %1451 = vperm.xlu1 %7575, %v8214_v45   ;;  %v2519_v45 = vmax.f32 %v2391_v39, 0.0  ;;  %v1001_v46 = vpop.permute.xlu0 %1000 }
 0x2e5   : > { %2821 = vmatmul.mubr.f32.gmra.mrb[70].mxu0 %v2517_v20 }
 0x2e6   : > { %v9001_v58 = vmax.f32 %v3035_v7, %v8996_v52  ;;  %v1416_v42 = vpop.permute.xlu1 %1415  ;;  %v2394_v60 = vadd.f32 %v8334_v24, %v2255_v27  ;;  %2825 = vmatprep.mubr.f32.mxu0 %v2520_v31  ;;  %v2393_v7 = vadd.f32 %v8332_v3, %v2254_v8  ;;  %v1212_v31 = vmul.f32 %v8310_v1, %v1001_v46 }
 0x2e7   : > { %v1605_v34 = vmul.f32 %v8300_v15, %v1416_v42  ;;  %v2687_v59 = vpop.f32.mrb[16].mxu0  ;;  %v1606_v12 = vmul.f32 %v8302_v17, %v1416_v42  ;;  %v1213_v42 = vmul.f32 %v8312_v11, %v1001_v46 }
 0x2e8   : > { %v2689_v51 = vpop.f32.mrb[17].mxu0  ;;  %v2522_v43 = vmax.f32 %v2394_v60, 0.0  ;;  %1459 = vperm.xlu1 %7575, %v8249_v57   ;;  %v9011_v22 = vadd.f32 %v8810_v47, %v2687_v59  ;;  %v2521_v57 = vmax.f32 %v2393_v7, 0.0 }
 0x2e9   : > { %2826 = vmatmul.mubr.f32.gmra.mrb[72].mxu0 %v2519_v45  ;;  %v1733_v56 = vadd.f32 %v1605_v34, %v1210_v35  ;;  %v1734_v16 = vadd.f32 %v1606_v12, %v1211_v2 }
 0x2ea   : > { %2830 = vmatprep.mubr.f32.mxu0 %v2522_v43 }
 0x2eb   : > { %v1939_v61 = vpop.permute.xlu1 %1938  ;;  %v2692_v49 = vpop.f32.mrb[18].mxu0 }
 0x2ec   : > { %v2128_v28 = vmul.f32 %v8315_v25, %v1939_v61  ;;  %v2129_v14 = vmul.f32 %v8321_v5, %v1939_v61  ;;  %v9016_v41 = vadd.f32 %v8810_v47, %v2692_v49  ;;  %v2694_v23 = vpop.f32.mrb[19].mxu0  ;;  %7577 = vset.pattern.permute.xlu1 %v10629_v13 }
 0x2ed   : > { %1065 = vperm.xlu1 %7577, %v8273_v0   ;;  %2831 = vmatmul.mubr.f32.gmra.mrb[74].mxu0 %v2521_v57 }
 0x2ee   : > { %v2256_v29 = vadd.f32 %v2128_v28, %v1733_v56  ;;  %v2257_v4 = vadd.f32 %v2129_v14, %v1734_v16  ;;  %v3043_v9 = vmax.f32 %v9011_v22, %v9016_v41 }
 0x2ef   : > { %v2697_v21 = vpop.f32.mrb[20].mxu0 }
 0x2f0   : > { %v1420_v27 = vpop.permute.xlu1 %1419  ;;  %v9023_v20 = vadd.f32 %v8810_v47, %v2697_v21  ;;  %v2699_v40 = vpop.f32.mrb[21].mxu0  ;;  %v2396_v39 = vadd.f32 %v8334_v24, %v2257_v4  ;;  %v2395_v8 = vadd.f32 %v8332_v3, %v2256_v29 }
 0x2f1   : > { %v1607_v50 = vmul.f32 %v8300_v15, %v1420_v27  ;;  %v1608_v60 = vmul.f32 %v8302_v17, %v1420_v27  ;;  %7578 = vset.pattern.permute.xlu1 %v10630_v32 }
 0x2f2   : > { %v3044_v35 = vmax.f32 %v3043_v9, %v9023_v20  ;;  %v2524_v34 = vmax.f32 %v2396_v39, 0.0  ;;  %1994 = vperm.xlu1 %7578, %v8273_v0   ;;  %v2523_v2 = vmax.f32 %v2395_v8, 0.0 }
 0x2f3   : > { %v2702_v59 = vpop.f32.mrb[22].mxu0  ;;  %v1735_v51 = vadd.f32 %v1607_v50, %v1212_v31  ;;  %v1736_v7 = vadd.f32 %v1608_v60, %v1213_v42 }
 0x2f4   : > { %2835 = vmatprep.mubr.f32.mxu0 %v2524_v34  ;;  %v9035_v12 = vadd.f32 %v8810_v47, %v2702_v59  ;;  %v2704_v45 = vpop.f32.mrb[23].mxu0 }
 0x2f5   : > { %v1943_v43 = vpop.permute.xlu1 %1942  ;;  %2836 = vmatmul.mubr.f32.gmra.mrb[76].mxu0 %v2523_v2 }
 0x2f6   : > { %v2130_v56 = vmul.f32 %v8315_v25, %v1943_v43  ;;  %v2131_v61 = vmul.f32 %v8321_v5, %v1943_v43  ;;  %v3045_v49 = vmax.f32 %v3044_v35, %v9035_v12  ;;  %7579 = vset.pattern.permute.xlu1 %v10629_v13 }
 0x2f7   : > { %v2707_v0 = vpop.f32.mrb[24].mxu0  ;;  %1070 = vperm.xlu1 %7579, %v8283_v6  }
 0x2f8   : > { %v2258_v16 = vadd.f32 %v2130_v56, %v1735_v51  ;;  %v2259_v28 = vadd.f32 %v2131_v61, %v1736_v7  ;;  %v9043_v14 = vadd.f32 %v8810_v47, %v2707_v0  ;;  %v2709_v23 = vpop.f32.mrb[25].mxu0  ;;  %v3037_v51 = vrot.slane %v9001_v58, 4 }
 0x2fa   : > { %v3046_v57 = vmax.f32 %v3045_v49, %v9043_v14  ;;  %v1006_v29 = vpop.permute.xlu1 %1005  ;;  %v2398_v4 = vadd.f32 %v8334_v24, %v2259_v28  ;;  %v2397_v9 = vadd.f32 %v8332_v3, %v2258_v16 }
 0x2fb   : > { %7580 = vset.pattern.permute.xlu1 %v10630_v32  ;;  %v1214_v60 = vmul.f32 %v8310_v1, %v1006_v29 }
 0x2fc   : > { %v2712_v46 = vpop.f32.mrb[26].mxu0  ;;  %v2526_v21 = vmax.f32 %v2398_v4, 0.0  ;;  %v2525_v27 = vmax.f32 %v2397_v9, 0.0  ;;  %1998 = vperm.xlu1 %7580, %v8283_v6   ;;  %v1215_v6 = vmul.f32 %v8312_v11, %v1006_v29 }
 0x2fd   : > { %v9051_v40 = vadd.f32 %v8810_v47, %v2712_v46  ;;  %v2714_v39 = vpop.f32.mrb[27].mxu0 }
 0x2fe   : > { %2840 = vmatprep.mubr.f32.mxu0 %v2526_v21 }
 0x2ff   : > { %v3047_v8 = vmax.f32 %v3046_v57, %v9051_v40  ;;  %v1424_v31 = vpop.permute.xlu1 %1423  ;;  %2841 = vmatmul.mubr.f32.gmra.mrb[78].mxu0 %v2525_v27  ;;  %v3038_v57 = vmax.f32 %v9001_v58, %v3037_v51 }
 0x300   : > { %v1609_v50 = vmul.f32 %v8300_v15, %v1424_v31  ;;  %v1610_v42 = vmul.f32 %v8302_v17, %v1424_v31  ;;  %7581 = vset.pattern.permute.xlu1 %v10628_v63 }
 0x301   : > { %1479 = vperm.xlu1 %7581, %v10636_v18   ;;  %v3039_v46 = vrot.slane %v3038_v57, 2 }
 0x302   : > { %v1737_v34 = vadd.f32 %v1609_v50, %v1214_v60  ;;  %v1738_v59 = vadd.f32 %v1610_v42, %v1215_v6 }
 0x303   : > { %v3040_v50 = vmax.f32 %v3038_v57, %v3039_v46 }
 0x304   : > { %v1947_v35 = vpop.permute.xlu1 %1946 }
 0x305   : > { %v2132_v2 = vmul.f32 %v8315_v25, %v1947_v35  ;;  %v2133_v45 = vmul.f32 %v8321_v5, %v1947_v35  ;;  %7582 = vset.pattern.permute.xlu1 %v10630_v32 }
 0x306   : > { %2002 = vperm.xlu1 %7582, %v10636_v18  }
 0x307   : > { %v2260_v43 = vadd.f32 %v2132_v2, %v1737_v34  ;;  %v2261_v7 = vadd.f32 %v2133_v45, %v1738_v59  ;;  %v2717_v56 = vpop.f32.mrb[28].mxu0 }
 0x308   : > { %v9066_v61 = vadd.f32 %v8810_v47, %v2717_v56  ;;  %v2719_v49 = vpop.f32.mrb[29].mxu0  ;;  %v9088_v56 = vpop.permute.xlu0 %1045 }
 0x309   : > { %v1011_v0 = vpop.permute.xlu1 %1010  ;;  %v2400_v16 = vadd.f32 %v8334_v24, %v2261_v7  ;;  %v2399_v28 = vadd.f32 %v8332_v3, %v2260_v43  ;;  %v3041_v49 = vrot.slane %v3040_v50, 1 }
 0x30a   : > { %v3048_v23 = vmax.f32 %v3047_v8, %v9066_v61  ;;  %7583 = vset.pattern.permute.xlu1 %v10628_v63  ;;  %v1217_v31 = vmul.f32 %v8312_v11, %v1011_v0 }
 0x30b   : > { %v2528_v29 = vmax.f32 %v2400_v16, 0.0  ;;  %v2527_v4 = vmax.f32 %v2399_v28, 0.0  ;;  %1483 = vperm.xlu1 %7583, %v8329_v37   ;;  %v1216_v37 = vmul.f32 %v8310_v1, %v1011_v0 }
 0x30d   : > { %2845 = vmatprep.mubr.f32.mxu0 %v2528_v29 }
 0x30e   : > { %v1428_v18 = vpop.permute.xlu1 %1427  ;;  %2846 = vmatmul.mubr.f32.gmra.mrb[80].mxu0 %v2527_v4  ;;  %v2722_v9 = vpop.f32.mrb[30].mxu0 }
 0x30f   : > { %v9075_v21 = vadd.f32 %v8810_v47, %v2722_v9  ;;  %v2724_v27 = vpop.f32.mrb[31].mxu0  ;;  %v1611_v39 = vmul.f32 %v8300_v15, %v1428_v18  ;;  %v1612_v8 = vmul.f32 %v8302_v17, %v1428_v18  ;;  %7584 = vset.pattern.permute.xlu1 %v10629_v13 }
 0x310   : > { %1085 = vperm.xlu1 %7584, %v8220_v48  }
 0x311   : > { %v3049_v58 = vmax.f32 %v3048_v23, %v9075_v21  ;;  %v1739_v35 = vadd.f32 %v1611_v39, %v1216_v37  ;;  %v1740_v34 = vadd.f32 %v1612_v8, %v1217_v31  ;;  %v3042_v37 = vmax.f32 %v3040_v50, %v3041_v49 }
 0x313   : > { %v3050_v42 = vrot.slane %v3049_v58, 4  ;;  %v1951_v60 = vpop.permute.xlu1 %1950  ;;  %v2727_v6 = vpop.f32.mrb[32].mxu0 }
 0x314   : > { %v2134_v59 = vmul.f32 %v8315_v25, %v1951_v60  ;;  %v2135_v2 = vmul.f32 %v8321_v5, %v1951_v60  ;;  %v2729_v45 = vpop.f32.mrb[33].mxu0  ;;  %7585 = vset.pattern.permute.xlu1 %v10628_v63  ;;  %v9091_v28 = vadd.f32 %v8810_v47, %v2727_v6  ;;  %v1614_v60 = vmul.f32 %v8302_v17, %v8877_v54 }
 0x315   : > { %v3051_v51 = vmax.f32 %v3049_v58, %v3050_v42  ;;  %1487 = vperm.xlu1 %7585, %v8220_v48   ;;  %v1613_v58 = vmul.f32 %v8300_v15, %v8877_v54  ;;  %v3134_v54 = vmax.f32 %v3042_v37, 0.0 }
 0x316   : > { %v2262_v43 = vadd.f32 %v2134_v59, %v1739_v35  ;;  %v2263_v7 = vadd.f32 %v2135_v2, %v1740_v34  ;;  %v9111_v34 = vpop.permute.xlu0 %1050 }
 0x317   : > { %v3052_v0 = vrot.slane %v3051_v51, 2  ;;  %v2732_v16 = vpop.f32.mrb[34].mxu0 }
 0x318   : > { %v9094_v23 = vadd.f32 %v8810_v47, %v2732_v16  ;;  %v1016_v57 = vpop.permute.xlu1 %1015  ;;  %v2734_v29 = vpop.f32.mrb[35].mxu0  ;;  %v2402_v4 = vadd.f32 %v8334_v24, %v2263_v7  ;;  %v2401_v18 = vadd.f32 %v8332_v3, %v2262_v43 }
 0x319   : > { %v3053_v9 = vmax.f32 %v3051_v51, %v3052_v0  ;;  %v1218_v48 = vmul.f32 %v8310_v1, %v1016_v57  ;;  %v1219_v27 = vmul.f32 %v8312_v11, %v1016_v57  ;;  %7587 = vset.pattern.permute.xlu1 %v10629_v13 }
 0x31a   : > { %v3056_v46 = vmax.f32 %v9091_v28, %v9094_v23  ;;  %v2530_v39 = vmax.f32 %v2402_v4, 0.0  ;;  %v2529_v8 = vmax.f32 %v2401_v18, 0.0  ;;  %1090 = vperm.xlu1 %7587, %v10633_v19  }
 0x31b   : > { %v3054_v31 = vrot.slane %v3053_v9, 1  ;;  %v2737_v42 = vpop.f32.mrb[36].mxu0  ;;  %v1741_v2 = vadd.f32 %v1613_v58, %v1218_v48  ;;  %v1742_v50 = vadd.f32 %v1614_v60, %v1219_v27 }
 0x31c   : > { %v9109_v6 = vadd.f32 %v8810_v47, %v2737_v42  ;;  %v2739_v35 = vpop.f32.mrb[37].mxu0  ;;  %2850 = vmatprep.mubr.f32.mxu0 %v2530_v39  ;;  %v9127_v39 = vpop.permute.xlu0 %1055 }
 0x31d   : > { %v3055_v59 = vmax.f32 %v3053_v9, %v3054_v31  ;;  %v1955_v45 = vpop.permute.xlu1 %1954  ;;  %2851 = vmatmul.mubr.f32.gmra.mrb[82].mxu0 %v2529_v8 }
 0x31e   : > { %v3057_v51 = vmax.f32 %v3056_v46, %v9109_v6  ;;  %v2136_v43 = vmul.f32 %v8315_v25, %v1955_v45  ;;  %v2137_v7 = vmul.f32 %v8321_v5, %v1955_v45  ;;  %7588 = vset.pattern.permute.xlu1 %v10630_v32 }
 0x31f   : > { %v3135_v49 = vmax.f32 %v3055_v59, 0.0  ;;  %v2742_v0 = vpop.f32.mrb[38].mxu0  ;;  %2014 = vperm.xlu1 %7588, %v10633_v19  }
 0x320   : > { %v2264_v16 = vadd.f32 %v2136_v43, %v1741_v2  ;;  %v2265_v57 = vadd.f32 %v2137_v7, %v1742_v50  ;;  %v9119_v29 = vadd.f32 %v8810_v47, %v2742_v0  ;;  %v2744_v4 = vpop.f32.mrb[39].mxu0  ;;  %v9139_v50 = vpop.permute.xlu0 %1060 }
 0x321   : > { %v9122_v18 = vsel %vm3173_vm0, %v3135_v49, %v3134_v54 }
 0x322   : > { %v3058_v9 = vmax.f32 %v3057_v51, %v9119_v29  ;;  %v1021_v48 = vpop.permute.xlu1 %1020  ;;  %v2404_v46 = vadd.f32 %v8334_v24, %v2265_v57  ;;  %v2403_v27 = vadd.f32 %v8332_v3, %v2264_v16 }
 0x323   : > { %v2747_v8 = vpop.f32.mrb[40].mxu0  ;;  %7589 = vset.pattern.permute.xlu1 %v10629_v13  ;;  %v1220_v43 = vmul.f32 %v8310_v1, %v1021_v48  ;;  %v1221_v54 = vmul.f32 %v8312_v11, %v1021_v48 }
 0x324   : > { %v9131_v19 = vadd.f32 %v8810_v47, %v2747_v8  ;;  %v2749_v58 = vpop.f32.mrb[41].mxu0  ;;  %v2532_v37 = vmax.f32 %v2404_v46, 0.0  ;;  %v2531_v31 = vmax.f32 %v2403_v27, 0.0  ;;  %1095 = vperm.xlu1 %7589, %v10634_v36   ;;  %v9153_v8 = vpop.permute.xlu0 %1974 }
 0x326   : > { %v3059_v42 = vmax.f32 %v3058_v9, %v9131_v19  ;;  %2855 = vmatprep.mubr.f32.mxu0 %v2532_v37 }
 0x327   : > { %v1436_v60 = vpop.permute.xlu1 %1435  ;;  %v2752_v35 = vpop.f32.mrb[42].mxu0  ;;  %2856 = vmatmul.mubr.f32.gmra.mrb[84].mxu0 %v2531_v31 }
 0x328   : > { %v1615_v59 = vmul.f32 %v8300_v15, %v1436_v60  ;;  %v9137_v2 = vadd.f32 %v8810_v47, %v2752_v35  ;;  %v2754_v45 = vpop.f32.mrb[43].mxu0  ;;  %v1616_v51 = vmul.f32 %v8302_v17, %v1436_v60  ;;  %7591 = vset.pattern.permute.xlu1 %v10630_v32 }
 0x329   : > { %2018 = vperm.xlu1 %7591, %v10634_v36  }
 0x32a   : > { %10660 = vst [vmem:[#allocation45_spill] sm:$0xff] %v9137_v2  ;;  %v3060_v7 = vmax.f32 %v3059_v42, %v9137_v2  ;;  %v1743_v49 = vadd.f32 %v1615_v59, %v1220_v43  ;;  %v1744_v57 = vadd.f32 %v1616_v51, %v1221_v54  ;;  %v9161_v59 = vpop.permute.xlu0 %1978 }
 0x32c   : > { %v1959_v0 = vpop.permute.xlu1 %1958  ;;  %v2757_v16 = vpop.f32.mrb[44].mxu0 }
 0x32d   : > { %v2138_v4 = vmul.f32 %v8315_v25, %v1959_v0  ;;  %v2139_v9 = vmul.f32 %v8321_v5, %v1959_v0  ;;  %v9150_v46 = vadd.f32 %v8810_v47, %v2757_v16  ;;  %v2759_v27 = vpop.f32.mrb[45].mxu0  ;;  %7592 = vset.pattern.permute.xlu1 %v10628_v63 }
 0x32e   : > { %1499 = vperm.xlu1 %7592, %v10639_v33  }
 0x32f   : > { %10661 = vst [vmem:[#allocation46_spill] sm:$0xff] %v9150_v46  ;;  %v2266_v58 = vadd.f32 %v2138_v4, %v1743_v49  ;;  %v2267_v36 = vadd.f32 %v2139_v9, %v1744_v57  ;;  %v3061_v48 = vmax.f32 %v3060_v7, %v9150_v46  ;;  %v9173_v57 = vpop.permute.xlu0 %1982 }
 0x331   : > { %v1026_v37 = vpop.permute.xlu1 %1025  ;;  %v2406_v31 = vadd.f32 %v8334_v24, %v2267_v36  ;;  %v2405_v42 = vadd.f32 %v8332_v3, %v2266_v58 }
 0x332   : > { %7593 = vset.pattern.permute.xlu1 %v10630_v32  ;;  %v1222_v0 = vmul.f32 %v8310_v1, %v1026_v37 }
 0x333   : > { %v2534_v60 = vmax.f32 %v2406_v31, 0.0  ;;  %v2533_v35 = vmax.f32 %v2405_v42, 0.0  ;;  %2022 = vperm.xlu1 %7593, %v10639_v33   ;;  %v1223_v33 = vmul.f32 %v8312_v11, %v1026_v37 }
 0x335   : > { %2860 = vmatprep.mubr.f32.mxu0 %v2534_v60 }
 0x336   : > { %v1440_v45 = vpop.permute.xlu1 %1439  ;;  %2861 = vmatmul.mubr.f32.gmra.mrb[86].mxu0 %v2533_v35 }
 0x337   : > { %v1617_v51 = vmul.f32 %v8300_v15, %v1440_v45  ;;  %v2762_v43 = vpop.f32.mrb[46].mxu0  ;;  %v1618_v7 = vmul.f32 %v8302_v17, %v1440_v45  ;;  %7594 = vset.pattern.permute.xlu1 %v10628_v63  ;;  %v9181_v45 = vpop.permute.xlu0 %1986 }
 0x338   : > { %v9167_v54 = vadd.f32 %v8810_v47, %v2762_v43  ;;  %v2764_v49 = vpop.f32.mrb[47].mxu0  ;;  %1503 = vperm.xlu1 %7594, %v10641_v44  }
 0x339   : > { %v1745_v4 = vadd.f32 %v1617_v51, %v1222_v0  ;;  %v1746_v27 = vadd.f32 %v1618_v7, %v1223_v33 }
 0x33a   : > { %10662 = vst [vmem:[#allocation26_spill] sm:$0xff] %v9167_v54  ;;  %v3062_v16 = vmax.f32 %v3061_v48, %v9167_v54 }
 0x33b   : > { %v1963_v9 = vpop.permute.xlu1 %1962 }
 0x33c   : > { %v3063_v58 = vrot.slane %v3062_v16, 4  ;;  %v2140_v36 = vmul.f32 %v8315_v25, %v1963_v9  ;;  %v2141_v47 = vmul.f32 %v8321_v5, %v1963_v9  ;;  %7596 = vset.pattern.permute.xlu1 %v10629_v13 }
 0x33d   : > { %1110 = vperm.xlu1 %7596, %v10644_v62  }
 0x33e   : > { %v3064_v31 = vmax.f32 %v3062_v16, %v3063_v58  ;;  %v2268_v42 = vadd.f32 %v2140_v36, %v1745_v4  ;;  %v2269_v60 = vadd.f32 %v2141_v47, %v1746_v27  ;;  %v9185_v4 = vpop.permute.xlu0 %1990 }
 0x340   : > { %v3065_v44 = vrot.slane %v3064_v31, 2  ;;  %v1031_v37 = vpop.permute.xlu1 %1030  ;;  %v2408_v48 = vadd.f32 %v8334_v24, %v2269_v60  ;;  %v2407_v35 = vadd.f32 %v8332_v3, %v2268_v42 }
 0x341   : > { %7597 = vset.pattern.permute.xlu1 %v10628_v63  ;;  %v1225_v36 = vmul.f32 %v8312_v11, %v1031_v37 }
 0x342   : > { %v3066_v51 = vmax.f32 %v3064_v31, %v3065_v44  ;;  %v2536_v43 = vmax.f32 %v2408_v48, 0.0  ;;  %v2535_v7 = vmax.f32 %v2407_v35, 0.0  ;;  %1507 = vperm.xlu1 %7597, %v10644_v62   ;;  %v1224_v62 = vmul.f32 %v8310_v1, %v1031_v37  ;;  %v9200_v35 = vpop.permute.xlu0 %2006 }
 0x344   : > { %v3067_v49 = vrot.slane %v3066_v51, 1  ;;  %2865 = vmatprep.mubr.f32.mxu0 %v2536_v43 }
 0x345   : > { %v1444_v0 = vpop.permute.xlu1 %1443  ;;  %2866 = vmatmul.mubr.f32.gmra.mrb[88].mxu0 %v2535_v7  ;;  %v2767_v16 = vpop.f32.mrb[48].mxu0 }
 0x346   : > { %v3068_v33 = vmax.f32 %v3066_v51, %v3067_v49  ;;  %v1619_v9 = vmul.f32 %v8300_v15, %v1444_v0  ;;  %v1620_v27 = vmul.f32 %v8302_v17, %v1444_v0  ;;  %7598 = vset.pattern.permute.xlu1 %v10629_v13  ;;  %v2769_v58 = vpop.f32.mrb[49].mxu0 }
 0x347   : > { %1115 = vperm.xlu1 %7598, %v10645_v10  }
 0x348   : > { %v3136_v63 = vmax.f32 %v3068_v33, 0.0  ;;  %v1747_v42 = vadd.f32 %v1619_v9, %v1224_v62  ;;  %v1748_v60 = vadd.f32 %v1620_v27, %v1225_v36  ;;  %v9207_v33 = vpop.permute.xlu0 %2010 }
 0x34a   : > { %v1967_v47 = vpop.permute.xlu1 %1966  ;;  %v9195_v31 = vsel %vm3175_vm1, %v3136_v63, %v9122_v18 }
 0x34b   : > { %v2142_v44 = vmul.f32 %v8315_v25, %v1967_v47  ;;  %v2143_v48 = vmul.f32 %v8321_v5, %v1967_v47  ;;  %7600 = vset.pattern.permute.xlu1 %v10630_v32 }
 0x34c   : > { %2034 = vperm.xlu1 %7600, %v10645_v10   ;;  %v9212_v10 = vld [vmem:[%s10467_s4] ss:$0 sm:$0xff] }
 0x34d   : > { %v2270_v51 = vadd.f32 %v2142_v44, %v1747_v42  ;;  %v2271_v43 = vadd.f32 %v2143_v48, %v1748_v60  ;;  %v9215_v58 = vadd.f32 %v9212_v10, %v2767_v16  ;;  %v1456_v60 = vpop.permute.xlu0 %1455 }
 0x34f   : > { %v1036_v37 = vpop.permute.xlu1 %1035  ;;  %v2410_v7 = vadd.f32 %v8334_v24, %v2271_v43  ;;  %v2409_v18 = vadd.f32 %v8332_v3, %v2270_v51  ;;  %10663 = vst [vmem:[#allocation38_spill] sm:$0xff] %v9215_v58 }
 0x350   : > { %7601 = vset.pattern.permute.xlu1 %v10629_v13  ;;  %v1226_v42 = vmul.f32 %v8310_v1, %v1036_v37  ;;  %v1227_v16 = vmul.f32 %v8312_v11, %v1036_v37 }
 0x351   : > { %v2538_v49 = vmax.f32 %v2410_v7, 0.0  ;;  %v2537_v0 = vmax.f32 %v2409_v18, 0.0  ;;  %1120 = vperm.xlu1 %7601, %v10647_v53  }
 0x353   : > { %2870 = vmatprep.mubr.f32.mxu0 %v2538_v49  ;;  %v1626_v49 = vmul.f32 %v8302_v17, %v1456_v60 }
 0x354   : > { %v1448_v9 = vpop.permute.xlu1 %1447  ;;  %2871 = vmatmul.mubr.f32.gmra.mrb[90].mxu0 %v2537_v0  ;;  %v2772_v27 = vpop.f32.mrb[50].mxu0 }
 0x355   : > { %v9218_v13 = vadd.f32 %v9212_v10, %v2772_v27  ;;  %v2774_v63 = vpop.f32.mrb[51].mxu0  ;;  %7602 = vset.pattern.permute.xlu1 %v10630_v32  ;;  %v1621_v62 = vmul.f32 %v8300_v15, %v1448_v9  ;;  %v1622_v36 = vmul.f32 %v8302_v17, %v1448_v9 }
 0x356   : > { %2038 = vperm.xlu1 %7602, %v10647_v53   ;;  %v1231_v53 = vmul.f32 %v8312_v11, %v9088_v56 }
 0x357   : > { %10664 = vst [vmem:[#allocation32_spill] sm:$0xff] %v9218_v13  ;;  %v3069_v47 = vmax.f32 %v9215_v58, %v9218_v13  ;;  %v1749_v48 = vadd.f32 %v1621_v62, %v1226_v42  ;;  %v1750_v51 = vadd.f32 %v1622_v36, %v1227_v16  ;;  %v1230_v36 = vmul.f32 %v8310_v1, %v9088_v56  ;;  %v1464_v16 = vpop.permute.xlu0 %1463 }
 0x358   : > { %v1625_v42 = vmul.f32 %v8300_v15, %v1456_v60  ;;  %v2148_v56 = vmul.f32 %v8315_v25, %v9161_v59 }
 0x359   : > { %v1971_v44 = vpop.permute.xlu1 %1970 }
 0x35a   : > { %v2144_v43 = vmul.f32 %v8315_v25, %v1971_v44  ;;  %v2145_v32 = vmul.f32 %v8321_v5, %v1971_v44  ;;  %v1753_v60 = vadd.f32 %v1625_v42, %v1230_v36  ;;  %v2146_v42 = vmul.f32 %v8315_v25, %v9153_v8 }
 0x35b   : > { %v1468_v36 = vpop.permute.xlu0 %1467 }
 0x35c   : > { %v2272_v7 = vadd.f32 %v2144_v43, %v1749_v48  ;;  %v2273_v18 = vadd.f32 %v2145_v32, %v1750_v51  ;;  %v2149_v43 = vmul.f32 %v8321_v5, %v9161_v59  ;;  %v1754_v32 = vadd.f32 %v1626_v49, %v1231_v53 }
 0x35d   : > { %v1234_v49 = vmul.f32 %v8310_v1, %v9127_v39  ;;  %v1630_v59 = vmul.f32 %v8302_v17, %v1464_v16  ;;  %v2276_v13 = vadd.f32 %v2148_v56, %v1753_v60  ;;  %v1236_v60 = vmul.f32 %v8310_v1, %v9139_v50 }
 0x35e   : > { %v2777_v0 = vpop.f32.mrb[52].mxu0  ;;  %v1041_v9 = vpop.permute.xlu1 %1040  ;;  %v2412_v63 = vadd.f32 %v8334_v24, %v2273_v18  ;;  %v2411_v62 = vadd.f32 %v8332_v3, %v2272_v7  ;;  %v1232_v18 = vmul.f32 %v8310_v1, %v9111_v34  ;;  %v1233_v7 = vmul.f32 %v8312_v11, %v9111_v34 }
 0x35f   : > { %v9234_v27 = vadd.f32 %v9212_v10, %v2777_v0  ;;  %v2779_v37 = vpop.f32.mrb[53].mxu0  ;;  %v1235_v34 = vmul.f32 %v8312_v11, %v9127_v39  ;;  %v1629_v39 = vmul.f32 %v8300_v15, %v1464_v16 }
 0x360   : > { %v2540_v48 = vmax.f32 %v2412_v63, 0.0  ;;  %v2539_v51 = vmax.f32 %v2411_v62, 0.0  ;;  %v1229_v37 = vmul.f32 %v8312_v11, %v1041_v9  ;;  %v2277_v62 = vadd.f32 %v2149_v43, %v1754_v32 }
 0x361   : > { %10665 = vst [vmem:[#allocation39_spill] sm:$0xff] %v9234_v27  ;;  %v9242_v44 = vmax.f32 %v3069_v47, %v9234_v27  ;;  %v1228_v47 = vmul.f32 %v8310_v1, %v1041_v9  ;;  %v2147_v9 = vmul.f32 %v8321_v5, %v9153_v8  ;;  %v2151_v27 = vmul.f32 %v8321_v5, %v9173_v57 }
 0x362   : > { %2875 = vmatprep.mubr.f32.mxu0 %v2540_v48  ;;  %v2153_v8 = vmul.f32 %v8321_v5, %v9181_v45 }
 0x363   : > { %v1452_v0 = vpop.permute.xlu1 %1451  ;;  %2876 = vmatmul.mubr.f32.gmra.mrb[92].mxu0 %v2539_v51 }
 0x364   : > { %v1623_v63 = vmul.f32 %v8300_v15, %v1452_v0  ;;  %v1624_v53 = vmul.f32 %v8302_v17, %v1452_v0  ;;  %v1237_v0 = vmul.f32 %v8312_v11, %v9139_v50 }
 0x366   : > { %v1751_v48 = vadd.f32 %v1623_v63, %v1228_v47  ;;  %v1752_v51 = vadd.f32 %v1624_v53, %v1229_v37  ;;  %v1758_v47 = vadd.f32 %v1630_v59, %v1235_v34  ;;  %v1632_v37 = vmul.f32 %v8302_v17, %v1468_v36  ;;  %v1472_v59 = vpop.permute.xlu0 %1471 }
 0x367   : > { %v1460_v43 = vpop.permute.xlu1 %1459  ;;  %v2416_v63 = vadd.f32 %v8334_v24, %v2277_v62  ;;  %v1757_v34 = vadd.f32 %v1629_v39, %v1234_v49 }
 0x368   : > { %v2274_v32 = vadd.f32 %v2146_v42, %v1751_v48  ;;  %v2275_v58 = vadd.f32 %v2147_v9, %v1752_v51  ;;  %v1627_v54 = vmul.f32 %v8300_v15, %v1460_v43  ;;  %v1628_v46 = vmul.f32 %v8302_v17, %v1460_v43 }
 0x369   : > { %v2150_v42 = vmul.f32 %v8315_v25, %v9173_v57  ;;  %v2152_v9 = vmul.f32 %v8315_v25, %v9181_v45  ;;  %v2155_v45 = vmul.f32 %v8321_v5, %v9185_v4  ;;  %v1760_v49 = vadd.f32 %v1632_v37, %v1237_v0 }
 0x36a   : > { %v1755_v53 = vadd.f32 %v1627_v54, %v1232_v18  ;;  %v1756_v2 = vadd.f32 %v1628_v46, %v1233_v7  ;;  %v2414_v56 = vadd.f32 %v8334_v24, %v2275_v58  ;;  %v2413_v16 = vadd.f32 %v8332_v3, %v2274_v32 }
 0x36b   : > { %v2415_v58 = vadd.f32 %v8332_v3, %v2276_v13  ;;  %v2281_v18 = vadd.f32 %v2153_v8, %v1758_v47  ;;  %v1631_v7 = vmul.f32 %v8300_v15, %v1468_v36  ;;  %v2154_v13 = vmul.f32 %v8315_v25, %v9185_v4  ;;  %v1476_v47 = vpop.permute.xlu0 %1475 }
 0x36c   : > { %v2279_v48 = vadd.f32 %v2151_v27, %v1756_v2  ;;  %v1066_v51 = vpop.permute.xlu1 %1065  ;;  %v2542_v62 = vmax.f32 %v2414_v56, 0.0  ;;  %v2541_v46 = vmax.f32 %v2413_v16, 0.0  ;;  %v2278_v43 = vadd.f32 %v2150_v42, %v1755_v53 }
 0x36d   : > { %v2782_v54 = vpop.f32.mrb[54].mxu0  ;;  %v2544_v2 = vmax.f32 %v2416_v63, 0.0  ;;  %v2280_v36 = vadd.f32 %v2152_v9, %v1757_v34  ;;  %v1239_v32 = vmul.f32 %v8312_v11, %v1066_v51  ;;  %v1759_v8 = vadd.f32 %v1631_v7, %v1236_v60 }
 0x36e   : > { %v9287_v50 = vadd.f32 %v9212_v10, %v2782_v54  ;;  %v2784_v57 = vpop.f32.mrb[55].mxu0  ;;  %2880 = vmatprep.mubr.f32.mxu0 %v2542_v62  ;;  %v2418_v27 = vadd.f32 %v8334_v24, %v2279_v48  ;;  %v2543_v56 = vmax.f32 %v2415_v58, 0.0  ;;  %v2417_v0 = vadd.f32 %v8332_v3, %v2278_v43 }
 0x36f   : > { %2881 = vmatmul.mubr.f32.gmra.mrb[94].mxu0 %v2541_v46  ;;  %v2420_v37 = vadd.f32 %v8334_v24, %v2281_v18  ;;  %v2283_v63 = vadd.f32 %v2155_v45, %v1760_v49  ;;  %v1634_v16 = vmul.f32 %v8302_v17, %v1472_v59  ;;  %v1238_v4 = vmul.f32 %v8310_v1, %v1066_v51  ;;  %v9306_v43 = vpop.permute.xlu0 %1491 }
 0x370   : > { %v3071_v39 = vmax.f32 %v9242_v44, %v9287_v50  ;;  %2885 = vmatprep.mubr.f32.mxu0 %v2544_v2  ;;  %v2546_v42 = vmax.f32 %v2418_v27, 0.0  ;;  %v2419_v60 = vadd.f32 %v8332_v3, %v2280_v36  ;;  %v2282_v34 = vadd.f32 %v2154_v13, %v1759_v8 }
 0x371   : > { %v1995_v53 = vpop.permute.xlu1 %1994  ;;  %v1762_v9 = vadd.f32 %v1634_v16, %v1239_v32  ;;  %v1633_v48 = vmul.f32 %v8300_v15, %v1472_v59  ;;  %v2545_v54 = vmax.f32 %v2417_v0, 0.0  ;;  %v2548_v18 = vmax.f32 %v2420_v37, 0.0 }
 0x372   : > { %v2157_v44 = vmul.f32 %v8321_v5, %v1995_v53  ;;  %v2156_v62 = vmul.f32 %v8315_v25, %v1995_v53  ;;  %v2422_v7 = vadd.f32 %v8334_v24, %v2283_v63  ;;  %v2547_v2 = vmax.f32 %v2419_v60, 0.0 }
 0x373   : > { %2886 = vmatmul.mubr.f32.gmra.mrb[96].mxu0 %v2543_v56  ;;  %v1761_v57 = vadd.f32 %v1633_v48, %v1238_v4  ;;  %v2421_v59 = vadd.f32 %v8332_v3, %v2282_v34  ;;  %v1635_v27 = vmul.f32 %v8300_v15, %v1476_v47  ;;  %v1636_v13 = vmul.f32 %v8302_v17, %v1476_v47  ;;  %v9316_v16 = vpop.permute.xlu0 %1495 }
 0x374   : > { %2890 = vmatprep.mubr.f32.mxu0 %v2546_v42  ;;  %v2285_v46 = vadd.f32 %v2157_v44, %v1762_v9  ;;  %v2550_v36 = vmax.f32 %v2422_v7, 0.0 }
 0x375   : > { %v2284_v49 = vadd.f32 %v2156_v62, %v1761_v57  ;;  %v2549_v47 = vmax.f32 %v2421_v59, 0.0 }
 0x376   : > { %v1071_v58 = vpop.permute.xlu1 %1070  ;;  %v2424_v32 = vadd.f32 %v8334_v24, %v2285_v46 }
 0x377   : > { %2891 = vmatmul.mubr.f32.gmra.mrb[98].mxu0 %v2545_v54  ;;  %v1240_v51 = vmul.f32 %v8310_v1, %v1071_v58  ;;  %v1241_v45 = vmul.f32 %v8312_v11, %v1071_v58  ;;  %v2423_v4 = vadd.f32 %v8332_v3, %v2284_v49 }
 0x378   : > { %2895 = vmatprep.mubr.f32.mxu0 %v2548_v18  ;;  %v2552_v34 = vmax.f32 %v2424_v32, 0.0 }
 0x379   : > { %v1763_v53 = vadd.f32 %v1635_v27, %v1240_v51  ;;  %v1764_v56 = vadd.f32 %v1636_v13, %v1241_v45  ;;  %v2551_v46 = vmax.f32 %v2423_v4, 0.0  ;;  %v1076_v51 = vpop.permute.xlu0 %1075 }
 0x37a   : > { %v1242_v45 = vmul.f32 %v8310_v1, %v1076_v51 }
 0x37b   : > { %v1999_v8 = vpop.permute.xlu1 %1998  ;;  %2896 = vmatmul.mubr.f32.gmra.mrb[100].mxu0 %v2547_v2 }
 0x37c   : > { %v2158_v0 = vmul.f32 %v8315_v25, %v1999_v8  ;;  %v2159_v37 = vmul.f32 %v8321_v5, %v1999_v8  ;;  %2900 = vmatprep.mubr.f32.mxu0 %v2550_v36  ;;  %v2787_v63 = vpop.f32.mrb[56].mxu0 }
 0x37d   : > { %v9319_v44 = vadd.f32 %v9212_v10, %v2787_v63  ;;  %v2789_v42 = vpop.f32.mrb[57].mxu0 }
 0x37e   : > { %v2286_v9 = vadd.f32 %v2158_v0, %v1763_v53  ;;  %v2287_v60 = vadd.f32 %v2159_v37, %v1764_v56  ;;  %v1081_v53 = vpop.permute.xlu0 %1080 }
 0x37f   : > { %v9323_v48 = vmax.f32 %v3071_v39, %v9319_v44  ;;  %2901 = vmatmul.mubr.f32.gmra.mrb[102].mxu0 %v2549_v47  ;;  %v1243_v39 = vmul.f32 %v8312_v11, %v1076_v51  ;;  %v1244_v63 = vmul.f32 %v8310_v1, %v1081_v53  ;;  %v1245_v42 = vmul.f32 %v8312_v11, %v1081_v53 }
 0x380   : > { %v1480_v62 = vpop.permute.xlu1 %1479  ;;  %2905 = vmatprep.mubr.f32.mxu0 %v2552_v34  ;;  %v2426_v54 = vadd.f32 %v8334_v24, %v2287_v60  ;;  %v2425_v58 = vadd.f32 %v8332_v3, %v2286_v9  ;;  %v2165_v53 = vmul.f32 %v8321_v5, %v9207_v33 }
 0x381   : > { %v1637_v18 = vmul.f32 %v8300_v15, %v1480_v62  ;;  %v1638_v7 = vmul.f32 %v8302_v17, %v1480_v62 }
 0x382   : > { %v2554_v57 = vmax.f32 %v2426_v54, 0.0  ;;  %v2553_v2 = vmax.f32 %v2425_v58, 0.0  ;;  %v2163_v58 = vmul.f32 %v8321_v5, %v9200_v35 }
 0x383   : > { %2906 = vmatmul.mubr.f32.gmra.mrb[104].mxu0 %v2551_v46  ;;  %v1765_v59 = vadd.f32 %v1637_v18, %v1242_v45  ;;  %v1766_v27 = vadd.f32 %v1638_v7, %v1243_v39  ;;  %v2162_v46 = vmul.f32 %v8315_v25, %v9200_v35 }
 0x384   : > { %2910 = vmatprep.mubr.f32.mxu0 %v2554_v57 }
 0x385   : > { %v2003_v49 = vpop.permute.xlu1 %2002 }
 0x386   : > { %v2160_v13 = vmul.f32 %v8315_v25, %v2003_v49  ;;  %v2161_v36 = vmul.f32 %v8321_v5, %v2003_v49 }
 0x387   : > { %2911 = vmatmul.mubr.f32.gmra.mrb[106].mxu0 %v2553_v2 }
 0x388   : > { %v2288_v32 = vadd.f32 %v2160_v13, %v1765_v59  ;;  %v2289_v8 = vadd.f32 %v2161_v36, %v1766_v27 }
 0x38a   : > { %v1484_v56 = vpop.permute.xlu1 %1483  ;;  %v2428_v0 = vadd.f32 %v8334_v24, %v2289_v8  ;;  %v2427_v37 = vadd.f32 %v8332_v3, %v2288_v32  ;;  %v2164_v8 = vmul.f32 %v8315_v25, %v9207_v33  ;;  %v1643_v33 = vmul.f32 %v8300_v15, %v9306_v43 }
 0x38b   : > { %v1639_v47 = vmul.f32 %v8300_v15, %v1484_v56  ;;  %v1640_v4 = vmul.f32 %v8302_v17, %v1484_v56  ;;  %v2792_v9 = vpop.f32.mrb[58].mxu0 }
 0x38c   : > { %v9340_v60 = vadd.f32 %v9212_v10, %v2792_v9  ;;  %v2794_v34 = vpop.f32.mrb[59].mxu0  ;;  %v2556_v62 = vmax.f32 %v2428_v0, 0.0  ;;  %v2555_v54 = vmax.f32 %v2427_v37, 0.0 }
 0x38d   : > { %v1767_v18 = vadd.f32 %v1639_v47, %v1244_v63  ;;  %v1768_v7 = vadd.f32 %v1640_v4, %v1245_v42 }
 0x38e   : > { %v3073_v57 = vmax.f32 %v9323_v48, %v9340_v60  ;;  %2915 = vmatprep.mubr.f32.mxu0 %v2556_v62 }
 0x38f   : > { %v2290_v51 = vadd.f32 %v2162_v46, %v1767_v18  ;;  %v2291_v45 = vadd.f32 %v2163_v58, %v1768_v7  ;;  %v1086_v39 = vpop.permute.xlu1 %1085  ;;  %2916 = vmatmul.mubr.f32.gmra.mrb[108].mxu0 %v2555_v54  ;;  %v1644_v58 = vmul.f32 %v8302_v17, %v9306_v43 }
 0x390   : > { %v1246_v36 = vmul.f32 %v8310_v1, %v1086_v39  ;;  %v1247_v35 = vmul.f32 %v8312_v11, %v1086_v39 }
 0x391   : > { %v2430_v49 = vadd.f32 %v8334_v24, %v2291_v45  ;;  %v2429_v2 = vadd.f32 %v8332_v3, %v2290_v51 }
 0x393   : > { %v2558_v59 = vmax.f32 %v2430_v49, 0.0  ;;  %v2557_v27 = vmax.f32 %v2429_v2, 0.0 }
 0x394   : > { %v1488_v13 = vpop.permute.xlu1 %1487 }
 0x395   : > { %v1641_v32 = vmul.f32 %v8300_v15, %v1488_v13  ;;  %v1642_v48 = vmul.f32 %v8302_v17, %v1488_v13  ;;  %2920 = vmatprep.mubr.f32.mxu0 %v2558_v59 }
 0x396   : > { %2921 = vmatmul.mubr.f32.gmra.mrb[110].mxu0 %v2557_v27 }
 0x397   : > { %v1769_v56 = vadd.f32 %v1641_v32, %v1246_v36  ;;  %v1770_v0 = vadd.f32 %v1642_v48, %v1247_v35 }
 0x399   : > { %v2292_v37 = vadd.f32 %v2164_v8, %v1769_v56  ;;  %v2293_v63 = vadd.f32 %v2165_v53, %v1770_v0  ;;  %v1091_v42 = vpop.permute.xlu1 %1090  ;;  %v1645_v53 = vmul.f32 %v8300_v15, %v9316_v16  ;;  %v1646_v56 = vmul.f32 %v8302_v17, %v9316_v16 }
 0x39a   : > { %v1248_v47 = vmul.f32 %v8310_v1, %v1091_v42  ;;  %v1249_v9 = vmul.f32 %v8312_v11, %v1091_v42 }
 0x39b   : > { %v2797_v4 = vpop.f32.mrb[60].mxu0  ;;  %v2432_v54 = vadd.f32 %v8334_v24, %v2293_v63  ;;  %v2431_v46 = vadd.f32 %v8332_v3, %v2292_v37 }
 0x39c   : > { %v9361_v34 = vadd.f32 %v9212_v10, %v2797_v4  ;;  %v2799_v62 = vpop.f32.mrb[61].mxu0  ;;  %v1771_v39 = vadd.f32 %v1643_v33, %v1248_v47  ;;  %v1772_v49 = vadd.f32 %v1644_v58, %v1249_v9 }
 0x39d   : > { %v2560_v7 = vmax.f32 %v2432_v54, 0.0  ;;  %v2559_v51 = vmax.f32 %v2431_v46, 0.0  ;;  %v1101_v54 = vpop.permute.xlu0 %1100 }
 0x39e   : > { %v3074_v18 = vmax.f32 %v3073_v57, %v9361_v34  ;;  %v2015_v45 = vpop.permute.xlu1 %2014 }
 0x39f   : > { %v2166_v2 = vmul.f32 %v8315_v25, %v2015_v45  ;;  %v2167_v59 = vmul.f32 %v8321_v5, %v2015_v45  ;;  %2925 = vmatprep.mubr.f32.mxu0 %v2560_v7 }
 0x3a0   : > { %2926 = vmatmul.mubr.f32.gmra.mrb[112].mxu0 %v2559_v51 }
 0x3a1   : > { %v2294_v27 = vadd.f32 %v2166_v2, %v1771_v39  ;;  %v2295_v13 = vadd.f32 %v2167_v59, %v1772_v49 }
 0x3a3   : > { %v1096_v36 = vpop.permute.xlu1 %1095  ;;  %v2434_v35 = vadd.f32 %v8334_v24, %v2295_v13  ;;  %v2433_v43 = vadd.f32 %v8332_v3, %v2294_v27 }
 0x3a4   : > { %v1250_v57 = vmul.f32 %v8310_v1, %v1096_v36  ;;  %v1251_v32 = vmul.f32 %v8312_v11, %v1096_v36  ;;  %v1106_v36 = vpop.permute.xlu0 %1105 }
 0x3a5   : > { %v2562_v48 = vmax.f32 %v2434_v35, 0.0  ;;  %v2561_v8 = vmax.f32 %v2433_v43, 0.0 }
 0x3a6   : > { %v1773_v0 = vadd.f32 %v1645_v53, %v1250_v57  ;;  %v1774_v42 = vadd.f32 %v1646_v56, %v1251_v32  ;;  %v1252_v57 = vmul.f32 %v8310_v1, %v1101_v54  ;;  %v1253_v53 = vmul.f32 %v8312_v11, %v1101_v54 }
 0x3a7   : > { %2930 = vmatprep.mubr.f32.mxu0 %v2562_v48  ;;  %v1254_v54 = vmul.f32 %v8310_v1, %v1106_v36 }
 0x3a8   : > { %v2019_v37 = vpop.permute.xlu1 %2018  ;;  %v2802_v63 = vpop.f32.mrb[62].mxu0  ;;  %2931 = vmatmul.mubr.f32.gmra.mrb[114].mxu0 %v2561_v8 }
 0x3a9   : > { %v2168_v47 = vmul.f32 %v8315_v25, %v2019_v37  ;;  %v2169_v4 = vmul.f32 %v8321_v5, %v2019_v37  ;;  %v9383_v9 = vadd.f32 %v9212_v10, %v2802_v63  ;;  %v2804_v62 = vpop.f32.mrb[63].mxu0 }
 0x3ab   : > { %v2296_v46 = vadd.f32 %v2168_v47, %v1773_v0  ;;  %v2297_v33 = vadd.f32 %v2169_v4, %v1774_v42  ;;  %v3075_v58 = vmax.f32 %v3074_v18, %v9383_v9 }
 0x3ac   : > { %v2807_v16 = vpop.f32.mrb[64].mxu0 }
 0x3ad   : > { %v3076_v7 = vrot.slane %v3075_v58, 4  ;;  %v1500_v51 = vpop.permute.xlu1 %1499  ;;  %v2809_v45 = vpop.f32.mrb[65].mxu0  ;;  %v2436_v39 = vadd.f32 %v8334_v24, %v2297_v33  ;;  %v2435_v49 = vadd.f32 %v8332_v3, %v2296_v46  ;;  %v9392_v32 = vadd.f32 %v9212_v10, %v2807_v16 }
 0x3ae   : > { %v1647_v59 = vmul.f32 %v8300_v15, %v1500_v51  ;;  %v1648_v35 = vmul.f32 %v8302_v17, %v1500_v51  ;;  %v1255_v45 = vmul.f32 %v8312_v11, %v1106_v36 }
 0x3af   : > { %v3077_v2 = vmax.f32 %v3075_v58, %v3076_v7  ;;  %v2564_v27 = vmax.f32 %v2436_v39, 0.0  ;;  %v2563_v13 = vmax.f32 %v2435_v49, 0.0  ;;  %v2027_v7 = vpop.permute.xlu0 %2026 }
 0x3b0   : > { %v2812_v43 = vpop.f32.mrb[66].mxu0  ;;  %v1775_v37 = vadd.f32 %v1647_v59, %v1252_v57  ;;  %v1776_v47 = vadd.f32 %v1648_v35, %v1253_v53  ;;  %v2172_v57 = vmul.f32 %v8315_v25, %v2027_v7 }
 0x3b1   : > { %v3078_v18 = vrot.slane %v3077_v2, 2  ;;  %v9395_v48 = vadd.f32 %v9212_v10, %v2812_v43  ;;  %v2814_v8 = vpop.f32.mrb[67].mxu0  ;;  %2935 = vmatprep.mubr.f32.mxu0 %v2564_v27 }
 0x3b2   : > { %v2023_v56 = vpop.permute.xlu1 %2022  ;;  %2936 = vmatmul.mubr.f32.gmra.mrb[116].mxu0 %v2563_v13 }
 0x3b3   : > { %v3079_v0 = vmax.f32 %v3077_v2, %v3078_v18  ;;  %v3082_v63 = vmax.f32 %v9392_v32, %v9395_v48  ;;  %v2170_v42 = vmul.f32 %v8315_v25, %v2023_v56  ;;  %v2171_v4 = vmul.f32 %v8321_v5, %v2023_v56 }
 0x3b4   : > { %v2817_v62 = vpop.f32.mrb[68].mxu0  ;;  %v2173_v56 = vmul.f32 %v8321_v5, %v2027_v7 }
 0x3b5   : > { %v3080_v46 = vrot.slane %v3079_v0, 1  ;;  %v2298_v33 = vadd.f32 %v2170_v42, %v1775_v37  ;;  %v9403_v58 = vadd.f32 %v9212_v10, %v2817_v62  ;;  %v2819_v16 = vpop.f32.mrb[69].mxu0  ;;  %v2299_v51 = vadd.f32 %v2171_v4, %v1776_v47 }
 0x3b7   : > { %v3081_v39 = vmax.f32 %v3079_v0, %v3080_v46  ;;  %v3083_v49 = vmax.f32 %v3082_v63, %v9403_v58  ;;  %v1504_v2 = vpop.permute.xlu1 %1503  ;;  %v2437_v59 = vadd.f32 %v8332_v3, %v2298_v33  ;;  %v2438_v43 = vadd.f32 %v8334_v24, %v2299_v51 }
 0x3b8   : > { %v1649_v27 = vmul.f32 %v8300_v15, %v1504_v2  ;;  %v1650_v13 = vmul.f32 %v8302_v17, %v1504_v2  ;;  %v2822_v35 = vpop.f32.mrb[70].mxu0 }
 0x3b9   : > { %v3137_v18 = vmax.f32 %v3081_v39, 0.0  ;;  %v9414_v8 = vadd.f32 %v9212_v10, %v2822_v35  ;;  %v2824_v36 = vpop.f32.mrb[71].mxu0  ;;  %v2565_v53 = vmax.f32 %v2437_v59, 0.0  ;;  %v2566_v63 = vmax.f32 %v2438_v43, 0.0  ;;  %v2031_v39 = vpop.permute.xlu0 %2030 }
 0x3ba   : > { %v1777_v0 = vadd.f32 %v1649_v27, %v1254_v54  ;;  %v1778_v37 = vadd.f32 %v1650_v13, %v1255_v45  ;;  %v2174_v36 = vmul.f32 %v8315_v25, %v2031_v39 }
 0x3bb   : > { %v3084_v42 = vmax.f32 %v3083_v49, %v9414_v8  ;;  %v9420_v47 = vsel %vm3177_vm2, %v3137_v18, %v9195_v31  ;;  %2940 = vmatprep.mubr.f32.mxu0 %v2566_v63 }
 0x3bc   : > { %v2300_v4 = vadd.f32 %v2172_v57, %v1777_v0  ;;  %v2301_v62 = vadd.f32 %v2173_v56, %v1778_v37  ;;  %v1111_v46 = vpop.permute.xlu1 %1110  ;;  %v2827_v33 = vpop.f32.mrb[72].mxu0  ;;  %2941 = vmatmul.mubr.f32.gmra.mrb[118].mxu0 %v2565_v53  ;;  %v2175_v53 = vmul.f32 %v8321_v5, %v2031_v39 }
 0x3bd   : > { %v9423_v16 = vadd.f32 %v9212_v10, %v2827_v33  ;;  %v2829_v51 = vpop.f32.mrb[73].mxu0  ;;  %v1256_v2 = vmul.f32 %v8310_v1, %v1111_v46  ;;  %v1257_v13 = vmul.f32 %v8312_v11, %v1111_v46  ;;  %v1512_v63 = vpop.permute.xlu0 %1511 }
 0x3be   : > { %v2440_v54 = vadd.f32 %v8334_v24, %v2301_v62  ;;  %v2439_v7 = vadd.f32 %v8332_v3, %v2300_v4 }
 0x3bf   : > { %v3085_v45 = vmax.f32 %v3084_v42, %v9423_v16 }
 0x3c0   : > { %v2568_v49 = vmax.f32 %v2440_v54, 0.0  ;;  %v2567_v31 = vmax.f32 %v2439_v7, 0.0  ;;  %v2832_v59 = vpop.f32.mrb[74].mxu0 }
 0x3c1   : > { %v1508_v27 = vpop.permute.xlu1 %1507  ;;  %v9431_v35 = vadd.f32 %v9212_v10, %v2832_v59  ;;  %v2834_v18 = vpop.f32.mrb[75].mxu0 }
 0x3c2   : > { %v1651_v43 = vmul.f32 %v8300_v15, %v1508_v27  ;;  %v1652_v57 = vmul.f32 %v8302_v17, %v1508_v27  ;;  %2945 = vmatprep.mubr.f32.mxu0 %v2568_v49 }
 0x3c3   : > { %2946 = vmatmul.mubr.f32.gmra.mrb[120].mxu0 %v2567_v31  ;;  %v3086_v56 = vmax.f32 %v3085_v45, %v9431_v35  ;;  %v1653_v45 = vmul.f32 %v8300_v15, %v1512_v63  ;;  %v1654_v31 = vmul.f32 %v8302_v17, %v1512_v63 }
 0x3c4   : > { %v1779_v0 = vadd.f32 %v1651_v43, %v1256_v2  ;;  %v1780_v37 = vadd.f32 %v1652_v57, %v1257_v13 }
 0x3c6   : > { %v2302_v42 = vadd.f32 %v2174_v36, %v1779_v0  ;;  %v2303_v4 = vadd.f32 %v2175_v53, %v1780_v37  ;;  %v1116_v62 = vpop.permute.xlu1 %1115  ;;  %v1516_v37 = vpop.permute.xlu0 %1515 }
 0x3c7   : > { %v1258_v46 = vmul.f32 %v8310_v1, %v1116_v62  ;;  %v1259_v51 = vmul.f32 %v8312_v11, %v1116_v62 }
 0x3c8   : > { %v2837_v33 = vpop.f32.mrb[76].mxu0  ;;  %v2442_v49 = vadd.f32 %v8334_v24, %v2303_v4  ;;  %v2441_v39 = vadd.f32 %v8332_v3, %v2302_v42 }
 0x3c9   : > { %v9441_v54 = vadd.f32 %v9212_v10, %v2837_v33  ;;  %v2839_v7 = vpop.f32.mrb[77].mxu0  ;;  %v1781_v43 = vadd.f32 %v1653_v45, %v1258_v46  ;;  %v1782_v57 = vadd.f32 %v1654_v31, %v1259_v51  ;;  %v1656_v45 = vmul.f32 %v8302_v17, %v1516_v37 }
 0x3ca   : > { %v2570_v59 = vmax.f32 %v2442_v49, 0.0  ;;  %v2569_v27 = vmax.f32 %v2441_v39, 0.0  ;;  %v1655_v39 = vmul.f32 %v8300_v15, %v1516_v37 }
 0x3cb   : > { %v3087_v2 = vmax.f32 %v3086_v56, %v9441_v54  ;;  %v2035_v13 = vpop.permute.xlu1 %2034 }
 0x3cc   : > { %v2176_v18 = vmul.f32 %v8315_v25, %v2035_v13  ;;  %v2177_v36 = vmul.f32 %v8321_v5, %v2035_v13  ;;  %2950 = vmatprep.mubr.f32.mxu0 %v2570_v59 }
 0x3cd   : > { %2951 = vmatmul.mubr.f32.gmra.mrb[122].mxu0 %v2569_v27 }
 0x3ce   : > { %v2304_v53 = vadd.f32 %v2176_v18, %v1781_v43  ;;  %v2305_v0 = vadd.f32 %v2177_v36, %v1782_v57 }
 0x3d0   : > { %v1121_v42 = vpop.permute.xlu1 %1120  ;;  %v2444_v4 = vadd.f32 %v8334_v24, %v2305_v0  ;;  %v2443_v63 = vadd.f32 %v8332_v3, %v2304_v53 }
 0x3d1   : > { %v1260_v56 = vmul.f32 %v8310_v1, %v1121_v42  ;;  %v1261_v46 = vmul.f32 %v8312_v11, %v1121_v42 }
 0x3d2   : > { %v2842_v62 = vpop.f32.mrb[78].mxu0  ;;  %v2572_v7 = vmax.f32 %v2444_v4, 0.0  ;;  %v2571_v49 = vmax.f32 %v2443_v63, 0.0 }
 0x3d3   : > { %v9455_v33 = vadd.f32 %v9212_v10, %v2842_v62  ;;  %v2844_v51 = vpop.f32.mrb[79].mxu0  ;;  %v1783_v59 = vadd.f32 %v1655_v39, %v1260_v56  ;;  %v1784_v1 = vadd.f32 %v1656_v45, %v1261_v46 }
 0x3d4   : > { %2955 = vmatprep.mubr.f32.mxu0 %v2572_v7 }
 0x3d5   : > { %v3088_v31 = vmax.f32 %v3087_v2, %v9455_v33  ;;  %v2039_v27 = vpop.permute.xlu1 %2038  ;;  %2956 = vmatmul.mubr.f32.gmra.mrb[124].mxu0 %v2571_v49 }
 0x3d6   : > { %v2178_v11 = vmul.f32 %v8315_v25, %v2039_v27  ;;  %v2179_v43 = vmul.f32 %v8321_v5, %v2039_v27 }
 0x3d7   : > { %v3089_v13 = vrot.slane %v3088_v31, 4 }
 0x3d8   : > { %v2306_v18 = vadd.f32 %v2178_v11, %v1783_v59  ;;  %v2307_v36 = vadd.f32 %v2179_v43, %v1784_v1 }
 0x3d9   : > { %v3090_v57 = vmax.f32 %v3088_v31, %v3089_v13 }
 0x3da   : > { %v2446_v15 = vadd.f32 %v8334_v24, %v2307_v36  ;;  %v2445_v17 = vadd.f32 %v8332_v3, %v2306_v18  ;;  %v3143_v18 = vld [vmem:[#allocation6 + $0x88] sm:$0xff] }
 0x3db   : > { %v3091_v53 = vrot.slane %v3090_v57, 2 }
 0x3dc   : > { %v2574_v2 = vmax.f32 %v2446_v15, 0.0  ;;  %v2573_v37 = vmax.f32 %v2445_v17, 0.0 }
 0x3dd   : > { %v3092_v0 = vmax.f32 %v3090_v57, %v3091_v53  ;;  %v3142_v57 = vld [vmem:[#allocation6 + $0x80] sm:$0xff] }
 0x3de   : > { %2960 = vmatprep.mubr.f32.mxu0 %v2574_v2  ;;  %v7184_v36 = vpack.c.bf16 %v3143_v18, %v3142_v57  ;;  %v3144_v2 = vld [vmem:[#allocation6 + $0x90] sm:$0xff]  ;;  %v3154_v18 = vld [vmem:[#allocation6 + $0xe0] sm:$0xff] }
 0x3df   : > { %v3093_v42 = vrot.slane %v3092_v0, 1  ;;  %2961 = vmatmul.mubr.f32.gmra.mrb[126].mxu0 %v2573_v37  ;;  %v3145_v37 = vld [vmem:[#allocation6 + $0x98] sm:$0xff] }
 0x3e0   : > { %7185 = vmatpush3.bf16.msra.mxu1 %v7184_v36  ;;  %v3155_v36 = vld [vmem:[#allocation6 + $0xe8] sm:$0xff] }
 0x3e1   : > { %v3094_v4 = vmax.f32 %v3092_v0, %v3093_v42  ;;  %v2847_v63 = vpop.f32.mrb[80].mxu0  ;;  %v10666_v0 = vmov 0.0|0.0  }
 0x3e2   : > { %v2849_v56 = vpop.f32.mrb[81].mxu0  ;;  %v9469_v24 = vadd.f32 %v9212_v10, %v2847_v63  ;;  %7186 = vmatprep.subr.bf16.mxu1 %v10666_v0  ;;  %v3146_v63 = vld [vmem:[#allocation6 + $0xa0] sm:$0xff] }
 0x3e3   : > { %v3138_v25 = vmax.f32 %v3094_v4, 0.0  ;;  %v7187_v4 = vpack.c.bf16 %v3145_v37, %v3144_v2  ;;  %v3147_v56 = vld [vmem:[#allocation6 + $0xa8] sm:$0xff]  ;;  %v3157_v2 = vld [vmem:[#allocation6 + $0xf8] sm:$0xff]  ;;  %v3258_v37 = vld [vmem:[#allocation6] sm:$0xff] }
 0x3e5   : > { %v9466_v5 = vsel %vm3179_vm3, %v3138_v25, %v9420_v47  ;;  %7188 = vmatpush3.bf16.msra.mxu1 %v7187_v4  ;;  %v7190_v25 = vpack.c.bf16 %v3147_v56, %v3146_v63  ;;  %v10538_v63 = vmov 0.0  }
 0x3e6   : > { %7189 = vmatprep.subr.bf16.mxu1 %v10666_v0  ;;  %6643 = vmatprep.mubr.msk.f32.mxu1 %vm7804_vm4, %v10538_v63 }
 0x3e7   : > { %6969 = vmatprep.mubr.msk.f32.mxu0 %vm7804_vm4, %v10538_v63 }
 0x3e9   : > { %7191 = vmatpush3.bf16.msra.mxu1 %v7190_v25 }
 0x3ea   : > { %7192 = vmatprep.subr.bf16.mxu1 %v10666_v0 }
 0x3f0   : > { %v2852_v62 = vpop.f32.mrb[82].mxu0 }
 0x3f1   : > { %v9472_v3 = vadd.f32 %v9212_v10, %v2852_v62  ;;  %v2854_v46 = vpop.f32.mrb[83].mxu0  ;;  %v3148_v62 = vld [vmem:[#allocation6 + $0xb0] sm:$0xff] }
 0x3f2   : > { %v3149_v46 = vld [vmem:[#allocation6 + $0xb8] sm:$0xff] }
 0x3f3   : > { %v3095_v51 = vmax.f32 %v9469_v24, %v9472_v3 }
 0x3fa   : > { %v2857_v7 = vpop.f32.mrb[84].mxu0 }
 0x3fb   : > { %v9477_v49 = vadd.f32 %v9212_v10, %v2857_v7  ;;  %v2859_v39 = vpop.f32.mrb[85].mxu0  ;;  %v3150_v7 = vld [vmem:[#allocation6 + $0xc0] sm:$0xff] }
 0x3fc   : > { %v3151_v39 = vld [vmem:[#allocation6 + $0xc8] sm:$0xff] }
 0x3fd   : > { %v3096_v45 = vmax.f32 %v3095_v51, %v9477_v49  ;;  %v7193_v51 = vpack.c.bf16 %v3149_v46, %v3148_v62 }
 0x3ff   : > { %7194 = vmatpush3.bf16.msra.mxu1 %v7193_v51 }
 0x400   : > { %7195 = vmatprep.subr.bf16.mxu1 %v10666_v0 }
 0x409   : > { %v2862_v47 = vpop.f32.mrb[86].mxu0 }
 0x40a   : > { %v9481_v31 = vadd.f32 %v9212_v10, %v2862_v47  ;;  %v2864_v59 = vpop.f32.mrb[87].mxu0 }
 0x40c   : > { %v3097_v27 = vmax.f32 %v3096_v45, %v9481_v31  ;;  %v7196_v45 = vpack.c.bf16 %v3151_v39, %v3150_v7 }
 0x40e   : > { %7197 = vmatpush3.bf16.msra.mxu1 %v7196_v45 }
 0x40f   : > { %7198 = vmatprep.subr.bf16.mxu1 %v10666_v0 }
 0x418   : > { %v2867_v1 = vpop.f32.mrb[88].mxu0 }
 0x419   : > { %v9485_v13 = vadd.f32 %v9212_v10, %v2867_v1  ;;  %v2869_v11 = vpop.f32.mrb[89].mxu0  ;;  %v3152_v1 = vld [vmem:[#allocation6 + $0xd0] sm:$0xff] }
 0x41a   : > { %v3153_v11 = vld [vmem:[#allocation6 + $0xd8] sm:$0xff] }
 0x41b   : > { %v3098_v43 = vmax.f32 %v3097_v27, %v9485_v13  ;;  %v7199_v57 = vpack.c.bf16 %v3153_v11, %v3152_v1 }
 0x41d   : > { %7200 = vmatpush3.bf16.msra.mxu1 %v7199_v57 }
 0x41e   : > { %7201 = vmatprep.subr.bf16.mxu1 %v10666_v0 }
 0x427   : > { %v2872_v53 = vpop.f32.mrb[90].mxu0 }
 0x428   : > { %v9489_v15 = vadd.f32 %v9212_v10, %v2872_v53  ;;  %v2874_v17 = vpop.f32.mrb[91].mxu0  ;;  %v7202_v53 = vpack.c.bf16 %v3155_v36, %v3154_v18 }
 0x429   : > { %v3156_v17 = vld [vmem:[#allocation6 + $0xf0] sm:$0xff] }
 0x42a   : > { %v3099_v42 = vmax.f32 %v3098_v43, %v9489_v15  ;;  %7203 = vmatpush3.bf16.msra.mxu1 %v7202_v53  ;;  %v7205_v4 = vpack.c.bf16 %v3157_v2, %v3156_v17 }
 0x42b   : > { %7204 = vmatprep.subr.bf16.mxu1 %v10666_v0 }
 0x42e   : > { %7206 = vmatpush3.bf16.msra.mxu1 %v7205_v4 }
 0x436   : > { %v2877_v47 = vpop.f32.mrb[92].mxu0 }
 0x437   : > { %v9497_v59 = vadd.f32 %v9212_v10, %v2877_v47  ;;  %v2879_v27 = vpop.f32.mrb[93].mxu0 }
 0x439   : > { %v3100_v43 = vmax.f32 %v3099_v42, %v9497_v59  ;;  %v3259_v42 = vld [vmem:[#allocation6 + $0x8] sm:$0xff] }
 0x43a   : > { %v9505_v56 = vpack.c.bf16 %v3259_v42, %v3258_v37 }
 0x43c   : > { %7208 = vmatprep.subr.bf16.mxu1 %v9505_v56 }
 0x442   : > { %v2882_v25 = vpop.f32.mrb[94].mxu0 }
 0x443   : > { %v9510_v62 = vadd.f32 %v9212_v10, %v2882_v25  ;;  %v2884_v46 = vpop.f32.mrb[95].mxu0 }
 0x445   : > { %v3101_v51 = vmax.f32 %v3100_v43, %v9510_v62 }
 0x446   : > { %v2887_v7 = vpop.f32.mrb[96].mxu0 }
 0x447   : > { %v3102_v39 = vrot.slane %v3101_v51, 4  ;;  %v2889_v45 = vpop.f32.mrb[97].mxu0  ;;  %v9515_v11 = vadd.f32 %v9212_v10, %v2887_v7 }
 0x449   : > { %v3103_v47 = vmax.f32 %v3101_v51, %v3102_v39 }
 0x44a   : > { %v2892_v27 = vpop.f32.mrb[98].mxu0 }
 0x44b   : > { %v3104_v1 = vrot.slane %v3103_v47, 2  ;;  %v9518_v57 = vadd.f32 %v9212_v10, %v2892_v27  ;;  %v2894_v18 = vpop.f32.mrb[99].mxu0 }
 0x44d   : > { %v3105_v36 = vmax.f32 %v3103_v47, %v3104_v1  ;;  %v3108_v53 = vmax.f32 %v9515_v11, %v9518_v57 }
 0x44e   : > { %v2897_v17 = vpop.f32.mrb[100].mxu0 }
 0x44f   : > { %v3106_v2 = vrot.slane %v3105_v36, 1  ;;  %v9523_v43 = vadd.f32 %v9212_v10, %v2897_v17  ;;  %v2899_v37 = vpop.f32.mrb[101].mxu0 }
 0x451   : > { %v3107_v4 = vmax.f32 %v3105_v36, %v3106_v2  ;;  %v3109_v42 = vmax.f32 %v3108_v53, %v9523_v43  ;;  %v7605_v53 = vld [vmem:[%s10467_s4] ss:$0 sm:$0xff] }
 0x452   : > { %v2902_v25 = vpop.f32.mrb[102].mxu0 }
 0x453   : > { %v3139_v46 = vmax.f32 %v3107_v4, 0.0  ;;  %v9527_v51 = vadd.f32 %v9212_v10, %v2902_v25  ;;  %v2904_v7 = vpop.f32.mrb[103].mxu0 }
 0x455   : > { %10667 = vst [vmem:[#allocation47_spill] sm:$0xff] %v9527_v51  ;;  %v3110_v39 = vmax.f32 %v3109_v42, %v9527_v51  ;;  %v3182_v45 = vsel %vm3181_vm5, %v3139_v46, %v9466_v5 }
 0x456   : > { %v2907_v47 = vpop.f32.mrb[104].mxu0 }
 0x457   : > { %v9533_v27 = vadd.f32 %v9212_v10, %v2907_v47  ;;  %v2909_v1 = vpop.f32.mrb[105].mxu0 }
 0x459   : > { %10668 = vst [vmem:[#allocation33_spill] sm:$0xff] %v9533_v27  ;;  %v3111_v18 = vmax.f32 %v3110_v39, %v9533_v27 }
 0x45a   : > { %v2912_v36 = vpop.f32.mrb[106].mxu0 }
 0x45b   : > { %v9539_v17 = vadd.f32 %v7605_v53, %v2912_v36  ;;  %v2914_v2 = vpop.f32.mrb[107].mxu0 }
 0x45d   : > { %10669 = vst [vmem:[#allocation40_spill] sm:$0xff] %v9539_v17  ;;  %v3112_v37 = vmax.f32 %v3111_v18, %v9539_v17 }
 0x462   : > { %v2917_v4 = vpop.f32.mrb[108].mxu0 }
 0x463   : > { %v9542_v42 = vadd.f32 %v7605_v53, %v2917_v4  ;;  %v2919_v5 = vpop.f32.mrb[109].mxu0 }
 0x465   : > { %10670 = vst [vmem:[#allocation41_spill] sm:$0xff] %v9542_v42  ;;  %v3113_v10 = vmax.f32 %v3112_v37, %v9542_v42  ;;  %v3260_v42 = vld [vmem:[#allocation6 + $0x10] sm:$0xff] }
 0x469   : > { %v2922_v25 = vpop.f32.mrb[110].mxu0 }
 0x46a   : > { %v9545_v46 = vadd.f32 %v7605_v53, %v2922_v25  ;;  %v2924_v7 = vpop.f32.mrb[111].mxu0 }
 0x46c   : > { %10671 = vst [vmem:[#allocation34_spill] sm:$0xff] %v9545_v46  ;;  %v3114_v39 = vmax.f32 %v3113_v10, %v9545_v46 }
 0x46e   : > { %v3115_v47 = vrot.slane %v3114_v39, 4 }
 0x470   : > { %v3116_v1 = vmax.f32 %v3114_v39, %v3115_v47 }
 0x472   : > { %v3117_v63 = vrot.slane %v3116_v1, 2 }
 0x473   : > { %v2927_v36 = vpop.f32.mrb[112].mxu0 }
 0x474   : > { %v3118_v27 = vmax.f32 %v3116_v1, %v3117_v63  ;;  %v2929_v2 = vpop.f32.mrb[113].mxu0  ;;  %v9548_v5 = vadd.f32 %v7605_v53, %v2927_v36 }
 0x476   : > { %v3119_v51 = vrot.slane %v3118_v27, 1  ;;  %10672 = vst [vmem:[#allocation42_spill] sm:$0xff] %v9548_v5 }
 0x478   : > { %v3120_v18 = vmax.f32 %v3118_v27, %v3119_v51 }
 0x47a   : > { %v3140_v4 = vmax.f32 %v3120_v18, 0.0 }
 0x47b   : > { %v2932_v17 = vpop.f32.mrb[114].mxu0 }
 0x47c   : > { %v9550_v37 = vadd.f32 %v7605_v53, %v2932_v17  ;;  %v2934_v25 = vpop.f32.mrb[115].mxu0  ;;  %v3184_v7 = vsel %vm3183_vm6, %v3140_v4, %v3182_v45 }
 0x47e   : > { %10673 = vst [vmem:[#allocation36_spill] sm:$0xff] %v9550_v37  ;;  %v3121_v10 = vmax.f32 %v9548_v5, %v9550_v37 }
 0x485   : > { %v2937_v39 = vpop.f32.mrb[116].mxu0 }
 0x486   : > { %v9555_v47 = vadd.f32 %v7605_v53, %v2937_v39  ;;  %v2939_v63 = vpop.f32.mrb[117].mxu0 }
 0x488   : > { %10674 = vst [vmem:[#allocation24_spill] sm:$0xff] %v9555_v47  ;;  %v3122_v1 = vmax.f32 %v3121_v10, %v9555_v47 }
 0x48f   : > { %v2942_v51 = vpop.f32.mrb[118].mxu0 }
 0x490   : > { %v9558_v27 = vadd.f32 %v7605_v53, %v2942_v51  ;;  %v2944_v2 = vpop.f32.mrb[119].mxu0 }
 0x492   : > { %10675 = vst [vmem:[#allocation25_spill] sm:$0xff] %v9558_v27  ;;  %v3123_v36 = vmax.f32 %v3122_v1, %v9558_v27 }
 0x496   : > { %v2947_v17 = vpop.f32.mrb[120].mxu0 }
 0x497   : > { %v9561_v18 = vadd.f32 %v7605_v53, %v2947_v17  ;;  %v2949_v25 = vpop.f32.mrb[121].mxu0 }
 0x499   : > { %10676 = vst [vmem:[#allocation27_spill] sm:$0xff] %v9561_v18  ;;  %v3124_v45 = vmax.f32 %v3123_v36, %v9561_v18 }
 0x4a0   : > { %v2952_v4 = vpop.f32.mrb[122].mxu0 }
 0x4a1   : > { %v9564_v37 = vadd.f32 %v7605_v53, %v2952_v4  ;;  %v2954_v39 = vpop.f32.mrb[123].mxu0 }
 0x4a3   : > { %10677 = vst [vmem:[#allocation28_spill] sm:$0xff] %v9564_v37  ;;  %v3125_v63 = vmax.f32 %v3124_v45, %v9564_v37  ;;  %v3261_v45 = vld [vmem:[#allocation6 + $0x18] sm:$0xff] }
 0x4a4   : > { %v7211_v37 = vpack.c.bf16 %v3261_v45, %v3260_v42  ;;  %v3268_v42 = vld [vmem:[#allocation6 + $0x50] sm:$0xff] }
 0x4a5   : > { %v3272_v45 = vld [vmem:[#allocation6 + $0x70] sm:$0xff] }
 0x4a8   : > { %v2957_v5 = vpop.f32.mrb[124].mxu0 }
 0x4a9   : > { %v9567_v10 = vadd.f32 %v7605_v53, %v2957_v5  ;;  %v2959_v51 = vpop.f32.mrb[125].mxu0 }
 0x4aa   : > { %v3338_v51 = vmax.f32 %v8818_v38, 0.0 }
 0x4ab   : > { %v3126_v2 = vmax.f32 %v3125_v63, %v9567_v10 }
 0x4b2   : > { %v2962_v47 = vpop.f32.mrb[126].mxu0 }
 0x4b3   : > { %v9570_v1 = vadd.f32 %v7605_v53, %v2962_v47  ;;  %v2964_v17 = vpop.f32.mrb[127].mxu0  ;;  %v3262_v53 = vld [vmem:[#allocation6 + $0x20] sm:$0xff]  ;;  %v3263_v47 = vld [vmem:[#allocation6 + $0x28] sm:$0xff] }
 0x4b4   : > { %v3266_v17 = vld [vmem:[#allocation6 + $0x40] sm:$0xff] }
 0x4b5   : > { %v3127_v25 = vmax.f32 %v3126_v2, %v9570_v1  ;;  %v3265_v2 = vld [vmem:[#allocation6 + $0x38] sm:$0xff] }
 0x4b7   : > { %v3128_v27 = vrot.slane %v3127_v25, 4 }
 0x4b9   : > { %v3129_v36 = vmax.f32 %v3127_v25, %v3128_v27  ;;  %v7215_v27 = vpack.c.bf16 %v3263_v47, %v3262_v53  ;;  %v3267_v25 = vld [vmem:[#allocation6 + $0x48] sm:$0xff]  ;;  %v10679_v47 = vld [vmem:[#allocation37_spill] sm:$0xff] }
 0x4ba   : > { %v7223_v38 = vpack.c.bf16 %v3267_v25, %v3266_v17  ;;  %v3344_v17 = vmax.f32 %v8965_v30, 0.0  ;;  %v3346_v25 = vmax.f32 %v9011_v22, 0.0  ;;  %v3351_v30 = vmax.f32 %v9051_v40, 0.0 }
 0x4bb   : > { %v3130_v18 = vrot.slane %v3129_v36, 2  ;;  %v3353_v22 = vmax.f32 %v9075_v21, 0.0  ;;  %v3358_v40 = vmax.f32 %v9131_v19, 0.0  ;;  %v3365_v19 = vmax.f32 %v9287_v50, 0.0 }
 0x4bc   : > { %v3372_v50 = vmax.f32 %v9403_v58, 0.0  ;;  %v3379_v58 = vmax.f32 %v9472_v3, 0.0  ;;  %v3386_v3 = vmax.f32 %v9515_v11, 0.0  ;;  %v10691_v11 = vld [vmem:[#allocation34_spill] sm:$0xff] }
 0x4bd   : > { %v3131_v4 = vmax.f32 %v3129_v36, %v3130_v18  ;;  %v3264_v18 = vld [vmem:[#allocation6 + $0x30] sm:$0xff] }
 0x4bf   : > { %v3132_v46 = vrot.slane %v3131_v4, 1 }
 0x4c1   : > { %v3133_v39 = vmax.f32 %v3131_v4, %v3132_v46  ;;  %v7219_v46 = vpack.c.bf16 %v3265_v2, %v3264_v18  ;;  %v3270_v4 = vld [vmem:[#allocation6 + $0x60] sm:$0xff]  ;;  %v10680_v18 = vld [vmem:[#allocation23_spill] sm:$0xff] }
 0x4c2   : > { %v3342_v2 = vmax.f32 %v10680_v18, 0.0 }
 0x4c3   : > { %v3141_v5 = vmax.f32 %v3133_v39, 0.0 }
 0x4c5   : > { %v3186_v63 = vsel %vm3185_vm7, %v3141_v5, %v3184_v7  ;;  %v3269_v7 = vld [vmem:[#allocation6 + $0x58] sm:$0xff] }
 0x4c6   : > { %6644 = vmatmul.mubr.f32.vlgmr.msra.gmra.mrb[0].mxu1 %v3186_v63  ;;  %v7227_v36 = vpack.c.bf16 %v3269_v7, %v3268_v42  ;;  %v3273_v5 = vld [vmem:[#allocation6 + $0x78] sm:$0xff]  ;;  %v10678_v63 = vld [vmem:[#allocation35_spill] sm:$0xff]  ;;  %v3348_v42 = vmax.f32 %v9023_v20, 0.0  ;;  %v3349_v7 = vmax.f32 %v9035_v12, 0.0  ;;  %v3355_v20 = vmax.f32 %v9094_v23, 0.0 }
 0x4c7   : > { %7210 = vmatpush3.bf16.msra.mxu1 %v9505_v56  ;;  %6678 = vmatprep.mubr.f32.mxu1 %v3338_v51  ;;  %v3271_v56 = vld [vmem:[#allocation6 + $0x68] sm:$0xff]  ;;  %v3339_v51 = vmax.f32 %v8821_v26, 0.0  ;;  %v3340_v53 = vmax.f32 %v10678_v63, 0.0  ;;  %v3345_v26 = vmax.f32 %v8996_v52, 0.0  ;;  %v3352_v52 = vmax.f32 %v9066_v61, 0.0  ;;  %v10681_v61 = vld [vmem:[#allocation45_spill] sm:$0xff] }
 0x4c8   : > { %7212 = vmatprep.subr.bf16.mxu1 %v7211_v37  ;;  %v7231_v39 = vpack.c.bf16 %v3271_v56, %v3270_v4  ;;  %v3356_v12 = vmax.f32 %v9109_v6, 0.0  ;;  %v10682_v4 = vld [vmem:[#allocation46_spill] sm:$0xff]  ;;  %v10685_v6 = vld [vmem:[#allocation32_spill] sm:$0xff]  ;;  %v3368_v63 = vmax.f32 %v9361_v34, 0.0  ;;  %v3375_v34 = vmax.f32 %v9431_v35, 0.0 }
 0x4c9   : > { %v3360_v21 = vmax.f32 %v10682_v4, 0.0  ;;  %v3382_v35 = vmax.f32 %v9485_v13, 0.0  ;;  %v10687_v13 = vld [vmem:[#allocation47_spill] sm:$0xff]  ;;  %v10698_v4 = vmov 0.0  }
 0x4ca   : > { %v3389_v18 = vmax.f32 %v10687_v13, 0.0 }
 0x4cb   : > { %7214 = vmatpush3.bf16.msra.mxu1 %v7211_v37  ;;  %v7235_v37 = vpack.c.bf16 %v3273_v5, %v3272_v45  ;;  %v3363_v45 = vmax.f32 %v10685_v6, 0.0  ;;  %v10686_v5 = vld [vmem:[#allocation39_spill] sm:$0xff] }
 0x4cc   : > { %7216 = vmatprep.subr.bf16.mxu1 %v7215_v27 }
 0x4cf   : > { %7218 = vmatpush3.bf16.msra.mxu1 %v7215_v27  ;;  %v3341_v27 = vmax.f32 %v10679_v47, 0.0  ;;  %v3370_v47 = vmax.f32 %v9392_v32, 0.0  ;;  %v3377_v32 = vmax.f32 %v9455_v33, 0.0  ;;  %v3384_v33 = vmax.f32 %v9497_v59, 0.0  ;;  %v10689_v59 = vld [vmem:[#allocation40_spill] sm:$0xff] }
 0x4d0   : > { %7220 = vmatprep.subr.bf16.mxu1 %v7219_v46 }
 0x4d3   : > { %7222 = vmatpush3.bf16.msra.mxu1 %v7219_v46  ;;  %v3343_v46 = vmax.f32 %v8910_v55, 0.0  ;;  %v3350_v55 = vmax.f32 %v9043_v14, 0.0  ;;  %v3357_v14 = vmax.f32 %v9119_v29, 0.0  ;;  %v3364_v29 = vmax.f32 %v10686_v5, 0.0 }
 0x4d4   : > { %7224 = vmatprep.subr.bf16.mxu1 %v7223_v38 }
 0x4d7   : > { %7226 = vmatpush3.bf16.msra.mxu1 %v7223_v38  ;;  %v3347_v38 = vmax.f32 %v9016_v41, 0.0  ;;  %v3354_v41 = vmax.f32 %v9091_v28, 0.0  ;;  %v10683_v28 = vld [vmem:[#allocation26_spill] sm:$0xff] }
 0x4d8   : > { %7228 = vmatprep.subr.bf16.mxu1 %v7227_v36  ;;  %v3361_v56 = vmax.f32 %v10683_v28, 0.0  ;;  %v4120_v28 = vld [vmem:[#allocation8 + $0x98] sm:$0xff] }
 0x4db   : > { %7230 = vmatpush3.bf16.msra.mxu1 %v7227_v36  ;;  %v3359_v36 = vmax.f32 %v10681_v61, 0.0  ;;  %v3400_v61 = vmax.f32 %v9567_v10, 0.0  ;;  %v4123_v10 = vld [vmem:[#allocation8 + $0xb0] sm:$0xff] }
 0x4dc   : > { %7232 = vmatprep.subr.bf16.mxu1 %v7231_v39 }
 0x4df   : > { %7234 = vmatpush3.bf16.msra.mxu1 %v7231_v39  ;;  %v10684_v39 = vld [vmem:[#allocation38_spill] sm:$0xff] }
 0x4e0   : > { %7236 = vmatprep.subr.bf16.mxu1 %v7235_v37  ;;  %v3362_v23 = vmax.f32 %v10684_v39, 0.0  ;;  %v4121_v39 = vld [vmem:[#allocation8 + $0xa0] sm:$0xff] }
 0x4e3   : > { %7238 = vmatpush3.bf16.msra.mxu1 %v7235_v37  ;;  %v3366_v37 = vmax.f32 %v9319_v44, 0.0  ;;  %v3373_v44 = vmax.f32 %v9414_v8, 0.0  ;;  %v3380_v8 = vmax.f32 %v9477_v49, 0.0  ;;  %v3387_v49 = vmax.f32 %v9518_v57, 0.0 }
 0x4e4   : > { %7239 = vmatprep.subr.bf16.mxu1 %v10666_v0 }
 0x4e6   : > { %6679 = vmatmul.mubr.f32.vlgmr.msra.gmra.mrb[2].mxu1 %v3339_v51  ;;  %v3367_v51 = vmax.f32 %v9340_v60, 0.0  ;;  %v3374_v60 = vmax.f32 %v9423_v16, 0.0  ;;  %v3381_v16 = vmax.f32 %v9481_v31, 0.0  ;;  %v3388_v31 = vmax.f32 %v9523_v43, 0.0  ;;  %v10693_v43 = vld [vmem:[#allocation36_spill] sm:$0xff] }
 0x4e7   : > { %6681 = vmatprep.mubr.f32.mxu1 %v3340_v53  ;;  %v3369_v53 = vmax.f32 %v9383_v9, 0.0  ;;  %v3376_v9 = vmax.f32 %v9441_v54, 0.0  ;;  %v3383_v54 = vmax.f32 %v9489_v15, 0.0 }
 0x4ea   : > { %6682 = vmatmul.mubr.f32.gmra.mrb[4].mxu1 %v3341_v27  ;;  %v3371_v27 = vmax.f32 %v9395_v48, 0.0  ;;  %v3378_v48 = vmax.f32 %v9469_v24, 0.0  ;;  %v3385_v24 = vmax.f32 %v9510_v62, 0.0 }
 0x4eb   : > { %6684 = vmatprep.mubr.f32.mxu1 %v3342_v2  ;;  %v10688_v2 = vld [vmem:[#allocation33_spill] sm:$0xff] }
 0x4ec   : > { %v3390_v15 = vmax.f32 %v10688_v2, 0.0 }
 0x4ee   : > { %6685 = vmatmul.mubr.f32.gmra.mrb[6].mxu1 %v3343_v46  ;;  %v3391_v46 = vmax.f32 %v10689_v59, 0.0 }
 0x4ef   : > { %6687 = vmatprep.mubr.f32.mxu1 %v3344_v17  ;;  %v10690_v17 = vld [vmem:[#allocation41_spill] sm:$0xff] }
 0x4f0   : > { %v3392_v62 = vmax.f32 %v10690_v17, 0.0 }
 0x4f2   : > { %6688 = vmatmul.mubr.f32.gmra.mrb[8].mxu1 %v3345_v26  ;;  %v3393_v26 = vmax.f32 %v10691_v11, 0.0 }
 0x4f3   : > { %6690 = vmatprep.mubr.f32.mxu1 %v3346_v25  ;;  %v10692_v25 = vld [vmem:[#allocation42_spill] sm:$0xff] }
 0x4f4   : > { %v3394_v57 = vmax.f32 %v10692_v25, 0.0 }
 0x4f6   : > { %6691 = vmatmul.mubr.f32.gmra.mrb[10].mxu1 %v3347_v38  ;;  %v3395_v38 = vmax.f32 %v10693_v43, 0.0 }
 0x4f7   : > { %6693 = vmatprep.mubr.f32.mxu1 %v3348_v42  ;;  %v10694_v42 = vld [vmem:[#allocation24_spill] sm:$0xff] }
 0x4fa   : > { %6694 = vmatmul.mubr.f32.gmra.mrb[12].mxu1 %v3349_v7  ;;  %v3396_v7 = vmax.f32 %v10694_v42, 0.0 }
 0x4fb   : > { %6696 = vmatprep.mubr.f32.mxu1 %v3350_v55  ;;  %v10695_v55 = vld [vmem:[#allocation25_spill] sm:$0xff] }
 0x4fe   : > { %6697 = vmatmul.mubr.f32.gmra.mrb[14].mxu1 %v3351_v30  ;;  %v3397_v30 = vmax.f32 %v10695_v55, 0.0  ;;  %v4132_v55 = vld [vmem:[#allocation8 + $0xf8] sm:$0xff] }
 0x4ff   : > { %6699 = vmatprep.mubr.f32.mxu1 %v3352_v52  ;;  %v10696_v52 = vld [vmem:[#allocation27_spill] sm:$0xff] }
 0x502   : > { %6700 = vmatmul.mubr.f32.gmra.mrb[16].mxu1 %v3353_v22  ;;  %v3398_v22 = vmax.f32 %v10696_v52, 0.0 }
 0x503   : > { %6702 = vmatprep.mubr.f32.mxu1 %v3354_v41  ;;  %v4117_v41 = vld [vmem:[#allocation8 + $0x80] sm:$0xff] }
 0x506   : > { %6703 = vmatmul.mubr.f32.gmra.mrb[18].mxu1 %v3355_v20  ;;  %v4118_v20 = vld [vmem:[#allocation8 + $0x88] sm:$0xff] }
 0x507   : > { %6705 = vmatprep.mubr.f32.mxu1 %v3356_v12  ;;  %v7240_v12 = vpack.c.bf16 %v4118_v20, %v4117_v41 }
 0x509   : > { %7241 = vmatpush3.bf16.msra.mxu1 %v7240_v12  ;;  %v4226_v12 = vld [vmem:[#allocation8] sm:$0xff] }
 0x50a   : > { %6706 = vmatmul.mubr.f32.gmra.mrb[20].mxu1 %v3357_v14  ;;  %v10697_v14 = vld [vmem:[#allocation28_spill] sm:$0xff]  ;;  %7242 = vmatprep.subr.bf16.mxu1 %v10666_v0 }
 0x50b   : > { %6708 = vmatprep.mubr.f32.mxu1 %v3358_v40  ;;  %v3399_v40 = vmax.f32 %v10697_v14, 0.0  ;;  %v4227_v14 = vld [vmem:[#allocation8 + $0x8] sm:$0xff] }
 0x50e   : > { %6709 = vmatmul.mubr.f32.gmra.mrb[22].mxu1 %v3359_v36  ;;  %v3401_v36 = vmax.f32 %v9570_v1, 0.0 }
 0x50f   : > { %6711 = vmatprep.mubr.f32.mxu1 %v3360_v21  ;;  %v4119_v21 = vld [vmem:[#allocation8 + $0x90] sm:$0xff] }
 0x512   : > { %6712 = vmatmul.mubr.f32.gmra.mrb[24].mxu1 %v3361_v56  ;;  %v7243_v56 = vpack.c.bf16 %v4120_v28, %v4119_v21 }
 0x513   : > { %6714 = vmatprep.mubr.f32.mxu1 %v3362_v23  ;;  %v4122_v23 = vld [vmem:[#allocation8 + $0xa8] sm:$0xff] }
 0x514   : > { %7244 = vmatpush3.bf16.msra.mxu1 %v7243_v56  ;;  %v7246_v6 = vpack.c.bf16 %v4122_v23, %v4121_v39 }
 0x515   : > { %7245 = vmatprep.subr.bf16.mxu1 %v10666_v0 }
 0x516   : > { %6715 = vmatmul.mubr.f32.gmra.mrb[26].mxu1 %v3363_v45  ;;  %v4124_v45 = vld [vmem:[#allocation8 + $0xb8] sm:$0xff] }
 0x517   : > { %6717 = vmatprep.mubr.f32.mxu1 %v3364_v29  ;;  %v7249_v5 = vpack.c.bf16 %v4124_v45, %v4123_v10  ;;  %v4125_v29 = vld [vmem:[#allocation8 + $0xc0] sm:$0xff] }
 0x518   : > { %7247 = vmatpush3.bf16.msra.mxu1 %v7246_v6 }
 0x519   : > { %7248 = vmatprep.subr.bf16.mxu1 %v10666_v0 }
 0x51a   : > { %6718 = vmatmul.mubr.f32.gmra.mrb[28].mxu1 %v3365_v19  ;;  %v4126_v19 = vld [vmem:[#allocation8 + $0xc8] sm:$0xff] }
 0x51b   : > { %6720 = vmatprep.mubr.f32.mxu1 %v3366_v37 }
 0x51c   : > { %7250 = vmatpush3.bf16.msra.mxu1 %v7249_v5 }
 0x51d   : > { %7251 = vmatprep.subr.bf16.mxu1 %v10666_v0 }
 0x51e   : > { %6721 = vmatmul.mubr.f32.gmra.mrb[30].mxu1 %v3367_v51  ;;  %v7252_v51 = vpack.c.bf16 %v4126_v19, %v4125_v29 }
 0x51f   : > { %6723 = vmatprep.mubr.f32.mxu1 %v3368_v63  ;;  %v7806_v63 = vmov 1966171168  }
 0x520   : > { %7253 = vmatpush3.bf16.msra.mxu1 %v7252_v51 }
 0x521   : > { %7254 = vmatprep.subr.bf16.mxu1 %v10666_v0 }
 0x522   : > { %6724 = vmatmul.mubr.f32.gmra.mrb[32].mxu1 %v3369_v53  ;;  %v3790_v53 = vunpack.c.l.s4 %v7806_v63 }
 0x523   : > { %6726 = vmatprep.mubr.f32.mxu1 %v3370_v47 }
 0x524   : > { %v3791_v47 = vunpack.c.0.s8 %v3790_v53 }
 0x526   : > { %6727 = vmatmul.mubr.f32.gmra.mrb[34].mxu1 %v3371_v27  ;;  %v6295_v27 = vld [vmem:[%s10469_s6] ss:$0 sm:$0xff] }
 0x527   : > { %6729 = vmatprep.mubr.f32.mxu1 %v3372_v50  ;;  %v4127_v50 = vld [vmem:[#allocation8 + $0xd0] sm:$0xff] }
 0x52a   : > { %6730 = vmatmul.mubr.f32.gmra.mrb[36].mxu1 %v3373_v44  ;;  %v4128_v44 = vld [vmem:[#allocation8 + $0xd8] sm:$0xff] }
 0x52b   : > { %6732 = vmatprep.mubr.f32.mxu1 %v3374_v60  ;;  %v7255_v60 = vpack.c.bf16 %v4128_v44, %v4127_v50 }
 0x52d   : > { %7256 = vmatpush3.bf16.msra.mxu1 %v7255_v60 }
 0x52e   : > { %6733 = vmatmul.mubr.f32.gmra.mrb[38].mxu1 %v3375_v34  ;;  %7257 = vmatprep.subr.bf16.mxu1 %v10666_v0 }
 0x52f   : > { %6735 = vmatprep.mubr.f32.mxu1 %v3376_v9  ;;  %v10699_v9 = vld [vmem:[#allocation43_spill] sm:$0xff] }
 0x532   : > { %6736 = vmatmul.mubr.f32.gmra.mrb[40].mxu1 %v3377_v32  ;;  %v9653_v32 = vsub.s32 %v3791_v47, %v10699_v9 }
 0x533   : > { %6738 = vmatprep.mubr.f32.mxu1 %v3378_v48 }
 0x534   : > { %10700 = vst [vmem:[#allocation29_spill] sm:$0xff] %v9653_v32 }
 0x536   : > { %6739 = vmatmul.mubr.f32.gmra.mrb[42].mxu1 %v3379_v58 }
 0x537   : > { %6741 = vmatprep.mubr.f32.mxu1 %v3380_v8  ;;  %v10701_v8 = vld [vmem:[#allocation44_spill] sm:$0xff] }
 0x53a   : > { %6742 = vmatmul.mubr.f32.gmra.mrb[44].mxu1 %v3381_v16 }
 0x53b   : > { %6744 = vmatprep.mubr.f32.mxu1 %v3382_v35 }
 0x53e   : > { %6745 = vmatmul.mubr.f32.gmra.mrb[46].mxu1 %v3383_v54  ;;  %v4129_v54 = vld [vmem:[#allocation8 + $0xe0] sm:$0xff] }
 0x53f   : > { %6747 = vmatprep.mubr.f32.mxu1 %v3384_v33  ;;  %v4130_v33 = vld [vmem:[#allocation8 + $0xe8] sm:$0xff] }
 0x542   : > { %6748 = vmatmul.mubr.f32.gmra.mrb[48].mxu1 %v3385_v24 }
 0x543   : > { %6750 = vmatprep.mubr.f32.mxu1 %v3386_v3 }
 0x546   : > { %6751 = vmatmul.mubr.f32.gmra.mrb[50].mxu1 %v3387_v49  ;;  %v7258_v49 = vpack.c.bf16 %v4130_v33, %v4129_v54 }
 0x547   : > { %6753 = vmatprep.mubr.f32.mxu1 %v3388_v31 }
 0x548   : > { %7259 = vmatpush3.bf16.msra.mxu1 %v7258_v49 }
 0x549   : > { %7260 = vmatprep.subr.bf16.mxu1 %v10666_v0 }
 0x54a   : > { %6754 = vmatmul.mubr.f32.gmra.mrb[52].mxu1 %v3389_v18 }
 0x54b   : > { %6756 = vmatprep.mubr.f32.mxu1 %v3390_v15 }
 0x54e   : > { %6757 = vmatmul.mubr.f32.gmra.mrb[54].mxu1 %v3391_v46 }
 0x54f   : > { %6759 = vmatprep.mubr.f32.mxu1 %v3392_v62 }
 0x552   : > { %6760 = vmatmul.mubr.f32.gmra.mrb[56].mxu1 %v3393_v26 }
 0x553   : > { %6762 = vmatprep.mubr.f32.mxu1 %v3394_v57 }
 0x556   : > { %6763 = vmatmul.mubr.f32.gmra.mrb[58].mxu1 %v3395_v38 }
 0x557   : > { %6765 = vmatprep.mubr.f32.mxu1 %v3396_v7  ;;  %v4131_v7 = vld [vmem:[#allocation8 + $0xf0] sm:$0xff] }
 0x55a   : > { %6766 = vmatmul.mubr.f32.gmra.mrb[60].mxu1 %v3397_v30 }
 0x55b   : > { %6768 = vmatprep.mubr.f32.mxu1 %v3398_v22  ;;  %v7261_v22 = vpack.c.bf16 %v4132_v55, %v4131_v7 }
 0x55d   : > { %7262 = vmatpush3.bf16.msra.mxu1 %v7261_v22 }
 0x55e   : > { %6769 = vmatmul.mubr.f32.gmra.mrb[62].mxu1 %v3399_v40 }
 0x55f   : > { %6771 = vmatprep.mubr.f32.mxu1 %v3400_v61  ;;  %v9691_v61 = vpack.c.bf16 %v4227_v14, %v4226_v12 }
 0x561   : > { %7264 = vmatprep.subr.bf16.mxu1 %v9691_v61 }
 0x562   : > { %6772 = vmatmul.mubr.f32.gmra.mrb[64].mxu1 %v3401_v36 }
 0x563   : > { %6806 = vmatprep.mubr.msk.f32.mxu1 %vm7804_vm4, %v10698_v4 }
 0x599   : > { %v3254_v1 = vpop.f32.mrb[0].mxu1 }
 0x59a   : > { %v6645_v37 = vpop.f32.mrb[1].mxu1  ;;  %v9650_v34 = vadd.f32 %v6295_v27, %v3254_v1 }
 0x59c   : > { %v3795_v48 = vrot.slane %v9650_v34, %v9653_v32 }
 0x59e   : > { %v9659_v58 = vrot.slane %v3795_v48, %v9653_v32  ;;  %v3803_v46 = vcombine.high %v3795_v48, %v3795_v48 }
 0x5a0   : > { %v3840_v16 = vrot.slane %v9659_v58, %v10701_v8  ;;  %v9681_v43 = vrot.slane %v3803_v46, %v9653_v32  ;;  %v3833_v27 = vcombine.high %v9659_v58, %v9659_v58 }
 0x5a2   : > { %v3844_v40 = vrot.slane %v9681_v43, %v10701_v8  ;;  %v3848_v54 = vrot.slane %v3833_v27, %v10701_v8 }
 0x5b9   : > { %v6680_v35 = vpop.f32.mrb[2].mxu1 }
 0x5ba   : > { %v9663_v24 = vadd.f32 %v6680_v35, %v3840_v16  ;;  %v3468_v3 = vpop.f32.mrb[3].mxu1 }
 0x5bb   : > { %v9665_v31 = vadd.f32 %v3840_v16, %v3468_v3 }
 0x5bd   : > { %v4005_v13 = vmax.f32 %v9665_v31, %v9663_v24  ;;  %v6683_v18 = vpop.f32.mrb[4].mxu1 }
 0x5be   : > { %v9670_v2 = vadd.f32 %v6683_v18, %v3840_v16  ;;  %v3478_v15 = vpop.f32.mrb[5].mxu1 }
 0x5bf   : > { %v9672_v59 = vadd.f32 %v3840_v16, %v3478_v15 }
 0x5c1   : > { %v4006_v17 = vmax.f32 %v4005_v13, %v9672_v59  ;;  %v6686_v62 = vpop.f32.mrb[6].mxu1 }
 0x5c2   : > { %v9675_v11 = vadd.f32 %v6686_v62, %v3840_v16  ;;  %v3488_v26 = vpop.f32.mrb[7].mxu1 }
 0x5c3   : > { %v9677_v25 = vadd.f32 %v3840_v16, %v3488_v26  ;;  %v4007_v57 = vmax.f32 %v4006_v17, %v9670_v2 }
 0x5c5   : > { %v4008_v38 = vmax.f32 %v4007_v57, %v9677_v25  ;;  %v6689_v42 = vpop.f32.mrb[8].mxu1 }
 0x5c6   : > { %v9684_v30 = vadd.f32 %v6689_v42, %v3840_v16  ;;  %v3498_v52 = vpop.f32.mrb[9].mxu1 }
 0x5c7   : > { %v9686_v41 = vadd.f32 %v3840_v16, %v3498_v52  ;;  %v4009_v20 = vmax.f32 %v4008_v38, %v9675_v11 }
 0x5c9   : > { %v4010_v36 = vmax.f32 %v4009_v20, %v9686_v41  ;;  %v6692_v21 = vpop.f32.mrb[10].mxu1 }
 0x5ca   : > { %v9694_v28 = vadd.f32 %v6692_v21, %v3844_v40  ;;  %v3508_v56 = vpop.f32.mrb[11].mxu1 }
 0x5cb   : > { %v4011_v39 = vmax.f32 %v4010_v36, %v9684_v30  ;;  %v9698_v23 = vadd.f32 %v3844_v40, %v3508_v56  ;;  %v3835_v56 = vcombine.high %v9681_v43, %v9681_v43 }
 0x5cd   : > { %v4018_v6 = vmax.f32 %v9698_v23, %v9694_v28  ;;  %v6695_v10 = vpop.f32.mrb[12].mxu1  ;;  %v4012_v29 = vrot.slane %v4011_v39, 4  ;;  %v3852_v27 = vrot.slane %v3835_v56, %v10701_v8 }
 0x5ce   : > { %v9702_v45 = vadd.f32 %v6695_v10, %v3844_v40  ;;  %v3518_v5 = vpop.f32.mrb[13].mxu1 }
 0x5cf   : > { %v9704_v1 = vadd.f32 %v3844_v40, %v3518_v5  ;;  %v4013_v50 = vmax.f32 %v4011_v39, %v4012_v29 }
 0x5d1   : > { %v4019_v19 = vmax.f32 %v4018_v6, %v9704_v1  ;;  %v6698_v37 = vpop.f32.mrb[14].mxu1  ;;  %v4014_v33 = vrot.slane %v4013_v50, 2 }
 0x5d2   : > { %v9707_v51 = vadd.f32 %v6698_v37, %v3844_v40  ;;  %v3528_v63 = vpop.f32.mrb[15].mxu1 }
 0x5d3   : > { %v9709_v53 = vadd.f32 %v3844_v40, %v3528_v63  ;;  %v4020_v47 = vmax.f32 %v4019_v19, %v9702_v45  ;;  %v4015_v46 = vmax.f32 %v4013_v50, %v4014_v33 }
 0x5d5   : > { %v4021_v44 = vmax.f32 %v4020_v47, %v9709_v53  ;;  %v6701_v60 = vpop.f32.mrb[16].mxu1  ;;  %v4016_v55 = vrot.slane %v4015_v46, 1 }
 0x5d6   : > { %v9715_v9 = vadd.f32 %v6701_v60, %v3844_v40  ;;  %v3538_v48 = vpop.f32.mrb[17].mxu1 }
 0x5d7   : > { %v9717_v16 = vadd.f32 %v3844_v40, %v3538_v48  ;;  %v4022_v35 = vmax.f32 %v4021_v44, %v9707_v51  ;;  %v4017_v39 = vmax.f32 %v4015_v46, %v4016_v55 }
 0x5d9   : > { %v4023_v3 = vmax.f32 %v4022_v35, %v9717_v16  ;;  %v6704_v49 = vpop.f32.mrb[18].mxu1  ;;  %v4109_v50 = vmax.f32 %v4017_v39, 0.0 }
 0x5da   : > { %v9722_v13 = vadd.f32 %v6704_v49, %v3848_v54  ;;  %v3548_v58 = vpop.f32.mrb[19].mxu1 }
 0x5db   : > { %v4024_v18 = vmax.f32 %v4023_v3, %v9715_v9  ;;  %v9725_v15 = vadd.f32 %v3848_v54, %v3548_v58 }
 0x5dd   : > { %v4025_v17 = vrot.slane %v4024_v18, 4  ;;  %v4031_v62 = vmax.f32 %v9725_v15, %v9722_v13  ;;  %v6707_v26 = vpop.f32.mrb[20].mxu1 }
 0x5de   : > { %v9729_v57 = vadd.f32 %v6707_v26, %v3848_v54  ;;  %v3558_v38 = vpop.f32.mrb[21].mxu1 }
 0x5df   : > { %v4026_v42 = vmax.f32 %v4024_v18, %v4025_v17  ;;  %v9731_v7 = vadd.f32 %v3848_v54, %v3558_v38 }
 0x5e1   : > { %v4027_v52 = vrot.slane %v4026_v42, 2  ;;  %v4032_v22 = vmax.f32 %v4031_v62, %v9731_v7  ;;  %v6710_v20 = vpop.f32.mrb[22].mxu1 }
 0x5e2   : > { %v9734_v12 = vadd.f32 %v6710_v20, %v3848_v54  ;;  %v3568_v14 = vpop.f32.mrb[23].mxu1 }
 0x5e3   : > { %v4028_v40 = vmax.f32 %v4026_v42, %v4027_v52  ;;  %v9736_v36 = vadd.f32 %v3848_v54, %v3568_v14  ;;  %v4033_v21 = vmax.f32 %v4032_v22, %v9729_v57 }
 0x5e5   : > { %v4029_v6 = vrot.slane %v4028_v40, 1  ;;  %v4034_v10 = vmax.f32 %v4033_v21, %v9736_v36  ;;  %v6713_v5 = vpop.f32.mrb[24].mxu1 }
 0x5e6   : > { %v9742_v29 = vadd.f32 %v6713_v5, %v3848_v54  ;;  %v3578_v19 = vpop.f32.mrb[25].mxu1 }
 0x5e7   : > { %v4030_v37 = vmax.f32 %v4028_v40, %v4029_v6  ;;  %v9744_v63 = vadd.f32 %v3848_v54, %v3578_v19  ;;  %v4035_v47 = vmax.f32 %v4034_v10, %v9734_v12  ;;  %v3788_v54 = vcombine.high %v9650_v34, %v9650_v34 }
 0x5e9   : > { %v4110_v44 = vmax.f32 %v4030_v37, 0.0  ;;  %v4036_v60 = vmax.f32 %v4035_v47, %v9744_v63  ;;  %v6716_v43 = vpop.f32.mrb[26].mxu1  ;;  %v3802_v42 = vrot.slane %v3788_v54, %v9653_v32 }
 0x5ea   : > { %v9749_v48 = vadd.f32 %v6716_v43, %v3852_v27  ;;  %v3588_v35 = vpop.f32.mrb[27].mxu1 }
 0x5eb   : > { %v4148_v33 = vsel %vm3173_vm0, %v4110_v44, %v4109_v50  ;;  %v4037_v3 = vmax.f32 %v4036_v60, %v9742_v29  ;;  %v9753_v49 = vadd.f32 %v3852_v27, %v3588_v35  ;;  %v9771_v56 = vrot.slane %v3802_v42, %v9653_v32 }
 0x5ed   : > { %v4038_v58 = vrot.slane %v4037_v3, 4  ;;  %v4044_v18 = vmax.f32 %v9753_v49, %v9749_v48  ;;  %v6719_v46 = vpop.f32.mrb[28].mxu1  ;;  %v3856_v44 = vrot.slane %v9771_v56, %v10701_v8 }
 0x5ee   : > { %v9759_v17 = vadd.f32 %v6719_v46, %v3852_v27  ;;  %v3598_v62 = vpop.f32.mrb[29].mxu1 }
 0x5ef   : > { %v4039_v26 = vmax.f32 %v4037_v3, %v4038_v58  ;;  %v9761_v38 = vadd.f32 %v3852_v27, %v3598_v62 }
 0x5f1   : > { %v4040_v55 = vrot.slane %v4039_v26, 2  ;;  %v4045_v52 = vmax.f32 %v4044_v18, %v9761_v38  ;;  %v6722_v22 = vpop.f32.mrb[30].mxu1 }
 0x5f2   : > { %v9765_v20 = vadd.f32 %v6722_v22, %v3852_v27  ;;  %v3608_v34 = vpop.f32.mrb[31].mxu1 }
 0x5f3   : > { %v4041_v14 = vmax.f32 %v4039_v26, %v4040_v55  ;;  %v9767_v40 = vadd.f32 %v3852_v27, %v3608_v34  ;;  %v4046_v21 = vmax.f32 %v4045_v52, %v9759_v17 }
 0x5f5   : > { %v4042_v39 = vrot.slane %v4041_v14, 1  ;;  %v4047_v6 = vmax.f32 %v4046_v21, %v9767_v40  ;;  %v6725_v10 = vpop.f32.mrb[32].mxu1 }
 0x5f6   : > { %v9774_v5 = vadd.f32 %v6725_v10, %v3852_v27  ;;  %v3618_v19 = vpop.f32.mrb[33].mxu1 }
 0x5f7   : > { %v4043_v37 = vmax.f32 %v4041_v14, %v4042_v39  ;;  %v9776_v47 = vadd.f32 %v3852_v27, %v3618_v19  ;;  %v4048_v50 = vmax.f32 %v4047_v6, %v9765_v20  ;;  %v3804_v14 = vcombine.high %v3802_v42, %v3802_v42 }
 0x5f9   : > { %v4111_v60 = vmax.f32 %v4043_v37, 0.0  ;;  %v4049_v43 = vmax.f32 %v4048_v50, %v9776_v47  ;;  %v6728_v35 = vpop.f32.mrb[34].mxu1 }
 0x5fa   : > { %v9782_v3 = vadd.f32 %v6728_v35, %v3856_v44  ;;  %v3628_v54 = vpop.f32.mrb[35].mxu1 }
 0x5fb   : > { %v4149_v58 = vsel %vm3175_vm1, %v4111_v60, %v4148_v33  ;;  %v4050_v18 = vmax.f32 %v4049_v43, %v9774_v5  ;;  %v9786_v46 = vadd.f32 %v3856_v44, %v3628_v54  ;;  %v9801_v60 = vrot.slane %v3804_v14, %v9653_v32 }
 0x5fd   : > { %v4051_v27 = vrot.slane %v4050_v18, 4  ;;  %v4057_v62 = vmax.f32 %v9786_v46, %v9782_v3  ;;  %v6731_v26 = vpop.f32.mrb[36].mxu1 }
 0x5fe   : > { %v9790_v55 = vadd.f32 %v6731_v26, %v3856_v44  ;;  %v3638_v52 = vpop.f32.mrb[37].mxu1 }
 0x5ff   : > { %v4052_v22 = vmax.f32 %v4050_v18, %v4051_v27  ;;  %v9792_v34 = vadd.f32 %v3856_v44, %v3638_v52  ;;  %v3860_v52 = vrot.slane %v9801_v60, %v10701_v8 }
 0x601   : > { %v4053_v21 = vrot.slane %v4052_v22, 2  ;;  %v4058_v39 = vmax.f32 %v4057_v62, %v9792_v34  ;;  %v6734_v33 = vpop.f32.mrb[38].mxu1 }
 0x602   : > { %v9795_v6 = vadd.f32 %v6734_v33, %v3856_v44  ;;  %v3648_v10 = vpop.f32.mrb[39].mxu1 }
 0x603   : > { %v4054_v19 = vmax.f32 %v4052_v22, %v4053_v21  ;;  %v9797_v37 = vadd.f32 %v3856_v44, %v3648_v10  ;;  %v4059_v50 = vmax.f32 %v4058_v39, %v9790_v55 }
 0x605   : > { %v4055_v43 = vrot.slane %v4054_v19, 1  ;;  %v4060_v35 = vmax.f32 %v4059_v50, %v9797_v37  ;;  %v6737_v54 = vpop.f32.mrb[40].mxu1 }
 0x606   : > { %v9804_v42 = vadd.f32 %v6737_v54, %v3856_v44  ;;  %v3658_v18 = vpop.f32.mrb[41].mxu1 }
 0x607   : > { %v4056_v27 = vmax.f32 %v4054_v19, %v4055_v43  ;;  %v9806_v62 = vadd.f32 %v3856_v44, %v3658_v18  ;;  %v4061_v26 = vmax.f32 %v4060_v35, %v9795_v6 }
 0x608   : > { %10702 = vst [vmem:[#allocation30_spill] sm:$0xff] %v9804_v42 }
 0x609   : > { %v4112_v22 = vmax.f32 %v4056_v27, 0.0  ;;  %v4062_v21 = vmax.f32 %v4061_v26, %v9806_v62  ;;  %v6740_v14 = vpop.f32.mrb[42].mxu1 }
 0x60a   : > { %v9812_v39 = vadd.f32 %v6740_v14, %v3860_v52  ;;  %v3668_v33 = vpop.f32.mrb[43].mxu1 }
 0x60b   : > { %v4063_v10 = vmax.f32 %v4062_v21, %v9804_v42  ;;  %v9815_v50 = vadd.f32 %v3860_v52, %v3668_v33  ;;  %v4150_v19 = vsel %vm3177_vm2, %v4112_v22, %v4149_v58 }
 0x60c   : > { %10703 = vst [vmem:[#allocation31_spill] sm:$0xff] %v9812_v39 }
 0x60d   : > { %10704 = vst [vmem:[#allocation35_spill] sm:$0xff] %v9815_v50  ;;  %v4064_v44 = vrot.slane %v4063_v10, 4  ;;  %v4070_v43 = vmax.f32 %v9815_v50, %v9812_v39  ;;  %v6743_v35 = vpop.f32.mrb[44].mxu1 }
 0x60e   : > { %v9820_v54 = vadd.f32 %v6743_v35, %v3860_v52  ;;  %v3678_v18 = vpop.f32.mrb[45].mxu1  ;;  %v3834_v35 = vcombine.high %v9771_v56, %v9771_v56 }
 0x60f   : > { %v4065_v27 = vmax.f32 %v4063_v10, %v4064_v44  ;;  %v9822_v26 = vadd.f32 %v3860_v52, %v3678_v18 }
 0x610   : > { %10705 = vst [vmem:[#allocation37_spill] sm:$0xff] %v9820_v54 }
 0x611   : > { %10706 = vst [vmem:[#allocation23_spill] sm:$0xff] %v9822_v26  ;;  %v4066_v14 = vrot.slane %v4065_v27, 2  ;;  %v4071_v4 = vmax.f32 %v4070_v43, %v9822_v26  ;;  %v6746_v32 = vpop.f32.mrb[46].mxu1 }
 0x612   : > { %v9825_v21 = vadd.f32 %v6746_v32, %v3860_v52  ;;  %v3688_v33 = vpop.f32.mrb[47].mxu1 }
 0x613   : > { %v4067_v42 = vmax.f32 %v4065_v27, %v4066_v14  ;;  %v9827_v58 = vadd.f32 %v3860_v52, %v3688_v33  ;;  %v4072_v22 = vmax.f32 %v4071_v4, %v9820_v54  ;;  %v3864_v27 = vrot.slane %v3834_v35, %v10701_v8 }
 0x614   : > { %10707 = vst [vmem:[#allocation45_spill] sm:$0xff] %v9825_v21 }
 0x615   : > { %10708 = vst [vmem:[#allocation46_spill] sm:$0xff] %v9827_v58  ;;  %v4068_v39 = vrot.slane %v4067_v42, 1  ;;  %v4073_v10 = vmax.f32 %v4072_v22, %v9827_v58  ;;  %v6749_v44 = vpop.f32.mrb[48].mxu1 }
 0x616   : > { %v9833_v18 = vadd.f32 %v6749_v44, %v3860_v52  ;;  %v3698_v50 = vpop.f32.mrb[49].mxu1 }
 0x617   : > { %v4069_v43 = vmax.f32 %v4067_v42, %v4068_v39  ;;  %v9835_v26 = vadd.f32 %v3860_v52, %v3698_v50  ;;  %v4074_v32 = vmax.f32 %v4073_v10, %v9825_v21  ;;  %v4229_v21 = vld [vmem:[#allocation8 + $0x18] sm:$0xff] }
 0x618   : > { %10709 = vst [vmem:[#allocation26_spill] sm:$0xff] %v9833_v18 }
 0x619   : > { %10710 = vst [vmem:[#allocation38_spill] sm:$0xff] %v9835_v26  ;;  %v4113_v14 = vmax.f32 %v4069_v43, 0.0  ;;  %v4075_v4 = vmax.f32 %v4074_v32, %v9835_v26  ;;  %v6752_v33 = vpop.f32.mrb[50].mxu1 }
 0x61a   : > { %v9840_v54 = vadd.f32 %v6752_v33, %v3864_v27  ;;  %v3708_v56 = vpop.f32.mrb[51].mxu1 }
 0x61b   : > { %v4076_v22 = vmax.f32 %v4075_v4, %v9833_v18  ;;  %v9843_v58 = vadd.f32 %v3864_v27, %v3708_v56  ;;  %v4151_v44 = vsel %vm3179_vm3, %v4113_v14, %v4150_v19 }
 0x61c   : > { %10711 = vst [vmem:[#allocation32_spill] sm:$0xff] %v9840_v54 }
 0x61d   : > { %10712 = vst [vmem:[#allocation39_spill] sm:$0xff] %v9843_v58  ;;  %v4077_v42 = vrot.slane %v4076_v22, 4  ;;  %v4083_v52 = vmax.f32 %v9843_v58, %v9840_v54  ;;  %v6755_v39 = vpop.f32.mrb[52].mxu1 }
 0x61e   : > { %v9848_v50 = vadd.f32 %v6755_v39, %v3864_v27  ;;  %v3718_v35 = vpop.f32.mrb[53].mxu1  ;;  %v3836_v39 = vcombine.high %v9801_v60, %v9801_v60 }
 0x61f   : > { %v4078_v10 = vmax.f32 %v4076_v22, %v4077_v42  ;;  %v9850_v43 = vadd.f32 %v3864_v27, %v3718_v35 }
 0x620   : > { %10713 = vst [vmem:[#allocation47_spill] sm:$0xff] %v9848_v50 }
 0x621   : > { %10714 = vst [vmem:[#allocation33_spill] sm:$0xff] %v9850_v43  ;;  %v4079_v32 = vrot.slane %v4078_v10, 2  ;;  %v4084_v33 = vmax.f32 %v4083_v52, %v9850_v43  ;;  %v6758_v26 = vpop.f32.mrb[54].mxu1 }
 0x622   : > { %v9853_v4 = vadd.f32 %v6758_v26, %v3864_v27  ;;  %v3728_v56 = vpop.f32.mrb[55].mxu1 }
 0x623   : > { %v4080_v18 = vmax.f32 %v4078_v10, %v4079_v32  ;;  %v9855_v19 = vadd.f32 %v3864_v27, %v3728_v56  ;;  %v4085_v14 = vmax.f32 %v4084_v33, %v9848_v50  ;;  %v3868_v10 = vrot.slane %v3836_v39, %v10701_v8 }
 0x624   : > { %10715 = vst [vmem:[#allocation40_spill] sm:$0xff] %v9853_v4 }
 0x625   : > { %10716 = vst [vmem:[#allocation41_spill] sm:$0xff] %v9855_v19  ;;  %v4081_v54 = vrot.slane %v4080_v18, 1  ;;  %v4086_v22 = vmax.f32 %v4085_v14, %v9855_v19  ;;  %v6761_v42 = vpop.f32.mrb[56].mxu1 }
 0x626   : > { %v9861_v35 = vadd.f32 %v6761_v42, %v3864_v27  ;;  %v3738_v58 = vpop.f32.mrb[57].mxu1 }
 0x627   : > { %v4082_v52 = vmax.f32 %v4080_v18, %v4081_v54  ;;  %v9863_v43 = vadd.f32 %v3864_v27, %v3738_v58  ;;  %v4087_v26 = vmax.f32 %v4086_v22, %v9853_v4  ;;  %v4228_v4 = vld [vmem:[#allocation8 + $0x10] sm:$0xff] }
 0x628   : > { %10717 = vst [vmem:[#allocation34_spill] sm:$0xff] %v9861_v35 }
 0x629   : > { %10718 = vst [vmem:[#allocation42_spill] sm:$0xff] %v9863_v43  ;;  %v4114_v32 = vmax.f32 %v4082_v52, 0.0  ;;  %v4088_v33 = vmax.f32 %v4087_v26, %v9863_v43  ;;  %v6764_v56 = vpop.f32.mrb[58].mxu1 }
 0x62a   : > { %v9868_v50 = vadd.f32 %v6764_v56, %v3868_v10  ;;  %v3748_v60 = vpop.f32.mrb[59].mxu1 }
 0x62b   : > { %v4089_v14 = vmax.f32 %v4088_v33, %v9861_v35  ;;  %v9871_v19 = vadd.f32 %v3868_v10, %v3748_v60  ;;  %v4152_v42 = vsel %vm3181_vm5, %v4114_v32, %v4151_v44 }
 0x62c   : > { %10719 = vst [vmem:[#allocation36_spill] sm:$0xff] %v9868_v50 }
 0x62d   : > { %10720 = vst [vmem:[#allocation24_spill] sm:$0xff] %v9871_v19  ;;  %v4090_v54 = vrot.slane %v4089_v14, 4  ;;  %v4096_v58 = vmax.f32 %v9871_v19, %v9868_v50  ;;  %v6767_v18 = vpop.f32.mrb[60].mxu1 }
 0x62e   : > { %v9876_v27 = vadd.f32 %v6767_v18, %v3868_v10  ;;  %v3758_v39 = vpop.f32.mrb[61].mxu1 }
 0x62f   : > { %v4091_v22 = vmax.f32 %v4089_v14, %v4090_v54  ;;  %v9878_v52 = vadd.f32 %v3868_v10, %v3758_v39 }
 0x630   : > { %10721 = vst [vmem:[#allocation25_spill] sm:$0xff] %v9876_v27 }
 0x631   : > { %10722 = vst [vmem:[#allocation27_spill] sm:$0xff] %v9878_v52  ;;  %v4092_v26 = vrot.slane %v4091_v22, 2  ;;  %v4097_v56 = vmax.f32 %v4096_v58, %v9878_v52  ;;  %v6770_v8 = vpop.f32.mrb[62].mxu1 }
 0x632   : > { %v9881_v33 = vadd.f32 %v6770_v8, %v3868_v10  ;;  %v3768_v60 = vpop.f32.mrb[63].mxu1 }
 0x633   : > { %v4093_v35 = vmax.f32 %v4091_v22, %v4092_v26  ;;  %v9883_v44 = vadd.f32 %v3868_v10, %v3768_v60  ;;  %v4098_v32 = vmax.f32 %v4097_v56, %v9876_v27 }
 0x635   : > { %10723 = vst [vmem:[#allocation28_spill] sm:$0xff] %v9883_v44  ;;  %v4094_v50 = vrot.slane %v4093_v35, 1  ;;  %v4099_v18 = vmax.f32 %v4098_v32, %v9883_v44  ;;  %v6773_v19 = vpop.f32.mrb[64].mxu1 }
 0x636   : > { %v9887_v43 = vadd.f32 %v6773_v19, %v3868_v10  ;;  %v3778_v14 = vpop.f32.mrb[65].mxu1 }
 0x637   : > { %v4095_v54 = vmax.f32 %v4093_v35, %v4094_v50  ;;  %v9889_v39 = vadd.f32 %v3868_v10, %v3778_v14  ;;  %v4100_v58 = vmax.f32 %v4099_v18, %v9881_v33  ;;  %v7267_v35 = vpack.c.bf16 %v4229_v21, %v4228_v4  ;;  %v4230_v14 = vld [vmem:[#allocation8 + $0x20] sm:$0xff] }
 0x638   : > { %v4306_v10 = vmax.f32 %v9665_v31, 0.0  ;;  %v4234_v4 = vld [vmem:[#allocation8 + $0x40] sm:$0xff]  ;;  %v4235_v31 = vld [vmem:[#allocation8 + $0x48] sm:$0xff] }
 0x639   : > { %v4115_v8 = vmax.f32 %v4095_v54, 0.0  ;;  %v4101_v52 = vmax.f32 %v4100_v58, %v9889_v39  ;;  %v4231_v54 = vld [vmem:[#allocation8 + $0x28] sm:$0xff] }
 0x63a   : > { %v5086_v58 = vld [vmem:[#allocation9 + $0x88] sm:$0xff] }
 0x63b   : > { %v4102_v22 = vmax.f32 %v4101_v52, %v9887_v43  ;;  %v4153_v26 = vsel %vm3183_vm6, %v4115_v8, %v4152_v42  ;;  %v7271_v42 = vpack.c.bf16 %v4231_v54, %v4230_v14  ;;  %v4232_v52 = vld [vmem:[#allocation8 + $0x30] sm:$0xff]  ;;  %v5088_v14 = vld [vmem:[#allocation9 + $0x98] sm:$0xff]  ;;  %v5089_v54 = vld [vmem:[#allocation9 + $0xa0] sm:$0xff] }
 0x63d   : > { %v4103_v56 = vrot.slane %v4102_v22, 4 }
 0x63f   : > { %v4104_v60 = vmax.f32 %v4102_v22, %v4103_v56  ;;  %v7279_v22 = vpack.c.bf16 %v4235_v31, %v4234_v4  ;;  %v4311_v4 = vmax.f32 %v9675_v11, 0.0  ;;  %v4314_v31 = vmax.f32 %v9698_v23, 0.0 }
 0x640   : > { %v4318_v11 = vmax.f32 %v9709_v53, 0.0  ;;  %v4321_v23 = vmax.f32 %v9715_v9, 0.0  ;;  %v4325_v53 = vmax.f32 %v9729_v57, 0.0  ;;  %v4328_v9 = vmax.f32 %v9744_v63, 0.0 }
 0x641   : > { %v4105_v27 = vrot.slane %v4104_v60, 2  ;;  %v4332_v57 = vmax.f32 %v9761_v38, 0.0  ;;  %v4335_v63 = vmax.f32 %v9765_v20, 0.0  ;;  %v4339_v38 = vmax.f32 %v9782_v3, 0.0 }
 0x642   : > { %v4341_v20 = vmax.f32 %v9790_v55, 0.0  ;;  %v4344_v3 = vmax.f32 %v9806_v62, 0.0  ;;  %v10726_v55 = vld [vmem:[#allocation31_spill] sm:$0xff]  ;;  %v10730_v62 = vld [vmem:[#allocation45_spill] sm:$0xff] }
 0x643   : > { %v4106_v32 = vmax.f32 %v4104_v60, %v4105_v27  ;;  %v4233_v27 = vld [vmem:[#allocation8 + $0x38] sm:$0xff]  ;;  %v4238_v60 = vld [vmem:[#allocation8 + $0x60] sm:$0xff] }
 0x644   : > { %v7275_v8 = vpack.c.bf16 %v4233_v27, %v4232_v52  ;;  %v5090_v52 = vld [vmem:[#allocation9 + $0xa8] sm:$0xff]  ;;  %v4307_v27 = vmax.f32 %v9663_v24, 0.0  ;;  %v4312_v24 = vmax.f32 %v9686_v41, 0.0  ;;  %v4319_v41 = vmax.f32 %v9707_v51, 0.0 }
 0x645   : > { %v4107_v44 = vrot.slane %v4106_v32, 1  ;;  %v4326_v51 = vmax.f32 %v9736_v36, 0.0  ;;  %v4333_v36 = vmax.f32 %v9759_v17, 0.0  ;;  %v4340_v17 = vmax.f32 %v9792_v34, 0.0 }
 0x647   : > { %v4108_v19 = vmax.f32 %v4106_v32, %v4107_v44  ;;  %v5085_v44 = vld [vmem:[#allocation9 + $0x80] sm:$0xff]  ;;  %v4239_v32 = vld [vmem:[#allocation8 + $0x68] sm:$0xff] }
 0x648   : > { %v7296_v21 = vpack.c.bf16 %v5086_v58, %v5085_v44  ;;  %v4308_v44 = vmax.f32 %v9672_v59, 0.0  ;;  %v7302_v58 = vpack.c.bf16 %v5090_v52, %v5089_v54  ;;  %v4313_v59 = vmax.f32 %v9684_v30, 0.0 }
 0x649   : > { %v4116_v50 = vmax.f32 %v4108_v19, 0.0  ;;  %v7287_v19 = vpack.c.bf16 %v4239_v32, %v4238_v60  ;;  %v4320_v30 = vmax.f32 %v9717_v16, 0.0  ;;  %v4327_v16 = vmax.f32 %v9734_v12, 0.0 }
 0x64a   : > { %7297 = vmatpush3.bf16.msra.mxu0 %v7296_v21  ;;  %v4310_v21 = vmax.f32 %v9677_v25, 0.0  ;;  %v4316_v25 = vmax.f32 %v9704_v1, 0.0  ;;  %v4323_v1 = vmax.f32 %v9722_v13, 0.0  ;;  %v4330_v13 = vmax.f32 %v9753_v49, 0.0 }
 0x64b   : > { %v4154_v18 = vsel %vm3185_vm7, %v4116_v50, %v4153_v26  ;;  %7298 = vmatprep.subr.bf16.mxu0 %v10666_v0  ;;  %v4237_v26 = vld [vmem:[#allocation8 + $0x58] sm:$0xff]  ;;  %v4240_v50 = vld [vmem:[#allocation8 + $0x70] sm:$0xff]  ;;  %v4334_v12 = vmax.f32 %v9767_v40, 0.0  ;;  %v4337_v49 = vmax.f32 %v9774_v5, 0.0  ;;  %v4343_v5 = vmax.f32 %v9795_v6, 0.0 }
 0x64c   : > { %6807 = vmatmul.mubr.f32.vlgmr.msra.gmra.mrb[66].mxu1 %v4154_v18  ;;  %v5087_v18 = vld [vmem:[#allocation9 + $0x90] sm:$0xff]  ;;  %v4347_v32 = vmax.f32 %v10726_v55, 0.0 }
 0x64d   : > { %7266 = vmatpush3.bf16.msra.mxu1 %v9691_v61  ;;  %6841 = vmatprep.mubr.f32.mxu1 %v4306_v10  ;;  %v4236_v61 = vld [vmem:[#allocation8 + $0x50] sm:$0xff] }
 0x64e   : > { %7268 = vmatprep.subr.bf16.mxu1 %v7267_v35  ;;  %v7283_v56 = vpack.c.bf16 %v4237_v26, %v4236_v61  ;;  %v5091_v40 = vld [vmem:[#allocation9 + $0xb0] sm:$0xff]  ;;  %v5092_v61 = vld [vmem:[#allocation9 + $0xb8] sm:$0xff] }
 0x64f   : > { %v7305_v26 = vpack.c.bf16 %v5092_v61, %v5091_v40  ;;  %v5196_v40 = vld [vmem:[#allocation9 + $0x10] sm:$0xff] }
 0x651   : > { %7270 = vmatpush3.bf16.msra.mxu1 %v7267_v35  ;;  %v4241_v35 = vld [vmem:[#allocation8 + $0x78] sm:$0xff] }
 0x652   : > { %7272 = vmatprep.subr.bf16.mxu1 %v7271_v42  ;;  %v7291_v10 = vpack.c.bf16 %v4241_v35, %v4240_v50  ;;  %v10728_v50 = vld [vmem:[#allocation37_spill] sm:$0xff] }
 0x653   : > { %v4349_v35 = vmax.f32 %v10728_v50, 0.0  ;;  %v5095_v50 = vld [vmem:[#allocation9 + $0xd0] sm:$0xff] }
 0x655   : > { %7274 = vmatpush3.bf16.msra.mxu1 %v7271_v42  ;;  %v7299_v42 = vpack.c.bf16 %v5088_v14, %v5087_v18  ;;  %v4351_v18 = vmax.f32 %v10730_v62, 0.0  ;;  %v10731_v14 = vld [vmem:[#allocation38_spill] sm:$0xff]  ;;  %v5209_v62 = vld [vmem:[#allocation9 + $0x78] sm:$0xff] }
 0x656   : > { %7276 = vmatprep.subr.bf16.mxu1 %v7275_v8  ;;  %v4352_v54 = vmax.f32 %v10731_v14, 0.0 }
 0x657   : > { %7300 = vmatpush3.bf16.msra.mxu0 %v7299_v42  ;;  %v10732_v42 = vld [vmem:[#allocation26_spill] sm:$0xff] }
 0x658   : > { %7301 = vmatprep.subr.bf16.mxu0 %v10666_v0  ;;  %v4353_v52 = vmax.f32 %v10732_v42, 0.0  ;;  %v5098_v42 = vld [vmem:[#allocation9 + $0xe8] sm:$0xff] }
 0x659   : > { %7278 = vmatpush3.bf16.msra.mxu1 %v7275_v8  ;;  %v4309_v8 = vmax.f32 %v9670_v2, 0.0  ;;  %v4315_v2 = vmax.f32 %v9694_v28, 0.0  ;;  %v4322_v28 = vmax.f32 %v9725_v15, 0.0  ;;  %v4329_v15 = vmax.f32 %v9742_v29, 0.0 }
 0x65a   : > { %7280 = vmatprep.subr.bf16.mxu1 %v7279_v22  ;;  %v4336_v29 = vmax.f32 %v9776_v47, 0.0  ;;  %v4342_v47 = vmax.f32 %v9797_v37, 0.0  ;;  %v10727_v37 = vld [vmem:[#allocation23_spill] sm:$0xff] }
 0x65b   : > { %7303 = vmatpush3.bf16.msra.mxu0 %v7302_v58  ;;  %v10734_v58 = vld [vmem:[#allocation32_spill] sm:$0xff] }
 0x65c   : > { %7304 = vmatprep.subr.bf16.mxu0 %v10666_v0 }
 0x65d   : > { %7282 = vmatpush3.bf16.msra.mxu1 %v7279_v22  ;;  %v4317_v22 = vmax.f32 %v9702_v45, 0.0  ;;  %v4324_v45 = vmax.f32 %v9731_v7, 0.0  ;;  %v4331_v7 = vmax.f32 %v9749_v48, 0.0  ;;  %v4338_v48 = vmax.f32 %v9786_v46, 0.0  ;;  %v10724_v46 = vld [vmem:[#allocation30_spill] sm:$0xff] }
 0x65e   : > { %7284 = vmatprep.subr.bf16.mxu1 %v7283_v56  ;;  %v4345_v34 = vmax.f32 %v10724_v46, 0.0  ;;  %v5203_v46 = vld [vmem:[#allocation9 + $0x48] sm:$0xff] }
 0x65f   : > { %7306 = vmatpush3.bf16.msra.mxu0 %v7305_v26  ;;  %v5199_v26 = vld [vmem:[#allocation9 + $0x28] sm:$0xff] }
 0x660   : > { %7307 = vmatprep.subr.bf16.mxu0 %v10666_v0 }
 0x661   : > { %7286 = vmatpush3.bf16.msra.mxu1 %v7283_v56  ;;  %v10725_v56 = vld [vmem:[#allocation35_spill] sm:$0xff] }
 0x662   : > { %7288 = vmatprep.subr.bf16.mxu1 %v7287_v19  ;;  %v4346_v60 = vmax.f32 %v10725_v56, 0.0  ;;  %v5204_v56 = vld [vmem:[#allocation9 + $0x50] sm:$0xff] }
 0x665   : > { %7290 = vmatpush3.bf16.msra.mxu1 %v7287_v19  ;;  %v4348_v19 = vmax.f32 %v10727_v37, 0.0  ;;  %v5207_v37 = vld [vmem:[#allocation9 + $0x68] sm:$0xff] }
 0x666   : > { %7292 = vmatprep.subr.bf16.mxu1 %v7291_v10 }
 0x669   : > { %7294 = vmatpush3.bf16.msra.mxu1 %v7291_v10  ;;  %v10729_v10 = vld [vmem:[#allocation46_spill] sm:$0xff] }
 0x66a   : > { %v4350_v6 = vmax.f32 %v10729_v10, 0.0 }
 0x66c   : > { %6842 = vmatmul.mubr.f32.vlgmr.msra.gmra.mrb[68].mxu1 %v4307_v27  ;;  %v10733_v27 = vld [vmem:[#allocation39_spill] sm:$0xff] }
 0x66d   : > { %6844 = vmatprep.mubr.f32.mxu1 %v4308_v44  ;;  %v4354_v44 = vmax.f32 %v10733_v27, 0.0 }
 0x670   : > { %6845 = vmatmul.mubr.f32.gmra.mrb[70].mxu1 %v4309_v8  ;;  %v4355_v8 = vmax.f32 %v10734_v58, 0.0 }
 0x671   : > { %6847 = vmatprep.mubr.f32.mxu1 %v4310_v21  ;;  %v10735_v21 = vld [vmem:[#allocation33_spill] sm:$0xff] }
 0x674   : > { %6848 = vmatmul.mubr.f32.gmra.mrb[72].mxu1 %v4311_v4  ;;  %v4356_v4 = vmax.f32 %v10735_v21, 0.0 }
 0x675   : > { %6850 = vmatprep.mubr.f32.mxu1 %v4312_v24  ;;  %v10736_v24 = vld [vmem:[#allocation47_spill] sm:$0xff] }
 0x678   : > { %6851 = vmatmul.mubr.f32.gmra.mrb[74].mxu1 %v4313_v59  ;;  %v4357_v59 = vmax.f32 %v10736_v24, 0.0  ;;  %v10747_v24 = vld [vmem:[#allocation44_spill] sm:$0xff] }
 0x679   : > { %6853 = vmatprep.mubr.f32.mxu1 %v4314_v31  ;;  %v10737_v31 = vld [vmem:[#allocation41_spill] sm:$0xff] }
 0x67c   : > { %6854 = vmatmul.mubr.f32.gmra.mrb[76].mxu1 %v4315_v2  ;;  %v4358_v2 = vmax.f32 %v10737_v31, 0.0 }
 0x67d   : > { %6856 = vmatprep.mubr.f32.mxu1 %v4316_v25  ;;  %v10738_v25 = vld [vmem:[#allocation40_spill] sm:$0xff] }
 0x680   : > { %6857 = vmatmul.mubr.f32.gmra.mrb[78].mxu1 %v4317_v22  ;;  %v4359_v22 = vmax.f32 %v10738_v25, 0.0  ;;  %v5100_v25 = vld [vmem:[#allocation9 + $0xf8] sm:$0xff] }
 0x681   : > { %6859 = vmatprep.mubr.f32.mxu1 %v4318_v11  ;;  %v10739_v11 = vld [vmem:[#allocation42_spill] sm:$0xff] }
 0x684   : > { %6860 = vmatmul.mubr.f32.gmra.mrb[80].mxu1 %v4319_v41  ;;  %v4360_v41 = vmax.f32 %v10739_v11, 0.0 }
 0x685   : > { %6862 = vmatprep.mubr.f32.mxu1 %v4320_v30  ;;  %v10740_v30 = vld [vmem:[#allocation34_spill] sm:$0xff] }
 0x688   : > { %6863 = vmatmul.mubr.f32.gmra.mrb[82].mxu1 %v4321_v23  ;;  %v4361_v23 = vmax.f32 %v10740_v30, 0.0 }
 0x689   : > { %6865 = vmatprep.mubr.f32.mxu1 %v4322_v28  ;;  %v10741_v28 = vld [vmem:[#allocation24_spill] sm:$0xff] }
 0x68c   : > { %6866 = vmatmul.mubr.f32.gmra.mrb[84].mxu1 %v4323_v1  ;;  %v4362_v1 = vmax.f32 %v10741_v28, 0.0 }
 0x68d   : > { %6868 = vmatprep.mubr.f32.mxu1 %v4324_v45  ;;  %v10742_v45 = vld [vmem:[#allocation36_spill] sm:$0xff] }
 0x690   : > { %6869 = vmatmul.mubr.f32.gmra.mrb[86].mxu1 %v4325_v53  ;;  %v4363_v53 = vmax.f32 %v10742_v45, 0.0 }
 0x691   : > { %6871 = vmatprep.mubr.f32.mxu1 %v4326_v51  ;;  %v10743_v51 = vld [vmem:[#allocation27_spill] sm:$0xff] }
 0x694   : > { %6872 = vmatmul.mubr.f32.gmra.mrb[88].mxu1 %v4327_v16  ;;  %v4364_v16 = vmax.f32 %v10743_v51, 0.0 }
 0x695   : > { %6874 = vmatprep.mubr.f32.mxu1 %v4328_v9  ;;  %v10744_v9 = vld [vmem:[#allocation25_spill] sm:$0xff] }
 0x698   : > { %6875 = vmatmul.mubr.f32.gmra.mrb[90].mxu1 %v4329_v15  ;;  %v4365_v15 = vmax.f32 %v10744_v9, 0.0 }
 0x699   : > { %6877 = vmatprep.mubr.f32.mxu1 %v4330_v13  ;;  %v10745_v13 = vld [vmem:[#allocation28_spill] sm:$0xff] }
 0x69c   : > { %6878 = vmatmul.mubr.f32.gmra.mrb[92].mxu1 %v4331_v7  ;;  %v4366_v7 = vmax.f32 %v10745_v13, 0.0 }
 0x69d   : > { %6880 = vmatprep.mubr.f32.mxu1 %v4332_v57  ;;  %v5093_v57 = vld [vmem:[#allocation9 + $0xc0] sm:$0xff] }
 0x6a0   : > { %6881 = vmatmul.mubr.f32.gmra.mrb[94].mxu1 %v4333_v36  ;;  %v5094_v36 = vld [vmem:[#allocation9 + $0xc8] sm:$0xff] }
 0x6a1   : > { %6883 = vmatprep.mubr.f32.mxu1 %v4334_v12  ;;  %v7308_v12 = vpack.c.bf16 %v5094_v36, %v5093_v57 }
 0x6a3   : > { %7309 = vmatpush3.bf16.msra.mxu0 %v7308_v12 }
 0x6a4   : > { %6884 = vmatmul.mubr.f32.gmra.mrb[96].mxu1 %v4335_v63  ;;  %v4367_v63 = vmax.f32 %v9881_v33, 0.0  ;;  %7310 = vmatprep.subr.bf16.mxu0 %v10666_v0  ;;  %v5197_v33 = vld [vmem:[#allocation9 + $0x18] sm:$0xff] }
 0x6a5   : > { %6886 = vmatprep.mubr.f32.mxu1 %v4336_v29  ;;  %v4368_v29 = vmax.f32 %v9889_v39, 0.0  ;;  %v9970_v61 = vpack.c.bf16 %v5197_v33, %v5196_v40  ;;  %v5198_v39 = vld [vmem:[#allocation9 + $0x20] sm:$0xff] }
 0x6a8   : > { %6887 = vmatmul.mubr.f32.gmra.mrb[98].mxu1 %v4337_v49  ;;  %v4369_v49 = vmax.f32 %v9887_v43, 0.0  ;;  %v9974_v43 = vpack.c.bf16 %v5199_v26, %v5198_v39 }
 0x6a9   : > { %6889 = vmatprep.mubr.f32.mxu1 %v4338_v48  ;;  %v5194_v48 = vld [vmem:[#allocation9] sm:$0xff] }
 0x6ac   : > { %6890 = vmatmul.mubr.f32.gmra.mrb[100].mxu1 %v4339_v38  ;;  %v5195_v38 = vld [vmem:[#allocation9 + $0x8] sm:$0xff] }
 0x6ad   : > { %6892 = vmatprep.mubr.f32.mxu1 %v4340_v17  ;;  %v9966_v17 = vpack.c.bf16 %v5195_v38, %v5194_v48 }
 0x6af   : > { %7375 = vmatprep.subr.bf16.mxu1 %v9966_v17 }
 0x6b0   : > { %6893 = vmatmul.mubr.f32.gmra.mrb[102].mxu1 %v4341_v20  ;;  %v5200_v20 = vld [vmem:[#allocation9 + $0x30] sm:$0xff] }
 0x6b1   : > { %6895 = vmatprep.mubr.f32.mxu1 %v4342_v47  ;;  %7383 = vmatpush3.bf16.msra.mxu1 %v9966_v17  ;;  %v5201_v47 = vld [vmem:[#allocation9 + $0x38] sm:$0xff] }
 0x6b2   : > { %7376 = vmatprep.subr.bf16.mxu1 %v9970_v61 }
 0x6b4   : > { %6896 = vmatmul.mubr.f32.gmra.mrb[104].mxu1 %v4343_v5  ;;  %v9978_v5 = vpack.c.bf16 %v5201_v47, %v5200_v20 }
 0x6b5   : > { %6898 = vmatprep.mubr.f32.mxu1 %v4344_v3  ;;  %7384 = vmatpush3.bf16.msra.mxu1 %v9970_v61  ;;  %v5202_v3 = vld [vmem:[#allocation9 + $0x40] sm:$0xff] }
 0x6b6   : > { %7377 = vmatprep.subr.bf16.mxu1 %v9974_v43 }
 0x6b8   : > { %6899 = vmatmul.mubr.f32.gmra.mrb[106].mxu1 %v4345_v34  ;;  %v9982_v34 = vpack.c.bf16 %v5203_v46, %v5202_v3 }
 0x6b9   : > { %6901 = vmatprep.mubr.f32.mxu1 %v4346_v60  ;;  %7385 = vmatpush3.bf16.msra.mxu1 %v9974_v43  ;;  %v5205_v60 = vld [vmem:[#allocation9 + $0x58] sm:$0xff] }
 0x6ba   : > { %7378 = vmatprep.subr.bf16.mxu1 %v9978_v5  ;;  %v9986_v55 = vpack.c.bf16 %v5205_v60, %v5204_v56 }
 0x6bc   : > { %6902 = vmatmul.mubr.f32.gmra.mrb[108].mxu1 %v4347_v32  ;;  %v5206_v32 = vld [vmem:[#allocation9 + $0x60] sm:$0xff] }
 0x6bd   : > { %6904 = vmatprep.mubr.f32.mxu1 %v4348_v19  ;;  %7386 = vmatpush3.bf16.msra.mxu1 %v9978_v5  ;;  %v9990_v19 = vpack.c.bf16 %v5207_v37, %v5206_v32 }
 0x6be   : > { %7379 = vmatprep.subr.bf16.mxu1 %v9982_v34 }
 0x6c0   : > { %6905 = vmatmul.mubr.f32.gmra.mrb[110].mxu1 %v4349_v35  ;;  %v5096_v35 = vld [vmem:[#allocation9 + $0xd8] sm:$0xff] }
 0x6c1   : > { %6907 = vmatprep.mubr.f32.mxu1 %v4350_v6  ;;  %7387 = vmatpush3.bf16.msra.mxu1 %v9982_v34  ;;  %v7311_v10 = vpack.c.bf16 %v5096_v35, %v5095_v50  ;;  %v5208_v6 = vld [vmem:[#allocation9 + $0x70] sm:$0xff] }
 0x6c2   : > { %7380 = vmatprep.subr.bf16.mxu1 %v9986_v55 }
 0x6c3   : > { %7312 = vmatpush3.bf16.msra.mxu0 %v7311_v10 }
 0x6c4   : > { %6908 = vmatmul.mubr.f32.gmra.mrb[112].mxu1 %v4351_v18  ;;  %v9994_v18 = vpack.c.bf16 %v5209_v62, %v5208_v6  ;;  %7313 = vmatprep.subr.bf16.mxu0 %v10666_v0 }
 0x6c5   : > { %6910 = vmatprep.mubr.f32.mxu1 %v4352_v54  ;;  %7388 = vmatpush3.bf16.msra.mxu1 %v9986_v55  ;;  %v5097_v54 = vld [vmem:[#allocation9 + $0xe0] sm:$0xff] }
 0x6c6   : > { %7381 = vmatprep.subr.bf16.mxu1 %v9990_v19  ;;  %v7314_v27 = vpack.c.bf16 %v5098_v42, %v5097_v54 }
 0x6c8   : > { %6911 = vmatmul.mubr.f32.gmra.mrb[114].mxu1 %v4353_v52  ;;  %7315 = vmatpush3.bf16.msra.mxu0 %v7314_v27 }
 0x6c9   : > { %6913 = vmatprep.mubr.f32.mxu1 %v4354_v44  ;;  %7389 = vmatpush3.bf16.msra.mxu1 %v9990_v19  ;;  %v6296_v44 = vld [vmem:[%s10471_s8] ss:$0 sm:$0xff] }
 0x6ca   : > { %7382 = vmatprep.subr.bf16.mxu1 %v9994_v18  ;;  %7316 = vmatprep.subr.bf16.mxu0 %v10666_v0 }
 0x6cc   : > { %6914 = vmatmul.mubr.f32.gmra.mrb[116].mxu1 %v4355_v8  ;;  %v10746_v8 = vld [vmem:[#allocation29_spill] sm:$0xff] }
 0x6cd   : > { %6916 = vmatprep.mubr.f32.mxu1 %v4356_v4  ;;  %7390 = vmatpush3.bf16.msra.mxu1 %v9994_v18 }
 0x6ce   : > { %7351 = vmatprep.subr.bf16.mxu1 %v10666_v0 }
 0x6d0   : > { %6917 = vmatmul.mubr.f32.gmra.mrb[118].mxu1 %v4357_v59 }
 0x6d1   : > { %6919 = vmatprep.mubr.f32.mxu1 %v4358_v2  ;;  %v5099_v2 = vld [vmem:[#allocation9 + $0xf0] sm:$0xff] }
 0x6d4   : > { %6920 = vmatmul.mubr.f32.gmra.mrb[120].mxu1 %v4359_v22 }
 0x6d5   : > { %6922 = vmatprep.mubr.f32.mxu1 %v4360_v41  ;;  %v7317_v41 = vpack.c.bf16 %v5100_v25, %v5099_v2 }
 0x6d7   : > { %7318 = vmatpush3.bf16.msra.mxu0 %v7317_v41 }
 0x6d8   : > { %6923 = vmatmul.mubr.f32.gmra.mrb[122].mxu1 %v4361_v23  ;;  %7320 = vmatprep.subr.bf16.mxu0 %v9966_v17 }
 0x6d9   : > { %6925 = vmatprep.mubr.f32.mxu1 %v4362_v1 }
 0x6dc   : > { %6926 = vmatmul.mubr.f32.gmra.mrb[124].mxu1 %v4363_v53 }
 0x6dd   : > { %6928 = vmatprep.mubr.f32.mxu1 %v4364_v16 }
 0x6e0   : > { %6929 = vmatmul.mubr.f32.gmra.mrb[126].mxu1 %v4365_v15 }
 0x6e1   : > { %6931 = vmatprep.mubr.f32.mxu1 %v4366_v7 }
 0x6e4   : > { %6932 = vmatmul.mubr.f32.gmra.mrb[128].mxu1 %v4367_v63 }
 0x6e5   : > { %6934 = vmatprep.mubr.f32.mxu1 %v4368_v29 }
 0x6e8   : > { %6935 = vmatmul.mubr.f32.gmra.mrb[130].mxu1 %v4369_v49 }
 0x71f   : > { %v4222_v14 = vpop.f32.mrb[66].mxu1 }
 0x720   : > { %v6808_v52 = vpop.f32.mrb[67].mxu1  ;;  %v10004_v58 = vadd.f32 %v6296_v44, %v4222_v14 }
 0x722   : > { %v4763_v21 = vrot.slane %v10004_v58, %v10746_v8 }
 0x724   : > { %v4779_v4 = vrot.slane %v4763_v21, %v10746_v8  ;;  %v4771_v51 = vcombine.high %v4763_v21, %v4763_v21 }
 0x726   : > { %v4808_v59 = vrot.slane %v4779_v4, %v10747_v24  ;;  %v10028_v36 = vrot.slane %v4771_v51, %v10746_v8  ;;  %v4801_v42 = vcombine.high %v4779_v4, %v4779_v4 }
 0x728   : > { %v4812_v40 = vrot.slane %v10028_v36, %v10747_v24  ;;  %v4816_v25 = vrot.slane %v4801_v42, %v10747_v24 }
 0x73f   : > { %v6843_v31 = vpop.f32.mrb[68].mxu1 }
 0x740   : > { %v10010_v22 = vadd.f32 %v6843_v31, %v4808_v59  ;;  %v4436_v11 = vpop.f32.mrb[69].mxu1 }
 0x741   : > { %v10012_v30 = vadd.f32 %v4808_v59, %v4436_v11 }
 0x743   : > { %v4973_v23 = vmax.f32 %v10012_v30, %v10010_v22  ;;  %v6846_v28 = vpop.f32.mrb[70].mxu1 }
 0x744   : > { %v10017_v1 = vadd.f32 %v6846_v28, %v4808_v59  ;;  %v4446_v45 = vpop.f32.mrb[71].mxu1 }
 0x745   : > { %v10019_v53 = vadd.f32 %v4808_v59, %v4446_v45 }
 0x747   : > { %v4974_v16 = vmax.f32 %v4973_v23, %v10019_v53  ;;  %v6849_v9 = vpop.f32.mrb[72].mxu1 }
 0x748   : > { %v10022_v15 = vadd.f32 %v6849_v9, %v4808_v59  ;;  %v4456_v13 = vpop.f32.mrb[73].mxu1 }
 0x749   : > { %v10024_v7 = vadd.f32 %v4808_v59, %v4456_v13  ;;  %v4975_v57 = vmax.f32 %v4974_v16, %v10017_v1 }
 0x74b   : > { %v4976_v12 = vmax.f32 %v4975_v57, %v10024_v7  ;;  %v6852_v63 = vpop.f32.mrb[74].mxu1 }
 0x74c   : > { %v10031_v29 = vadd.f32 %v6852_v63, %v4808_v59  ;;  %v4466_v49 = vpop.f32.mrb[75].mxu1 }
 0x74d   : > { %v10033_v48 = vadd.f32 %v4808_v59, %v4466_v49  ;;  %v4977_v38 = vmax.f32 %v4976_v12, %v10022_v15 }
 0x74f   : > { %v4978_v33 = vmax.f32 %v4977_v38, %v10033_v48  ;;  %v6855_v39 = vpop.f32.mrb[76].mxu1 }
 0x750   : > { %v10039_v26 = vadd.f32 %v6855_v39, %v4812_v40  ;;  %v4476_v20 = vpop.f32.mrb[77].mxu1 }
 0x751   : > { %v4979_v47 = vmax.f32 %v4978_v33, %v10031_v29  ;;  %v10042_v3 = vadd.f32 %v4812_v40, %v4476_v20 }
 0x753   : > { %v4986_v46 = vmax.f32 %v10042_v3, %v10039_v26  ;;  %v6858_v56 = vpop.f32.mrb[78].mxu1  ;;  %v4980_v50 = vrot.slane %v4979_v47, 4 }
 0x754   : > { %v10046_v60 = vadd.f32 %v6858_v56, %v4812_v40  ;;  %v4486_v32 = vpop.f32.mrb[79].mxu1 }
 0x755   : > { %v10048_v37 = vadd.f32 %v4812_v40, %v4486_v32  ;;  %v4981_v52 = vmax.f32 %v4979_v47, %v4980_v50 }
 0x757   : > { %v4987_v35 = vmax.f32 %v4986_v46, %v10048_v37  ;;  %v6861_v10 = vpop.f32.mrb[80].mxu1  ;;  %v4982_v11 = vrot.slane %v4981_v52, 2 }
 0x758   : > { %v10051_v6 = vadd.f32 %v6861_v10, %v4812_v40  ;;  %v4496_v62 = vpop.f32.mrb[81].mxu1 }
 0x759   : > { %v10053_v14 = vadd.f32 %v4812_v40, %v4496_v62  ;;  %v4988_v54 = vmax.f32 %v4987_v35, %v10046_v60  ;;  %v4983_v16 = vmax.f32 %v4981_v52, %v4982_v11  ;;  %v4803_v35 = vcombine.high %v10028_v36, %v10028_v36 }
 0x75b   : > { %v4989_v27 = vmax.f32 %v4988_v54, %v10053_v14  ;;  %v6864_v44 = vpop.f32.mrb[82].mxu1  ;;  %v4820_v11 = vrot.slane %v4803_v35, %v10747_v24 }
 0x75c   : > { %v10057_v21 = vadd.f32 %v6864_v44, %v4812_v40  ;;  %v4506_v59 = vpop.f32.mrb[83].mxu1 }
 0x75d   : > { %v10059_v31 = vadd.f32 %v4812_v40, %v4506_v59  ;;  %v4990_v2 = vmax.f32 %v4989_v27, %v10051_v6  ;;  %v4984_v40 = vrot.slane %v4983_v16, 1 }
 0x75f   : > { %v4991_v41 = vmax.f32 %v4990_v2, %v10059_v31  ;;  %v6867_v23 = vpop.f32.mrb[84].mxu1  ;;  %v4985_v10 = vmax.f32 %v4983_v16, %v4984_v40 }
 0x760   : > { %v10064_v28 = vadd.f32 %v6867_v23, %v4816_v25  ;;  %v4516_v4 = vpop.f32.mrb[85].mxu1 }
 0x761   : > { %v4992_v45 = vmax.f32 %v4991_v41, %v10057_v21  ;;  %v10067_v51 = vadd.f32 %v4816_v25, %v4516_v4  ;;  %v5077_v41 = vmax.f32 %v4985_v10, 0.0 }
 0x763   : > { %v4993_v9 = vrot.slane %v4992_v45, 4  ;;  %v4999_v13 = vmax.f32 %v10067_v51, %v10064_v28  ;;  %v6870_v57 = vpop.f32.mrb[86].mxu1 }
 0x764   : > { %v10071_v12 = vadd.f32 %v6870_v57, %v4816_v25  ;;  %v4526_v63 = vpop.f32.mrb[87].mxu1 }
 0x765   : > { %v4994_v49 = vmax.f32 %v4992_v45, %v4993_v9  ;;  %v10073_v38 = vadd.f32 %v4816_v25, %v4526_v63 }
 0x767   : > { %v4995_v33 = vrot.slane %v4994_v49, 2  ;;  %v5000_v39 = vmax.f32 %v4999_v13, %v10073_v38  ;;  %v6873_v20 = vpop.f32.mrb[88].mxu1 }
 0x768   : > { %v10076_v47 = vadd.f32 %v6873_v20, %v4816_v25  ;;  %v4536_v46 = vpop.f32.mrb[89].mxu1 }
 0x769   : > { %v4996_v56 = vmax.f32 %v4994_v49, %v4995_v33  ;;  %v10078_v32 = vadd.f32 %v4816_v25, %v4536_v46  ;;  %v5001_v50 = vmax.f32 %v5000_v39, %v10071_v12 }
 0x76b   : > { %v4997_v62 = vrot.slane %v4996_v56, 1  ;;  %v5002_v54 = vmax.f32 %v5001_v50, %v10078_v32  ;;  %v6876_v42 = vpop.f32.mrb[90].mxu1 }
 0x76c   : > { %v10084_v52 = vadd.f32 %v6876_v42, %v4816_v25  ;;  %v4546_v27 = vpop.f32.mrb[91].mxu1 }
 0x76d   : > { %v4998_v44 = vmax.f32 %v4996_v56, %v4997_v62  ;;  %v10086_v59 = vadd.f32 %v4816_v25, %v4546_v27  ;;  %v5003_v2 = vmax.f32 %v5002_v54, %v10076_v47  ;;  %v4756_v25 = vcombine.high %v10004_v58, %v10004_v58 }
 0x76f   : > { %v5078_v23 = vmax.f32 %v4998_v44, 0.0  ;;  %v5004_v4 = vmax.f32 %v5003_v2, %v10086_v59  ;;  %v6879_v36 = vpop.f32.mrb[92].mxu1  ;;  %v4770_v56 = vrot.slane %v4756_v25, %v10746_v8 }
 0x770   : > { %v10091_v45 = vadd.f32 %v6879_v36, %v4820_v11  ;;  %v4556_v16 = vpop.f32.mrb[93].mxu1 }
 0x771   : > { %v5116_v9 = vsel %vm3173_vm0, %v5078_v23, %v5077_v41  ;;  %v5005_v13 = vmax.f32 %v5004_v4, %v10084_v52  ;;  %v10095_v57 = vadd.f32 %v4820_v11, %v4556_v16  ;;  %v10113_v44 = vrot.slane %v4770_v56, %v10746_v8 }
 0x773   : > { %v5006_v63 = vrot.slane %v5005_v13, 4  ;;  %v5012_v49 = vmax.f32 %v10095_v57, %v10091_v45  ;;  %v6882_v40 = vpop.f32.mrb[94].mxu1 }
 0x774   : > { %v10101_v33 = vadd.f32 %v6882_v40, %v4820_v11  ;;  %v4566_v39 = vpop.f32.mrb[95].mxu1 }
 0x775   : > { %v5007_v20 = vmax.f32 %v5005_v13, %v5006_v63  ;;  %v10103_v46 = vadd.f32 %v4820_v11, %v4566_v39  ;;  %v4824_v63 = vrot.slane %v10113_v44, %v10747_v24 }
 0x776   : > { %10748 = vst [vmem:[#allocation43_spill] sm:$0xff] %v10101_v33 }
 0x777   : > { %v5008_v50 = vrot.slane %v5007_v20, 2  ;;  %v5013_v35 = vmax.f32 %v5012_v49, %v10103_v46  ;;  %v6885_v10 = vpop.f32.mrb[96].mxu1 }
 0x778   : > { %v10107_v62 = vadd.f32 %v6885_v10, %v4820_v11  ;;  %v4576_v58 = vpop.f32.mrb[97].mxu1 }
 0x779   : > { %v5009_v54 = vmax.f32 %v5007_v20, %v5008_v50  ;;  %v10109_v42 = vadd.f32 %v4820_v11, %v4576_v58  ;;  %v5014_v27 = vmax.f32 %v5013_v35, %v10101_v33 }
 0x77a   : > { %10749 = vst [vmem:[#allocation30_spill] sm:$0xff] %v10107_v62 }
 0x77b   : > { %10750 = vst [vmem:[#allocation35_spill] sm:$0xff] %v10109_v42  ;;  %v5010_v2 = vrot.slane %v5009_v54, 1  ;;  %v5015_v41 = vmax.f32 %v5014_v27, %v10109_v42  ;;  %v6888_v23 = vpop.f32.mrb[98].mxu1 }
 0x77c   : > { %v10116_v4 = vadd.f32 %v6888_v23, %v4820_v11  ;;  %v4586_v36 = vpop.f32.mrb[99].mxu1 }
 0x77d   : > { %v5011_v16 = vmax.f32 %v5009_v54, %v5010_v2  ;;  %v10118_v13 = vadd.f32 %v4820_v11, %v4586_v36  ;;  %v5016_v25 = vmax.f32 %v5015_v41, %v10107_v62 }
 0x77e   : > { %10751 = vst [vmem:[#allocation31_spill] sm:$0xff] %v10116_v4 }
 0x77f   : > { %10752 = vst [vmem:[#allocation23_spill] sm:$0xff] %v10118_v13  ;;  %v5079_v49 = vmax.f32 %v5011_v16, 0.0  ;;  %v5017_v40 = vmax.f32 %v5016_v25, %v10118_v13  ;;  %v6891_v39 = vpop.f32.mrb[100].mxu1  ;;  %v4772_v16 = vcombine.high %v4770_v56, %v4770_v56 }
 0x780   : > { %v10124_v20 = vadd.f32 %v6891_v39, %v4824_v63  ;;  %v4596_v50 = vpop.f32.mrb[101].mxu1 }
 0x781   : > { %v5117_v35 = vsel %vm3175_vm1, %v5079_v49, %v5116_v9  ;;  %v5018_v10 = vmax.f32 %v5017_v40, %v10116_v4  ;;  %v10128_v58 = vadd.f32 %v4824_v63, %v4596_v50  ;;  %v10133_v42 = vrot.slane %v4772_v16, %v10746_v8 }
 0x782   : > { %10753 = vst [vmem:[#allocation37_spill] sm:$0xff] %v10124_v20 }
 0x783   : > { %10754 = vst [vmem:[#allocation46_spill] sm:$0xff] %v10128_v58  ;;  %v5019_v11 = vrot.slane %v5018_v10, 4  ;;  %v5025_v54 = vmax.f32 %v10128_v58, %v10124_v20  ;;  %v6894_v27 = vpop.f32.mrb[102].mxu1 }
 0x784   : > { %v4880_v2 = vadd.f32 %v6894_v27, %v4824_v63  ;;  %v4606_v41 = vpop.f32.mrb[103].mxu1 }
 0x785   : > { %v5020_v23 = vmax.f32 %v5018_v10, %v5019_v11  ;;  %v4879_v36 = vadd.f32 %v4824_v63, %v4606_v41 }
 0x786   : > { %v5309_v62 = vmax.f32 %v4880_v2, 0.0 }
 0x787   : > { %v5021_v25 = vrot.slane %v5020_v23, 2  ;;  %v5026_v39 = vmax.f32 %v5025_v54, %v4879_v36  ;;  %v5308_v0 = vmax.f32 %v4879_v36, 0.0  ;;  %v6897_v13 = vpop.f32.mrb[104].mxu1 }
 0x788   : > { %v4882_v9 = vadd.f32 %v6897_v13, %v4824_v63  ;;  %v4616_v49 = vpop.f32.mrb[105].mxu1  ;;  %v4828_v13 = vrot.slane %v10133_v42, %v10747_v24 }
 0x789   : > { %v5022_v40 = vmax.f32 %v5020_v23, %v5021_v25  ;;  %v4881_v50 = vadd.f32 %v4824_v63, %v4616_v49  ;;  %v5027_v4 = vmax.f32 %v5026_v39, %v4880_v2  ;;  %7055 = vmatprep.mubr.f32.mxu1 %v5308_v0 }
 0x78a   : > { %7056 = vmatmul.mubr.f32.vlgmr.msra.gmra.mrb[132].mxu1 %v5309_v62  ;;  %v5311_v56 = vmax.f32 %v4882_v9, 0.0 }
 0x78b   : > { %v5023_v27 = vrot.slane %v5022_v40, 1  ;;  %v5028_v20 = vmax.f32 %v5027_v4, %v4881_v50  ;;  %v5310_v10 = vmax.f32 %v4881_v50, 0.0  ;;  %v6900_v11 = vpop.f32.mrb[106].mxu1 }
 0x78c   : > { %v4884_v41 = vadd.f32 %v6900_v11, %v4824_v63  ;;  %v4626_v54 = vpop.f32.mrb[107].mxu1 }
 0x78d   : > { %v5024_v36 = vmax.f32 %v5022_v40, %v5023_v27  ;;  %v4883_v58 = vadd.f32 %v4824_v63, %v4626_v54  ;;  %v5029_v33 = vmax.f32 %v5028_v20, %v4882_v9  ;;  %7058 = vmatprep.mubr.f32.mxu1 %v5310_v10 }
 0x78e   : > { %7059 = vmatmul.mubr.f32.gmra.mrb[134].mxu1 %v5311_v56  ;;  %v5313_v62 = vmax.f32 %v4884_v41, 0.0 }
 0x78f   : > { %v5080_v0 = vmax.f32 %v5024_v36, 0.0  ;;  %v5030_v2 = vmax.f32 %v5029_v33, %v4883_v58  ;;  %v5312_v23 = vmax.f32 %v4883_v58, 0.0  ;;  %v6903_v16 = vpop.f32.mrb[108].mxu1 }
 0x790   : > { %v4886_v25 = vadd.f32 %v6903_v16, %v4828_v13  ;;  %v4636_v4 = vpop.f32.mrb[109].mxu1 }
 0x791   : > { %v5031_v39 = vmax.f32 %v5030_v2, %v4884_v41  ;;  %v4885_v49 = vadd.f32 %v4828_v13, %v4636_v4  ;;  %7061 = vmatprep.mubr.f32.mxu1 %v5312_v23  ;;  %v5118_v50 = vsel %vm3177_vm2, %v5080_v0, %v5117_v35 }
 0x792   : > { %7062 = vmatmul.mubr.f32.gmra.mrb[136].mxu1 %v5313_v62  ;;  %v5315_v27 = vmax.f32 %v4886_v25, 0.0 }
 0x793   : > { %v5032_v63 = vrot.slane %v5031_v39, 4  ;;  %v5038_v20 = vmax.f32 %v4885_v49, %v4886_v25  ;;  %v5314_v9 = vmax.f32 %v4885_v49, 0.0  ;;  %v6906_v40 = vpop.f32.mrb[110].mxu1  ;;  %v4802_v25 = vcombine.high %v10113_v44, %v10113_v44 }
 0x794   : > { %v4888_v10 = vadd.f32 %v6906_v40, %v4828_v13  ;;  %v4646_v11 = vpop.f32.mrb[111].mxu1 }
 0x795   : > { %v5033_v56 = vmax.f32 %v5031_v39, %v5032_v63  ;;  %v4887_v33 = vadd.f32 %v4828_v13, %v4646_v11  ;;  %7064 = vmatprep.mubr.f32.mxu1 %v5314_v9 }
 0x796   : > { %7065 = vmatmul.mubr.f32.gmra.mrb[138].mxu1 %v5315_v27  ;;  %v5317_v2 = vmax.f32 %v4888_v10, 0.0 }
 0x797   : > { %v5034_v58 = vrot.slane %v5033_v56, 2  ;;  %v5039_v54 = vmax.f32 %v5038_v20, %v4887_v33  ;;  %v5316_v36 = vmax.f32 %v4887_v33, 0.0  ;;  %v6909_v41 = vpop.f32.mrb[112].mxu1 }
 0x798   : > { %v4890_v23 = vadd.f32 %v6909_v41, %v4828_v13  ;;  %v4656_v16 = vpop.f32.mrb[113].mxu1 }
 0x799   : > { %v5035_v35 = vmax.f32 %v5033_v56, %v5034_v58  ;;  %v4889_v0 = vadd.f32 %v4828_v13, %v4656_v16  ;;  %v5040_v62 = vmax.f32 %v5039_v54, %v4888_v10  ;;  %7067 = vmatprep.mubr.f32.mxu1 %v5316_v36  ;;  %v4832_v56 = vrot.slane %v4802_v25, %v10747_v24 }
 0x79a   : > { %7068 = vmatmul.mubr.f32.gmra.mrb[140].mxu1 %v5317_v2  ;;  %v5319_v9 = vmax.f32 %v4890_v23, 0.0 }
 0x79b   : > { %v5036_v4 = vrot.slane %v5035_v35, 1  ;;  %v5041_v39 = vmax.f32 %v5040_v62, %v4889_v0  ;;  %v5318_v49 = vmax.f32 %v4889_v0, 0.0  ;;  %v6912_v63 = vpop.f32.mrb[114].mxu1 }
 0x79c   : > { %v4892_v40 = vadd.f32 %v6912_v63, %v4828_v13  ;;  %v4666_v20 = vpop.f32.mrb[115].mxu1 }
 0x79d   : > { %v5037_v27 = vmax.f32 %v5035_v35, %v5036_v4  ;;  %v4891_v11 = vadd.f32 %v4828_v13, %v4666_v20  ;;  %v5042_v33 = vmax.f32 %v5041_v39, %v4890_v23  ;;  %7070 = vmatprep.mubr.f32.mxu1 %v5318_v49 }
 0x79e   : > { %7071 = vmatmul.mubr.f32.gmra.mrb[142].mxu1 %v5319_v9  ;;  %v5321_v44 = vmax.f32 %v4892_v40, 0.0 }
 0x79f   : > { %v5081_v10 = vmax.f32 %v5037_v27, 0.0  ;;  %v5043_v58 = vmax.f32 %v5042_v33, %v4891_v11  ;;  %v5320_v54 = vmax.f32 %v4891_v11, 0.0  ;;  %v6915_v36 = vpop.f32.mrb[116].mxu1 }
 0x7a0   : > { %v4894_v41 = vadd.f32 %v6915_v36, %v4832_v56  ;;  %v4676_v2 = vpop.f32.mrb[117].mxu1 }
 0x7a1   : > { %v5044_v16 = vmax.f32 %v5043_v58, %v4892_v40  ;;  %v4893_v0 = vadd.f32 %v4832_v56, %v4676_v2  ;;  %7073 = vmatprep.mubr.f32.mxu1 %v5320_v54  ;;  %v5119_v62 = vsel %vm3179_vm3, %v5081_v10, %v5118_v50 }
 0x7a2   : > { %7074 = vmatmul.mubr.f32.gmra.mrb[144].mxu1 %v5321_v44  ;;  %v5323_v39 = vmax.f32 %v4894_v41, 0.0  ;;  %v4804_v44 = vcombine.high %v10133_v42, %v10133_v42 }
 0x7a3   : > { %v5045_v35 = vrot.slane %v5044_v16, 4  ;;  %v5051_v13 = vmax.f32 %v4893_v0, %v4894_v41  ;;  %v5322_v23 = vmax.f32 %v4893_v0, 0.0  ;;  %v6918_v4 = vpop.f32.mrb[118].mxu1 }
 0x7a4   : > { %v4896_v25 = vadd.f32 %v6918_v4, %v4832_v56  ;;  %v4686_v49 = vpop.f32.mrb[119].mxu1 }
 0x7a5   : > { %v5046_v63 = vmax.f32 %v5044_v16, %v5045_v35  ;;  %v4895_v9 = vadd.f32 %v4832_v56, %v4686_v49  ;;  %7076 = vmatprep.mubr.f32.mxu1 %v5322_v23 }
 0x7a6   : > { %7077 = vmatmul.mubr.f32.gmra.mrb[146].mxu1 %v5323_v39  ;;  %v5325_v33 = vmax.f32 %v4896_v25, 0.0 }
 0x7a7   : > { %v5047_v20 = vrot.slane %v5046_v63, 2  ;;  %v5052_v27 = vmax.f32 %v5051_v13, %v4895_v9  ;;  %v5324_v11 = vmax.f32 %v4895_v9, 0.0  ;;  %v6921_v40 = vpop.f32.mrb[120].mxu1 }
 0x7a8   : > { %v4898_v58 = vadd.f32 %v6921_v40, %v4832_v56  ;;  %v4696_v54 = vpop.f32.mrb[121].mxu1 }
 0x7a9   : > { %v5048_v50 = vmax.f32 %v5046_v63, %v5047_v20  ;;  %v4897_v10 = vadd.f32 %v4832_v56, %v4696_v54  ;;  %v5053_v36 = vmax.f32 %v5052_v27, %v4896_v25  ;;  %7079 = vmatprep.mubr.f32.mxu1 %v5324_v11  ;;  %v4836_v63 = vrot.slane %v4804_v44, %v10747_v24 }
 0x7aa   : > { %7080 = vmatmul.mubr.f32.gmra.mrb[148].mxu1 %v5325_v33  ;;  %v5327_v35 = vmax.f32 %v4898_v58, 0.0 }
 0x7ab   : > { %v5049_v41 = vrot.slane %v5048_v50, 1  ;;  %v5054_v2 = vmax.f32 %v5053_v36, %v4897_v10  ;;  %v5326_v16 = vmax.f32 %v4897_v10, 0.0  ;;  %v6924_v0 = vpop.f32.mrb[122].mxu1 }
 0x7ac   : > { %v4900_v23 = vadd.f32 %v6924_v0, %v4832_v56  ;;  %v4706_v13 = vpop.f32.mrb[123].mxu1 }
 0x7ad   : > { %v5050_v4 = vmax.f32 %v5048_v50, %v5049_v41  ;;  %v4899_v39 = vadd.f32 %v4832_v56, %v4706_v13  ;;  %v5055_v49 = vmax.f32 %v5054_v2, %v4898_v58  ;;  %7082 = vmatprep.mubr.f32.mxu1 %v5326_v16 }
 0x7ae   : > { %7083 = vmatmul.mubr.f32.gmra.mrb[150].mxu1 %v5327_v35  ;;  %v5329_v42 = vmax.f32 %v4900_v23, 0.0 }
 0x7af   : > { %v5082_v25 = vmax.f32 %v5050_v4, 0.0  ;;  %v5056_v9 = vmax.f32 %v5055_v49, %v4899_v39  ;;  %v5328_v20 = vmax.f32 %v4899_v39, 0.0  ;;  %v6927_v27 = vpop.f32.mrb[124].mxu1 }
 0x7b0   : > { %v4902_v11 = vadd.f32 %v6927_v27, %v4836_v63  ;;  %v4716_v40 = vpop.f32.mrb[125].mxu1 }
 0x7b1   : > { %v5057_v33 = vmax.f32 %v5056_v9, %v4900_v23  ;;  %v4901_v54 = vadd.f32 %v4836_v63, %v4716_v40  ;;  %7085 = vmatprep.mubr.f32.mxu1 %v5328_v20  ;;  %v5120_v10 = vsel %vm3181_vm5, %v5082_v25, %v5119_v62 }
 0x7b2   : > { %7086 = vmatmul.mubr.f32.gmra.mrb[152].mxu1 %v5329_v42  ;;  %v5331_v41 = vmax.f32 %v4902_v11, 0.0 }
 0x7b3   : > { %v5058_v50 = vrot.slane %v5057_v33, 4  ;;  %v5064_v56 = vmax.f32 %v4901_v54, %v4902_v11  ;;  %v5330_v58 = vmax.f32 %v4901_v54, 0.0  ;;  %v6930_v36 = vpop.f32.mrb[126].mxu1 }
 0x7b4   : > { %v4904_v44 = vadd.f32 %v6930_v36, %v4836_v63  ;;  %v4726_v2 = vpop.f32.mrb[127].mxu1 }
 0x7b5   : > { %v5059_v16 = vmax.f32 %v5057_v33, %v5058_v50  ;;  %v4903_v0 = vadd.f32 %v4836_v63, %v4726_v2  ;;  %7088 = vmatprep.mubr.f32.mxu1 %v5330_v58 }
 0x7b6   : > { %7089 = vmatmul.mubr.f32.gmra.mrb[154].mxu1 %v5331_v41  ;;  %v5333_v39 = vmax.f32 %v4904_v44, 0.0 }
 0x7b7   : > { %v5060_v35 = vrot.slane %v5059_v16, 2  ;;  %v5065_v13 = vmax.f32 %v5064_v56, %v4903_v0  ;;  %v5332_v4 = vmax.f32 %v4903_v0, 0.0  ;;  %v6933_v23 = vpop.f32.mrb[128].mxu1 }
 0x7b8   : > { %v4906_v49 = vadd.f32 %v6933_v23, %v4836_v63  ;;  %v4736_v9 = vpop.f32.mrb[129].mxu1 }
 0x7b9   : > { %v5061_v62 = vmax.f32 %v5059_v16, %v5060_v35  ;;  %v4905_v25 = vadd.f32 %v4836_v63, %v4736_v9  ;;  %v5066_v20 = vmax.f32 %v5065_v13, %v4904_v44  ;;  %7091 = vmatprep.mubr.f32.mxu1 %v5332_v4  ;;  %v10755_v4 = vmov 0.0  }
 0x7ba   : > { %7092 = vmatmul.mubr.f32.gmra.mrb[156].mxu1 %v5333_v39  ;;  %v5335_v33 = vmax.f32 %v4906_v49, 0.0 }
 0x7bb   : > { %v5062_v27 = vrot.slane %v5061_v62, 1  ;;  %v5067_v42 = vmax.f32 %v5066_v20, %v4905_v25  ;;  %v5334_v11 = vmax.f32 %v4905_v25, 0.0  ;;  %v6936_v40 = vpop.f32.mrb[130].mxu1  ;;  %v5274_v25 = vmax.f32 %v10012_v30, 0.0 }
 0x7bc   : > { %v4908_v54 = vadd.f32 %v6936_v40, %v4836_v63  ;;  %v4746_v50 = vpop.f32.mrb[131].mxu1  ;;  %v5284_v30 = vmax.f32 %v10048_v37, 0.0  ;;  %v5294_v37 = vmax.f32 %v10078_v32, 0.0  ;;  %v10757_v32 = vld [vmem:[#allocation35_spill] sm:$0xff] }
 0x7bd   : > { %v5063_v58 = vmax.f32 %v5061_v62, %v5062_v27  ;;  %v4907_v36 = vadd.f32 %v4836_v63, %v4746_v50  ;;  %v5068_v56 = vmax.f32 %v5067_v42, %v4906_v49  ;;  %7094 = vmatprep.mubr.f32.mxu1 %v5334_v11  ;;  %v10759_v27 = vld [vmem:[#allocation23_spill] sm:$0xff]  ;;  %v10761_v11 = vld [vmem:[#allocation46_spill] sm:$0xff] }
 0x7be   : > { %7095 = vmatmul.mubr.f32.gmra.mrb[158].mxu1 %v5335_v33  ;;  %v5337_v16 = vmax.f32 %v4908_v54, 0.0 }
 0x7bf   : > { %v5083_v41 = vmax.f32 %v5063_v58, 0.0  ;;  %v5069_v2 = vmax.f32 %v5068_v56, %v4907_v36  ;;  %v5336_v0 = vmax.f32 %v4907_v36, 0.0 }
 0x7c1   : > { %v5070_v35 = vmax.f32 %v5069_v2, %v4908_v54  ;;  %7097 = vmatprep.mubr.f32.mxu1 %v5336_v0  ;;  %v5121_v44 = vsel %vm3183_vm6, %v5083_v41, %v5120_v10 }
 0x7c2   : > { %7098 = vmatmul.mubr.f32.gmra.mrb[160].mxu1 %v5337_v16 }
 0x7c3   : > { %v5071_v13 = vrot.slane %v5070_v35, 4  ;;  %7132 = vmatprep.mubr.msk.f32.mxu1 %vm7804_vm4, %v10755_v4 }
 0x7c5   : > { %v5072_v23 = vmax.f32 %v5070_v35, %v5071_v13 }
 0x7c7   : > { %v5073_v39 = vrot.slane %v5072_v23, 2 }
 0x7c9   : > { %v5074_v9 = vmax.f32 %v5072_v23, %v5073_v39  ;;  %v6053_v23 = vld [vmem:[%s10474_s11] sm:$0xff]  ;;  %v6054_v39 = vld [vmem:[%s10474_s11 + $0x8] sm:$0xff] }
 0x7cb   : > { %v5075_v63 = vrot.slane %v5074_v9, 1 }
 0x7cd   : > { %v5076_v49 = vmax.f32 %v5074_v9, %v5075_v63  ;;  %v7352_v9 = vpack.c.bf16 %v6054_v39, %v6053_v23 }
 0x7cf   : > { %v5084_v62 = vmax.f32 %v5076_v49, 0.0  ;;  %7353 = vmatpush3.bf16.msra.mxu1 %v7352_v9 }
 0x7d1   : > { %v5122_v20 = vsel %vm3185_vm7, %v5084_v62, %v5121_v44  ;;  %v10763_v62 = vmov 0.0|0.0  }
 0x7d2   : > { %6970 = vmatmul.mubr.f32.vlgmr.msra.gmra.mrb[128].mxu0 %v5122_v20  ;;  %7354 = vmatprep.subr.bf16.mxu1 %v10763_v62 }
 0x7d3   : > { %7322 = vmatpush3.bf16.msra.mxu0 %v9966_v17  ;;  %7004 = vmatprep.mubr.f32.mxu0 %v5274_v25  ;;  %v5275_v17 = vmax.f32 %v10010_v22, 0.0  ;;  %v5283_v22 = vmax.f32 %v10039_v26, 0.0  ;;  %v5291_v26 = vmax.f32 %v10064_v28, 0.0  ;;  %v5299_v28 = vmax.f32 %v10091_v45, 0.0 }
 0x7d4   : > { %7324 = vmatprep.subr.bf16.mxu0 %v9970_v61  ;;  %v5306_v45 = vmax.f32 %v10761_v11, 0.0 }
 0x7d7   : > { %7326 = vmatpush3.bf16.msra.mxu0 %v9970_v61  ;;  %v5276_v61 = vmax.f32 %v10019_v53, 0.0  ;;  %v5286_v53 = vmax.f32 %v10053_v14, 0.0  ;;  %v5296_v14 = vmax.f32 %v10086_v59, 0.0  ;;  %v10758_v59 = vld [vmem:[#allocation30_spill] sm:$0xff] }
 0x7d8   : > { %7328 = vmatprep.subr.bf16.mxu0 %v9974_v43  ;;  %v5303_v10 = vmax.f32 %v10758_v59, 0.0  ;;  %v6067_v59 = vld [vmem:[%s10474_s11 + $0x70] sm:$0xff] }
 0x7db   : > { %7330 = vmatpush3.bf16.msra.mxu0 %v9974_v43  ;;  %v5277_v43 = vmax.f32 %v10017_v1, 0.0  ;;  %v5285_v1 = vmax.f32 %v10046_v60, 0.0  ;;  %v5293_v60 = vmax.f32 %v10071_v12, 0.0  ;;  %v10756_v12 = vld [vmem:[#allocation43_spill] sm:$0xff] }
 0x7dc   : > { %7332 = vmatprep.subr.bf16.mxu0 %v9978_v5 }
 0x7df   : > { %7334 = vmatpush3.bf16.msra.mxu0 %v9978_v5  ;;  %v5278_v5 = vmax.f32 %v10024_v7, 0.0  ;;  %v5288_v7 = vmax.f32 %v10059_v31, 0.0  ;;  %v5298_v31 = vmax.f32 %v10095_v57, 0.0  ;;  %v10760_v57 = vld [vmem:[#allocation31_spill] sm:$0xff] }
 0x7e0   : > { %7336 = vmatprep.subr.bf16.mxu0 %v9982_v34  ;;  %v5305_v42 = vmax.f32 %v10760_v57, 0.0 }
 0x7e3   : > { %7338 = vmatpush3.bf16.msra.mxu0 %v9982_v34  ;;  %v5279_v34 = vmax.f32 %v10022_v15, 0.0  ;;  %v5287_v15 = vmax.f32 %v10051_v6, 0.0  ;;  %v5295_v6 = vmax.f32 %v10076_v47, 0.0  ;;  %v5302_v47 = vmax.f32 %v10757_v32, 0.0  ;;  %v6066_v32 = vld [vmem:[%s10474_s11 + $0x68] sm:$0xff] }
 0x7e4   : > { %7340 = vmatprep.subr.bf16.mxu0 %v9986_v55 }
 0x7e7   : > { %7342 = vmatpush3.bf16.msra.mxu0 %v9986_v55  ;;  %v5280_v55 = vmax.f32 %v10033_v48, 0.0  ;;  %v5290_v48 = vmax.f32 %v10067_v51, 0.0  ;;  %v5300_v51 = vmax.f32 %v10103_v46, 0.0  ;;  %v10762_v46 = vld [vmem:[#allocation37_spill] sm:$0xff] }
 0x7e8   : > { %7344 = vmatprep.subr.bf16.mxu0 %v9990_v19  ;;  %v5307_v40 = vmax.f32 %v10762_v46, 0.0 }
 0x7eb   : > { %7346 = vmatpush3.bf16.msra.mxu0 %v9990_v19  ;;  %v5281_v19 = vmax.f32 %v10031_v29, 0.0  ;;  %v5289_v29 = vmax.f32 %v10057_v21, 0.0  ;;  %v5297_v21 = vmax.f32 %v10084_v52, 0.0  ;;  %v5304_v52 = vmax.f32 %v10759_v27, 0.0  ;;  %v6297_v27 = vld [vmem:[%s10473_s10] ss:$0 sm:$0xff] }
 0x7ec   : > { %7348 = vmatprep.subr.bf16.mxu0 %v9994_v18 }
 0x7ef   : > { %7350 = vmatpush3.bf16.msra.mxu0 %v9994_v18  ;;  %v5282_v18 = vmax.f32 %v10042_v3, 0.0  ;;  %v5292_v3 = vmax.f32 %v10073_v38, 0.0  ;;  %v5301_v38 = vmax.f32 %v10756_v12, 0.0 }
 0x7f2   : > { %7005 = vmatmul.mubr.f32.vlgmr.msra.gmra.mrb[130].mxu0 %v5275_v17 }
 0x7f3   : > { %7007 = vmatprep.mubr.f32.mxu0 %v5276_v61 }
 0x7f6   : > { %7008 = vmatmul.mubr.f32.gmra.mrb[132].mxu0 %v5277_v43 }
 0x7f7   : > { %7010 = vmatprep.mubr.f32.mxu0 %v5278_v5 }
 0x7fa   : > { %7011 = vmatmul.mubr.f32.gmra.mrb[134].mxu0 %v5279_v34  ;;  %v6055_v34 = vld [vmem:[%s10474_s11 + $0x10] sm:$0xff] }
 0x7fb   : > { %7013 = vmatprep.mubr.f32.mxu0 %v5280_v55  ;;  %v6056_v55 = vld [vmem:[%s10474_s11 + $0x18] sm:$0xff] }
 0x7fe   : > { %7014 = vmatmul.mubr.f32.gmra.mrb[136].mxu0 %v5281_v19  ;;  %v6057_v19 = vld [vmem:[%s10474_s11 + $0x20] sm:$0xff] }
 0x7ff   : > { %7016 = vmatprep.mubr.f32.mxu0 %v5282_v18  ;;  %v7355_v18 = vpack.c.bf16 %v6056_v55, %v6055_v34 }
 0x801   : > { %7356 = vmatpush3.bf16.msra.mxu1 %v7355_v18 }
 0x802   : > { %7017 = vmatmul.mubr.f32.gmra.mrb[138].mxu0 %v5283_v22  ;;  %v6058_v22 = vld [vmem:[%s10474_s11 + $0x28] sm:$0xff]  ;;  %7357 = vmatprep.subr.bf16.mxu1 %v10763_v62 }
 0x803   : > { %7019 = vmatprep.mubr.f32.mxu0 %v5284_v30 }
 0x806   : > { %7020 = vmatmul.mubr.f32.gmra.mrb[140].mxu0 %v5285_v1 }
 0x807   : > { %7022 = vmatprep.mubr.f32.mxu0 %v5286_v53  ;;  %v7358_v53 = vpack.c.bf16 %v6058_v22, %v6057_v19 }
 0x809   : > { %7359 = vmatpush3.bf16.msra.mxu1 %v7358_v53 }
 0x80a   : > { %7023 = vmatmul.mubr.f32.gmra.mrb[142].mxu0 %v5287_v15  ;;  %7360 = vmatprep.subr.bf16.mxu1 %v10763_v62 }
 0x80b   : > { %7025 = vmatprep.mubr.f32.mxu0 %v5288_v7 }
 0x80e   : > { %7026 = vmatmul.mubr.f32.gmra.mrb[144].mxu0 %v5289_v29 }
 0x80f   : > { %7028 = vmatprep.mubr.f32.mxu0 %v5290_v48 }
 0x812   : > { %7029 = vmatmul.mubr.f32.gmra.mrb[146].mxu0 %v5291_v26  ;;  %v6059_v26 = vld [vmem:[%s10474_s11 + $0x30] sm:$0xff] }
 0x813   : > { %7031 = vmatprep.mubr.f32.mxu0 %v5292_v3  ;;  %v6060_v3 = vld [vmem:[%s10474_s11 + $0x38] sm:$0xff] }
 0x816   : > { %7032 = vmatmul.mubr.f32.gmra.mrb[148].mxu0 %v5293_v60  ;;  %v7361_v60 = vpack.c.bf16 %v6060_v3, %v6059_v26 }
 0x817   : > { %7034 = vmatprep.mubr.f32.mxu0 %v5294_v37 }
 0x818   : > { %7362 = vmatpush3.bf16.msra.mxu1 %v7361_v60 }
 0x819   : > { %7363 = vmatprep.subr.bf16.mxu1 %v10763_v62 }
 0x81a   : > { %7035 = vmatmul.mubr.f32.gmra.mrb[150].mxu0 %v5295_v6 }
 0x81b   : > { %7037 = vmatprep.mubr.f32.mxu0 %v5296_v14  ;;  %v6061_v14 = vld [vmem:[%s10474_s11 + $0x40] sm:$0xff] }
 0x81e   : > { %7038 = vmatmul.mubr.f32.gmra.mrb[152].mxu0 %v5297_v21  ;;  %v6062_v21 = vld [vmem:[%s10474_s11 + $0x48] sm:$0xff] }
 0x81f   : > { %7040 = vmatprep.mubr.f32.mxu0 %v5298_v31  ;;  %v7364_v31 = vpack.c.bf16 %v6062_v21, %v6061_v14 }
 0x821   : > { %7365 = vmatpush3.bf16.msra.mxu1 %v7364_v31 }
 0x822   : > { %7041 = vmatmul.mubr.f32.gmra.mrb[154].mxu0 %v5299_v28  ;;  %7366 = vmatprep.subr.bf16.mxu1 %v10763_v62  ;;  %v6063_v28 = vld [vmem:[%s10474_s11 + $0x50] sm:$0xff] }
 0x823   : > { %7043 = vmatprep.mubr.f32.mxu0 %v5300_v51  ;;  %v6064_v51 = vld [vmem:[%s10474_s11 + $0x58] sm:$0xff] }
 0x824   : > { %v7367_v12 = vpack.c.bf16 %v6064_v51, %v6063_v28 }
 0x826   : > { %7044 = vmatmul.mubr.f32.gmra.mrb[156].mxu0 %v5301_v38  ;;  %v6065_v38 = vld [vmem:[%s10474_s11 + $0x60] sm:$0xff]  ;;  %7368 = vmatpush3.bf16.msra.mxu1 %v7367_v12 }
 0x827   : > { %7046 = vmatprep.mubr.f32.mxu0 %v5302_v47  ;;  %v7370_v47 = vpack.c.bf16 %v6066_v32, %v6065_v38  ;;  %7369 = vmatprep.subr.bf16.mxu1 %v10763_v62 }
 0x82a   : > { %7047 = vmatmul.mubr.f32.gmra.mrb[158].mxu0 %v5303_v10  ;;  %v6068_v10 = vld [vmem:[%s10474_s11 + $0x78] sm:$0xff]  ;;  %7371 = vmatpush3.bf16.msra.mxu1 %v7370_v47 }
 0x82b   : > { %7049 = vmatprep.mubr.f32.mxu0 %v5304_v52  ;;  %v7373_v52 = vpack.c.bf16 %v6068_v10, %v6067_v59  ;;  %7372 = vmatprep.subr.bf16.mxu1 %v10763_v62 }
 0x82e   : > { %7050 = vmatmul.mubr.f32.gmra.mrb[160].mxu0 %v5305_v42  ;;  %7374 = vmatpush3.bf16.msra.mxu1 %v7373_v52 }
 0x82f   : > { %7052 = vmatprep.mubr.f32.mxu0 %v5306_v45 }
 0x832   : > { %7053 = vmatmul.mubr.f32.gmra.mrb[162].mxu0 %v5307_v40 }
 0x85d   : > { %v10199_v33 = vpop.f32.mrb[132].mxu1 }
 0x85e   : > { %v10201_v54 = vpop.f32.mrb[133].mxu1 }
 0x861   : > { %v10203_v50 = vpop.f32.mrb[134].mxu1 }
 0x862   : > { %v10205_v58 = vpop.f32.mrb[135].mxu1 }
 0x865   : > { %v10207_v36 = vpop.f32.mrb[136].mxu1 }
 0x866   : > { %v10209_v56 = vpop.f32.mrb[137].mxu1 }
 0x869   : > { %v10211_v41 = vpop.f32.mrb[138].mxu1 }
 0x86a   : > { %v10213_v2 = vpop.f32.mrb[139].mxu1 }
 0x86d   : > { %v10215_v0 = vpop.f32.mrb[140].mxu1 }
 0x86e   : > { %v10217_v16 = vpop.f32.mrb[141].mxu1 }
 0x871   : > { %v10219_v35 = vpop.f32.mrb[142].mxu1 }
 0x872   : > { %v10221_v44 = vpop.f32.mrb[143].mxu1 }
 0x875   : > { %v10223_v13 = vpop.f32.mrb[144].mxu1 }
 0x876   : > { %v10225_v4 = vpop.f32.mrb[145].mxu1 }
 0x879   : > { %v10233_v63 = vpop.f32.mrb[146].mxu1 }
 0x87a   : > { %v10235_v49 = vpop.f32.mrb[147].mxu1 }
 0x87d   : > { %v10238_v25 = vpop.f32.mrb[148].mxu1 }
 0x87e   : > { %v10240_v20 = vpop.f32.mrb[149].mxu1 }
 0x881   : > { %v10242_v17 = vpop.f32.mrb[150].mxu1 }
 0x882   : > { %v10244_v61 = vpop.f32.mrb[151].mxu1 }
 0x885   : > { %v10246_v43 = vpop.f32.mrb[152].mxu1 }
 0x886   : > { %v10248_v5 = vpop.f32.mrb[153].mxu1 }
 0x889   : > { %v10262_v30 = vpop.f32.mrb[154].mxu1 }
 0x88a   : > { %v10264_v1 = vpop.f32.mrb[155].mxu1 }
 0x88d   : > { %v10267_v15 = vpop.f32.mrb[156].mxu1 }
 0x88e   : > { %v10269_v7 = vpop.f32.mrb[157].mxu1 }
 0x891   : > { %v10272_v29 = vpop.f32.mrb[158].mxu1 }
 0x892   : > { %v10274_v48 = vpop.f32.mrb[159].mxu1 }
 0x895   : > { %v10282_v37 = vpop.f32.mrb[160].mxu1 }
 0x896   : > { %v10284_v6 = vpop.f32.mrb[161].mxu1 }
 0x8a5   : > { %v5190_v57 = vpop.f32.mrb[128].mxu0 }
 0x8a6   : > { %v5191_v42 = vadd.f32 %v6297_v27, %v5190_v57  ;;  %v6971_v11 = vpop.f32.mrb[129].mxu0 }
 0x8a8   : > { %v5724_v45 = vcombine.high %v5191_v42, %v5191_v42 }
 0x8aa   : > { %v5738_v46 = vrot.slane %v5724_v45, %v10746_v8 }
 0x8ac   : > { %v5740_v40 = vcombine.high %v5738_v46, %v5738_v46  ;;  %v5754_v23 = vrot.slane %v5738_v46, %v10746_v8 }
 0x8ae   : > { %v5768_v39 = vrot.slane %v5740_v40, %v10746_v8  ;;  %v5770_v9 = vcombine.high %v5754_v23, %v5754_v23  ;;  %v10321_v34 = vrot.slane %v5754_v23, %v10747_v24 }
 0x8b0   : > { %v5772_v55 = vcombine.high %v5768_v39, %v5768_v39  ;;  %v5796_v19 = vrot.slane %v5768_v39, %v10747_v24  ;;  %v5800_v62 = vrot.slane %v5770_v9, %v10747_v24  ;;  %v10327_v18 = vadd.f32 %v10321_v34, %v10201_v54 }
 0x8b1   : > { %v10331_v22 = vadd.f32 %v10199_v33, %v10321_v34  ;;  %v10335_v53 = vadd.f32 %v10321_v34, %v10205_v58  ;;  %v10339_v26 = vadd.f32 %v10203_v50, %v10321_v34  ;;  %v10344_v60 = vadd.f32 %v10321_v34, %v10209_v56 }
 0x8b2   : > { %v5804_v3 = vrot.slane %v5772_v55, %v10747_v24  ;;  %v10348_v54 = vadd.f32 %v10207_v36, %v10321_v34  ;;  %v5853_v33 = vadd.f32 %v5796_v19, %v10213_v2  ;;  %v5854_v14 = vadd.f32 %v10211_v41, %v5796_v19 }
 0x8b3   : > { %v5855_v58 = vadd.f32 %v5796_v19, %v10217_v16  ;;  %v5856_v21 = vadd.f32 %v10215_v0, %v5796_v19  ;;  %v5857_v50 = vadd.f32 %v5796_v19, %v10221_v44  ;;  %v5858_v31 = vadd.f32 %v10219_v35, %v5796_v19 }
 0x8b4   : > { %v5859_v28 = vadd.f32 %v5796_v19, %v10225_v4  ;;  %v5860_v56 = vadd.f32 %v10223_v13, %v5796_v19  ;;  %v5861_v51 = vadd.f32 %v5800_v62, %v10235_v49  ;;  %v5862_v36 = vadd.f32 %v10233_v63, %v5800_v62 }
 0x8b5   : > { %v5863_v2 = vadd.f32 %v5800_v62, %v10240_v20  ;;  %v5864_v41 = vadd.f32 %v10238_v25, %v5800_v62  ;;  %v5865_v16 = vadd.f32 %v5800_v62, %v10244_v61  ;;  %v5866_v0 = vadd.f32 %v10242_v17, %v5800_v62 }
 0x8b6   : > { %v5867_v44 = vadd.f32 %v5800_v62, %v10248_v5  ;;  %v5868_v35 = vadd.f32 %v10246_v43, %v5800_v62  ;;  %v5869_v4 = vadd.f32 %v5804_v3, %v10264_v1  ;;  %v5870_v13 = vadd.f32 %v10262_v30, %v5804_v3 }
 0x8b7   : > { %v5871_v49 = vadd.f32 %v5804_v3, %v10269_v7  ;;  %v5872_v63 = vadd.f32 %v10267_v15, %v5804_v3  ;;  %v5873_v20 = vadd.f32 %v5804_v3, %v10274_v48  ;;  %v5874_v25 = vadd.f32 %v10272_v29, %v5804_v3 }
 0x8b8   : > { %v5875_v61 = vadd.f32 %v5804_v3, %v10284_v6  ;;  %v5876_v17 = vadd.f32 %v10282_v37, %v5804_v3  ;;  %v6006_v12 = vmax.f32 %v5853_v33, %v5854_v14  ;;  %v6019_v5 = vmax.f32 %v5861_v51, %v5862_v36 }
 0x8b9   : > { %v6032_v38 = vmax.f32 %v5869_v4, %v5870_v13  ;;  %v5731_v30 = vrot.slane %v5191_v42, %v10746_v8 }
 0x8ba   : > { %v6007_v43 = vmax.f32 %v6006_v12, %v5855_v58  ;;  %v6020_v32 = vmax.f32 %v6019_v5, %v5863_v2 }
 0x8bb   : > { %v6033_v1 = vmax.f32 %v6032_v38, %v5871_v49  ;;  %v5747_v29 = vrot.slane %v5731_v30, %v10746_v8  ;;  %v5739_v58 = vcombine.high %v5731_v30, %v5731_v30 }
 0x8bc   : > { %v6008_v47 = vmax.f32 %v6007_v43, %v5856_v21  ;;  %v6021_v7 = vmax.f32 %v6020_v32, %v5864_v41 }
 0x8bd   : > { %v6034_v59 = vmax.f32 %v6033_v1, %v5872_v63  ;;  %v5776_v45 = vrot.slane %v5747_v29, %v10747_v24  ;;  %v10384_v36 = vrot.slane %v5739_v58, %v10746_v8 }
 0x8be   : > { %v6009_v15 = vmax.f32 %v6008_v47, %v5857_v50  ;;  %v6022_v10 = vmax.f32 %v6021_v7, %v5865_v16 }
 0x8bf   : > { %v6035_v48 = vmax.f32 %v6034_v59, %v5873_v20  ;;  %v5780_v4 = vrot.slane %v10384_v36, %v10747_v24 }
 0x8c0   : > { %v6010_v27 = vmax.f32 %v6009_v15, %v5858_v31  ;;  %v6023_v6 = vmax.f32 %v6022_v10, %v5866_v0  ;;  %v5769_v15 = vcombine.high %v5747_v29, %v5747_v29 }
 0x8c1   : > { %v6036_v52 = vmax.f32 %v6035_v48, %v5874_v25 }
 0x8c2   : > { %v6011_v37 = vmax.f32 %v6010_v27, %v5859_v28  ;;  %v6024_v57 = vmax.f32 %v6023_v6, %v5867_v44 }
 0x8c3   : > { %v6037_v11 = vmax.f32 %v6036_v52, %v5875_v61 }
 0x8c4   : > { %v10377_v46 = vmax.f32 %v6011_v37, %v5860_v56  ;;  %v10379_v42 = vmax.f32 %v6024_v57, %v5868_v35 }
 0x8c5   : > { %v7006_v40 = vpop.f32.mrb[130].mxu0  ;;  %v10381_v23 = vmax.f32 %v6037_v11, %v5876_v17  ;;  %v5784_v11 = vrot.slane %v5769_v15, %v10747_v24 }
 0x8c6   : > { %v5814_v39 = vadd.f32 %v7006_v40, %v5776_v45  ;;  %v5404_v9 = vpop.f32.mrb[131].mxu0 }
 0x8c7   : > { %v5813_v55 = vadd.f32 %v5776_v45, %v5404_v9 }
 0x8c9   : > { %v5941_v19 = vmax.f32 %v5813_v55, %v5814_v39  ;;  %v7009_v62 = vpop.f32.mrb[132].mxu0 }
 0x8ca   : > { %v5816_v3 = vadd.f32 %v7009_v62, %v5776_v45  ;;  %v5414_v33 = vpop.f32.mrb[133].mxu0 }
 0x8cb   : > { %v5815_v14 = vadd.f32 %v5776_v45, %v5414_v33 }
 0x8cd   : > { %v5942_v21 = vmax.f32 %v5941_v19, %v5815_v14  ;;  %v7012_v50 = vpop.f32.mrb[134].mxu0 }
 0x8ce   : > { %v5818_v31 = vadd.f32 %v7012_v50, %v5776_v45  ;;  %v5424_v28 = vpop.f32.mrb[135].mxu0 }
 0x8cf   : > { %v5817_v56 = vadd.f32 %v5776_v45, %v5424_v28  ;;  %v5943_v51 = vmax.f32 %v5942_v21, %v5816_v3 }
 0x8d1   : > { %v5944_v2 = vmax.f32 %v5943_v51, %v5817_v56  ;;  %v7015_v41 = vpop.f32.mrb[136].mxu0 }
 0x8d2   : > { %v5820_v16 = vadd.f32 %v7015_v41, %v5776_v45  ;;  %v5434_v0 = vpop.f32.mrb[137].mxu0 }
 0x8d3   : > { %v5819_v44 = vadd.f32 %v5776_v45, %v5434_v0  ;;  %v5945_v35 = vmax.f32 %v5944_v2, %v5818_v31 }
 0x8d5   : > { %v5946_v13 = vmax.f32 %v5945_v35, %v5819_v44  ;;  %v7018_v49 = vpop.f32.mrb[138].mxu0 }
 0x8d6   : > { %v5822_v63 = vadd.f32 %v7018_v49, %v5780_v4  ;;  %v5444_v20 = vpop.f32.mrb[139].mxu0 }
 0x8d7   : > { %v5947_v25 = vmax.f32 %v5946_v13, %v5820_v16  ;;  %v5821_v61 = vadd.f32 %v5780_v4, %v5444_v20 }
 0x8d9   : > { %v5954_v17 = vmax.f32 %v5821_v61, %v5822_v63  ;;  %v7021_v12 = vpop.f32.mrb[140].mxu0  ;;  %v5948_v43 = vrot.slane %v5947_v25, 4 }
 0x8da   : > { %v5824_v5 = vadd.f32 %v7021_v12, %v5780_v4  ;;  %v5454_v8 = vpop.f32.mrb[141].mxu0 }
 0x8db   : > { %v5823_v38 = vadd.f32 %v5780_v4, %v5454_v8  ;;  %v5949_v10 = vmax.f32 %v5947_v25, %v5948_v43 }
 0x8dd   : > { %v5955_v32 = vmax.f32 %v5954_v17, %v5823_v38  ;;  %v7024_v1 = vpop.f32.mrb[142].mxu0  ;;  %v5950_v45 = vrot.slane %v5949_v10, 2 }
 0x8de   : > { %v5826_v30 = vadd.f32 %v7024_v1, %v5780_v4  ;;  %v5464_v47 = vpop.f32.mrb[143].mxu0 }
 0x8df   : > { %v5825_v7 = vadd.f32 %v5780_v4, %v5464_v47  ;;  %v5956_v59 = vmax.f32 %v5955_v32, %v5824_v5  ;;  %v5951_v3 = vmax.f32 %v5949_v10, %v5950_v45 }
 0x8e1   : > { %v5957_v48 = vmax.f32 %v5956_v59, %v5825_v7  ;;  %v7027_v27 = vpop.f32.mrb[144].mxu0  ;;  %v5952_v28 = vrot.slane %v5951_v3, 1 }
 0x8e2   : > { %v5828_v6 = vadd.f32 %v7027_v27, %v5780_v4  ;;  %v5474_v52 = vpop.f32.mrb[145].mxu0 }
 0x8e3   : > { %v5827_v37 = vadd.f32 %v5780_v4, %v5474_v52  ;;  %v5958_v57 = vmax.f32 %v5957_v48, %v5826_v30  ;;  %v5771_v4 = vcombine.high %v10384_v36, %v10384_v36  ;;  %v5953_v13 = vmax.f32 %v5951_v3, %v5952_v28 }
 0x8e5   : > { %v5959_v40 = vmax.f32 %v5958_v57, %v5827_v37  ;;  %v7030_v39 = vpop.f32.mrb[146].mxu0  ;;  %v5788_v8 = vrot.slane %v5771_v4, %v10747_v24  ;;  %v6045_v38 = vmax.f32 %v5953_v13, 0.0  ;;  %v6013_v13 = vrot.slane %v10377_v46, 4 }
 0x8e6   : > { %v5830_v9 = vadd.f32 %v7030_v39, %v5784_v11  ;;  %v5484_v55 = vpop.f32.mrb[147].mxu0 }
 0x8e7   : > { %v5960_v19 = vmax.f32 %v5959_v40, %v5828_v6  ;;  %v5829_v62 = vadd.f32 %v5784_v11, %v5484_v55 }
 0x8e9   : > { %v5961_v33 = vrot.slane %v5960_v19, 4  ;;  %v5967_v14 = vmax.f32 %v5829_v62, %v5830_v9  ;;  %v7033_v29 = vpop.f32.mrb[148].mxu0 }
 0x8ea   : > { %v5832_v58 = vadd.f32 %v7033_v29, %v5784_v11  ;;  %v5494_v21 = vpop.f32.mrb[149].mxu0 }
 0x8eb   : > { %v5962_v50 = vmax.f32 %v5960_v19, %v5961_v33  ;;  %v5831_v31 = vadd.f32 %v5784_v11, %v5494_v21 }
 0x8ed   : > { %v5963_v56 = vrot.slane %v5962_v50, 2  ;;  %v5968_v51 = vmax.f32 %v5967_v14, %v5831_v31  ;;  %v7036_v2 = vpop.f32.mrb[150].mxu0 }
 0x8ee   : > { %v5834_v41 = vadd.f32 %v7036_v2, %v5784_v11  ;;  %v5504_v16 = vpop.f32.mrb[151].mxu0 }
 0x8ef   : > { %v5964_v0 = vmax.f32 %v5962_v50, %v5963_v56  ;;  %v5833_v44 = vadd.f32 %v5784_v11, %v5504_v16  ;;  %v5969_v35 = vmax.f32 %v5968_v51, %v5832_v58 }
 0x8f1   : > { %v5965_v49 = vrot.slane %v5964_v0, 1  ;;  %v5970_v63 = vmax.f32 %v5969_v35, %v5833_v44  ;;  %v7039_v20 = vpop.f32.mrb[152].mxu0 }
 0x8f2   : > { %v5836_v25 = vadd.f32 %v7039_v20, %v5784_v11  ;;  %v5514_v61 = vpop.f32.mrb[153].mxu0  ;;  %v6026_v20 = vrot.slane %v10379_v42, 4 }
 0x8f3   : > { %v5966_v17 = vmax.f32 %v5964_v0, %v5965_v49  ;;  %v5835_v12 = vadd.f32 %v5784_v11, %v5514_v61  ;;  %v5971_v5 = vmax.f32 %v5970_v63, %v5834_v41 }
 0x8f5   : > { %v6046_v43 = vmax.f32 %v5966_v17, 0.0  ;;  %v5972_v32 = vmax.f32 %v5971_v5, %v5835_v12  ;;  %v7042_v1 = vpop.f32.mrb[154].mxu0  ;;  %v6014_v12 = vmax.f32 %v10377_v46, %v6013_v13 }
 0x8f6   : > { %v5838_v30 = vadd.f32 %v7042_v1, %v5788_v8  ;;  %v5524_v47 = vpop.f32.mrb[155].mxu0 }
 0x8f7   : > { %v6084_v7 = vsel %vm3173_vm0, %v6046_v43, %v6045_v38  ;;  %v5973_v36 = vmax.f32 %v5972_v32, %v5836_v25  ;;  %v5837_v59 = vadd.f32 %v5788_v8, %v5524_v47  ;;  %v6039_v25 = vrot.slane %v10381_v23, 4 }
 0x8f9   : > { %v5974_v15 = vrot.slane %v5973_v36, 4  ;;  %v5980_v10 = vmax.f32 %v5837_v59, %v5838_v30  ;;  %v7045_v48 = vpop.f32.mrb[156].mxu0 }
 0x8fa   : > { %v5840_v27 = vadd.f32 %v7045_v48, %v5788_v8  ;;  %v5534_v6 = vpop.f32.mrb[157].mxu0 }
 0x8fb   : > { %v5975_v52 = vmax.f32 %v5973_v36, %v5974_v15  ;;  %v5839_v37 = vadd.f32 %v5788_v8, %v5534_v6 }
 0x8fd   : > { %v5976_v57 = vrot.slane %v5975_v52, 2  ;;  %v5981_v11 = vmax.f32 %v5980_v10, %v5839_v37  ;;  %v7048_v24 = vpop.f32.mrb[158].mxu0 }
 0x8fe   : > { %v5842_v45 = vadd.f32 %v7048_v24, %v5788_v8  ;;  %v5544_v40 = vpop.f32.mrb[159].mxu0 }
 0x8ff   : > { %v5977_v39 = vmax.f32 %v5975_v52, %v5976_v57  ;;  %v5841_v9 = vadd.f32 %v5788_v8, %v5544_v40  ;;  %v5982_v55 = vmax.f32 %v5981_v11, %v5840_v27 }
 0x901   : > { %v5978_v19 = vrot.slane %v5977_v39, 1  ;;  %v5983_v62 = vmax.f32 %v5982_v55, %v5841_v9  ;;  %v7051_v3 = vpop.f32.mrb[160].mxu0  ;;  %v6298_v55 = vld [vmem:[%s10765_s15] ss:$0 sm:$0xff] }
 0x902   : > { %v5844_v33 = vadd.f32 %v7051_v3, %v5788_v8  ;;  %v5554_v14 = vpop.f32.mrb[161].mxu0 }
 0x903   : > { %v5979_v29 = vmax.f32 %v5977_v39, %v5978_v19  ;;  %v5843_v58 = vadd.f32 %v5788_v8, %v5554_v14  ;;  %v5984_v21 = vmax.f32 %v5983_v62, %v5842_v45  ;;  %v6027_v8 = vmax.f32 %v10379_v42, %v6026_v20 }
 0x905   : > { %v6047_v50 = vmax.f32 %v5979_v29, 0.0  ;;  %v5985_v31 = vmax.f32 %v5984_v21, %v5843_v58  ;;  %v7054_v28 = vpop.f32.mrb[162].mxu0  ;;  %v6028_v30 = vrot.slane %v6027_v8, 2 }
 0x906   : > { %v5846_v56 = vadd.f32 %v7054_v28, %v10321_v34  ;;  %v5564_v51 = vpop.f32.mrb[163].mxu0 }
 0x907   : > { %v6085_v2 = vsel %vm3175_vm1, %v6047_v50, %v6084_v7  ;;  %v5986_v41 = vmax.f32 %v5985_v31, %v5844_v33  ;;  %v5845_v16 = vadd.f32 %v10321_v34, %v5564_v51  ;;  %v6029_v59 = vmax.f32 %v6027_v8, %v6028_v30 }
 0x909   : > { %v5987_v0 = vrot.slane %v5986_v41, 4  ;;  %v5993_v44 = vmax.f32 %v5845_v16, %v5846_v56 }
 0x90b   : > { %v5988_v35 = vmax.f32 %v5986_v41, %v5987_v0  ;;  %v5994_v4 = vmax.f32 %v5993_v44, %v10327_v18  ;;  %v6040_v18 = vmax.f32 %v10381_v23, %v6039_v25  ;;  %v6030_v23 = vrot.slane %v6029_v59, 1 }
 0x90d   : > { %v5989_v49 = vrot.slane %v5988_v35, 2  ;;  %v5995_v63 = vmax.f32 %v5994_v4, %v10331_v22  ;;  %v6015_v22 = vrot.slane %v6014_v12, 2  ;;  %v6041_v47 = vrot.slane %v6040_v18, 2 }
 0x90f   : > { %v5990_v61 = vmax.f32 %v5988_v35, %v5989_v49  ;;  %v5996_v17 = vmax.f32 %v5995_v63, %v10335_v53  ;;  %v6016_v46 = vmax.f32 %v6014_v12, %v6015_v22 }
 0x911   : > { %v5991_v34 = vrot.slane %v5990_v61, 1  ;;  %v5997_v5 = vmax.f32 %v5996_v17, %v10339_v26  ;;  %v6042_v26 = vmax.f32 %v6040_v18, %v6041_v47  ;;  %v6017_v42 = vrot.slane %v6016_v46, 1 }
 0x913   : > { %v5992_v38 = vmax.f32 %v5990_v61, %v5991_v34  ;;  %v5998_v43 = vmax.f32 %v5997_v5, %v10344_v60  ;;  %v6043_v48 = vrot.slane %v6042_v26, 1  ;;  %v6018_v27 = vmax.f32 %v6016_v46, %v6017_v42 }
 0x915   : > { %v6048_v32 = vmax.f32 %v5992_v38, 0.0  ;;  %v5999_v1 = vmax.f32 %v5998_v43, %v10348_v54  ;;  %v6031_v54 = vmax.f32 %v6029_v59, %v6030_v23  ;;  %v6044_v52 = vmax.f32 %v6042_v26, %v6043_v48 }
 0x916   : > { %v6050_v57 = vmax.f32 %v6018_v27, 0.0 }
 0x917   : > { %v6000_v7 = vrot.slane %v5999_v1, 4  ;;  %v6086_v53 = vsel %vm3177_vm2, %v6048_v32, %v6085_v2  ;;  %v6051_v11 = vmax.f32 %v6031_v54, 0.0  ;;  %v6052_v45 = vmax.f32 %v6044_v52, 0.0 }
 0x919   : > { %v6001_v36 = vmax.f32 %v5999_v1, %v6000_v7 }
 0x91b   : > { %v6002_v15 = vrot.slane %v6001_v36, 2 }
 0x91d   : > { %v6003_v10 = vmax.f32 %v6001_v36, %v6002_v15 }
 0x91f   : > { %v6004_v60 = vrot.slane %v6003_v10, 1 }
 0x921   : > { %v6005_v6 = vmax.f32 %v6003_v10, %v6004_v60 }
 0x923   : > { %v6049_v37 = vmax.f32 %v6005_v6, 0.0 }
 0x925   : > { %v6087_v24 = vsel %vm3179_vm3, %v6049_v37, %v6086_v53 }
 0x926   : > { %v6088_v40 = vsel %vm3181_vm5, %v6050_v57, %v6087_v24 }
 0x927   : > { %v6089_v39 = vsel %vm3183_vm6, %v6051_v11, %v6088_v40 }
 0x928   : > { %v6090_v9 = vsel %vm3185_vm7, %v6052_v45, %v6089_v39 }
 0x929   : > { %7133 = vmatmul.mubr.f32.vlgmr.msra.gmra.mrb[162].mxu1 %v6090_v9 }
 0x9fc   : > { %v6158_v19 = vpop.f32.mrb[162].mxu1 }
 0x9fd   : > { %v6159_v62 = vadd.f32 %v6298_v55, %v6158_v19  ;;  %v7134_v3 = vpop.f32.mrb[163].mxu1 }
 0x9ff   : > { %6162 = vst [vmem:[%s493_s22] sm:$0xff] %v6159_v62 }
 0xa00   : > { %7731 = shalt.err (!%p7728_p0)
}
 0xa01   : > { %s7732_s18 = scalar_lea.hbm %s10421_s23, 128  ;;  %s7736_s15 = scalar_lea.hbm %s10767_s20, 256 }
 0xa02   : > { %p7733_p10 = scmp.ne.s32.totalorder %s10421_s23, %s7732_s18  ;;  %p7737_p4 = scmp.lt.u32.totalorder %s10421_s23, %s10767_s20 }
 0xa03   : > { %p7738_p12 = scmp.lt.u32.totalorder %s7736_s15, %s7732_s18  ;;  %p7740_p8 = scmp.lt.u32.totalorder %s7732_s18, %s10421_s23 }
 0xa04   : > { %p7734_p2 = pnand %p7733_p10, %p10768_p11 }
 0xa05   : > { %p7739_p7 = por %p7738_p12, %p7737_p4 }
 0xa06   : > { %p7735_p3 = pneg %p7734_p2 }
 0xa07   : > { %p7741_p13 = por %p7740_p8, %p7739_p7 }
 0xa09   : > { %p7742_p1 = pnand %p7741_p13, %p7735_p3 }
 0xa0b   : > { %7745 = shalt.err (!%p7742_p1)
}
 0xa0c   : > { %7407 = dma.vmem_to_hbm [thread:$0]  (%p10768_p11), %s10423_s16, 128, %s10421_s23, %s6164_s17  }
 0xa0d PF: > { %s10769_s30 = sld [smem:[#allocation18_spill]]  ;;  %s10770_s12 = sld [smem:[#allocation16_spill]] }
 0xa0e   : > { %s10771_s25 = sld [smem:[#allocation22_spill]] }
 0xa13   : > { %p7434_p6 = scmp.ge.s32.totalorder %s10769_s30, 2  ;;  %s6189_s14 = sand.u32 1, %s10770_s12  }
 0xa14   : > { %p10772_p9 = scmp.ne.s32.totalorder %s10771_s25, 0  ;;  %s6190_s29 = scalar_lea.sflag [#allocation5], %s6189_s14 }
 0xa16   : > { %p7423_p5 = pnand %p7434_p6, %p10772_p9 }
 0xa18   : > { %7775 = dma.done.wait (!%p7423_p5), %s6190_s29, 128  }
 0xa19   : > { %7777 = vsyncadd (!%p7423_p5), %s6190_s29, 4294967168  ;;  %s10773_s28 = sld [smem:[#allocation19_spill]]  ;;  %s10774_s13 = sld [smem:[#allocation17_spill]] }
 0xa1a   : > { %s10775_s27 = sld [smem:[#allocation20_spill]]  ;;  %s10776_s25 = smov %s7784_s26 }
 0xa1f   : > { %p26_p0 = scmp.ge.s32.totalorder %s10773_s28, 4   ;;  %s10777_s26 = smov %s10774_s13 }
 0xa21   :  { %28 = sbr.rel (!%p26_p0) target bundleno = 9 (0x9), region = 126 }
 0xa28   :  { %6195 = vsyncpa [#allocation4], 1 }
 0xa29   :  { %6197 = vsyncpa [#allocation4 + $0x1], 1 }
 0xa2a   :  { %6198 = vsyncpa [#allocation7], 1 }
 0xa2b   :  { %6199 = vsyncpa [#allocation10], 1 }
 0xa2c   :  { %6200 = vsyncpa [#allocation5], 1 }
 0xa2d   :  { %6202 = vsyncpa [#allocation5 + $0x1], 1 }

</bundles_post_ra>
